<compile_context>
chip_gen: v6e
topology: v6e:2x2x1
jax: 0.10.0
libtpu: 0.0.40
codegen_flags: <defaults>
</compile_context>

<pallas_src>
import math
from functools import partial

import jax
import jax.numpy as jnp
from jax import lax
from jax.experimental import pallas as pl
from jax.experimental.pallas import tpu as pltpu

NEG_INF = -1e30  # additive mask value (exp underflows to 0, stays finite in f32)

_VMEM_SPEC = pl.BlockSpec(memory_space=pltpu.MemorySpace.VMEM)


# ----------------------------------------------------------------------------
# In-kernel helpers (operate on traced values)
# ----------------------------------------------------------------------------

def _residual_layernorm(y, resid, gamma, beta):
    h = y + resid
    mu = jnp.mean(h, axis=-1, keepdims=True)
    c = h - mu
    var = jnp.mean(c * c, axis=-1, keepdims=True)
    return c * lax.rsqrt(var + 1e-5) * gamma + beta


def _sdpa_head(q, k, v, scale, bias):
    # q: (Lq, Dh)  k, v: (Lk, Dh)  bias: None | (1, Lk) | (Lq, Lk) additive
    s = lax.dot_general(q, k, (((1,), (1,)), ((), ())),
                        preferred_element_type=jnp.float32) * scale
    if bias is not None:
        s = s + bias
    s = s - jnp.max(s, axis=-1, keepdims=True)
    p = jnp.exp(s)
    p = p * pl.reciprocal(jnp.sum(p, axis=-1, keepdims=True), approx=True)
    return jnp.dot(p, v, preferred_element_type=jnp.float32)


# ----------------------------------------------------------------------------
# Fused Pallas kernels
# ----------------------------------------------------------------------------

def _self_attn_block_kernel(*refs, n_batch, seq, nhead, dh, scale, causal, has_kpm):
    if has_kpm:
        (x_ref, wqkv_ref, bqkv_ref, wo_ref, bo_ref, g_ref, beta_ref,
         kpm_ref, o_ref, qkv_scr, ctx_scr) = refs
    else:
        (x_ref, wqkv_ref, bqkv_ref, wo_ref, bo_ref, g_ref, beta_ref,
         o_ref, qkv_scr, ctx_scr) = refs
        kpm_ref = None
    E = nhead * dh

    xf = x_ref[...]                                               # (N*L, E)
    # fused QKV projection: one (N*L, E) @ (E, 3E) matmul
    qkv_scr[...] = (jnp.dot(xf, wqkv_ref[...], preferred_element_type=jnp.float32)
                    + bqkv_ref[...])

    causal_bias = None
    if causal:
        r = lax.broadcasted_iota(jnp.int32, (seq, seq), 0)
        c = lax.broadcasted_iota(jnp.int32, (seq, seq), 1)
        causal_bias = jnp.where(c > r, NEG_INF, 0.0).astype(jnp.float32)

    for n in range(n_batch):
        bias = causal_bias
        if kpm_ref is not None:
            row = kpm_ref[pl.ds(n, 1), :]                         # (1, L)
            bias = row if bias is None else bias + row
        for h in range(nhead):
            q = qkv_scr[pl.ds(n * seq, seq), pl.ds(h * dh, dh)]
            k = qkv_scr[pl.ds(n * seq, seq), pl.ds(E + h * dh, dh)]
            v = qkv_scr[pl.ds(n * seq, seq), pl.ds(2 * E + h * dh, dh)]
            ctx_scr[pl.ds(n * seq, seq), pl.ds(h * dh, dh)] = _sdpa_head(q, k, v, scale, bias)

    y = jnp.dot(ctx_scr[...], wo_ref[...], preferred_element_type=jnp.float32) + bo_ref[...]
    o_ref[...] = _residual_layernorm(y, xf, g_ref[...], beta_ref[...])


def _cross_attn_block_kernel(x_ref, mem_ref, wq_ref, bq_ref, wkv_ref, bkv_ref,
                             wo_ref, bo_ref, g_ref, beta_ref, o_ref,
                             q_scr, kv_scr, ctx_scr,
                             *, n_batch, lq, lk, nhead, dh, scale):
    E = nhead * dh
    xf = x_ref[...]                                               # (N*Lq, E)
    mf = mem_ref[...]                                             # (N*Lk, E)
    q_scr[...] = jnp.dot(xf, wq_ref[...], preferred_element_type=jnp.float32) + bq_ref[...]
    # fused KV projection: one (N*Lk, E) @ (E, 2E) matmul
    kv_scr[...] = jnp.dot(mf, wkv_ref[...], preferred_element_type=jnp.float32) + bkv_ref[...]

    for n in range(n_batch):
        for h in range(nhead):
            q = q_scr[pl.ds(n * lq, lq), pl.ds(h * dh, dh)]
            k = kv_scr[pl.ds(n * lk, lk), pl.ds(h * dh, dh)]
            v = kv_scr[pl.ds(n * lk, lk), pl.ds(E + h * dh, dh)]
            ctx_scr[pl.ds(n * lq, lq), pl.ds(h * dh, dh)] = _sdpa_head(q, k, v, scale, None)

    y = jnp.dot(ctx_scr[...], wo_ref[...], preferred_element_type=jnp.float32) + bo_ref[...]
    o_ref[...] = _residual_layernorm(y, xf, g_ref[...], beta_ref[...])


def _ffn_block_kernel(x_ref, w1_ref, b1_ref, w2_ref, b2_ref, g_ref, beta_ref, o_ref):
    xf = x_ref[...]
    h = jnp.dot(xf, w1_ref[...], preferred_element_type=jnp.float32) + b1_ref[...]
    h = jnp.maximum(h, 0.0)
    y = jnp.dot(h, w2_ref[...], preferred_element_type=jnp.float32) + b2_ref[...]
    o_ref[...] = _residual_layernorm(y, xf, g_ref[...], beta_ref[...])


def _ln_kernel(x_ref, g_ref, b_ref, o_ref):
    x = x_ref[...]
    mu = jnp.mean(x, axis=-1, keepdims=True)
    c = x - mu
    var = jnp.mean(c * c, axis=-1, keepdims=True)
    o_ref[...] = c * lax.rsqrt(var + 1e-5) * g_ref[...] + b_ref[...]


def _final_norm_fc_kernel(x_ref, g_ref, b_ref, w_ref, bias_ref, o_ref):
    x = x_ref[...]
    mu = jnp.mean(x, axis=-1, keepdims=True)
    c = x - mu
    var = jnp.mean(c * c, axis=-1, keepdims=True)
    xn = c * lax.rsqrt(var + 1e-5) * g_ref[...] + b_ref[...]
    o_ref[...] = jnp.dot(xn, w_ref[...], preferred_element_type=jnp.float32) + bias_ref[...]


# ----------------------------------------------------------------------------
# pallas_call wrappers (grid-less; whole slabs in VMEM — tiny at these shapes)
# ----------------------------------------------------------------------------

def self_attn_block(x, p, gamma, beta, *, n_batch, seq, nhead, causal, kpm):
    M, E = x.shape
    dh = E // nhead
    has_kpm = kpm is not None
    args = [x, p["wqkv"], p["bqkv"], p["wo"], p["bo"], gamma, beta]
    if has_kpm:
        args.append(kpm)
    kernel = partial(_self_attn_block_kernel, n_batch=n_batch, seq=seq, nhead=nhead,
                     dh=dh, scale=1.0 / math.sqrt(dh), causal=causal, has_kpm=has_kpm)
    return pl.pallas_call(
        kernel,
        out_shape=jax.ShapeDtypeStruct((M, E), jnp.float32),
        in_specs=[_VMEM_SPEC] * len(args),
        out_specs=_VMEM_SPEC,
        scratch_shapes=[pltpu.VMEM((M, 3 * E), jnp.float32),
                        pltpu.VMEM((M, E), jnp.float32)],
    )(*args)


def cross_attn_block(x, mem, p, gamma, beta, *, n_batch, lq, lk, nhead):
    M, E = x.shape
    Mk = mem.shape[0]
    dh = E // nhead
    kernel = partial(_cross_attn_block_kernel, n_batch=n_batch, lq=lq, lk=lk,
                     nhead=nhead, dh=dh, scale=1.0 / math.sqrt(dh))
    args = [x, mem, p["wq"], p["bq"], p["wkv"], p["bkv"], p["wo"], p["bo"], gamma, beta]
    return pl.pallas_call(
        kernel,
        out_shape=jax.ShapeDtypeStruct((M, E), jnp.float32),
        in_specs=[_VMEM_SPEC] * len(args),
        out_specs=_VMEM_SPEC,
        scratch_shapes=[pltpu.VMEM((M, E), jnp.float32),
                        pltpu.VMEM((Mk, 2 * E), jnp.float32),
                        pltpu.VMEM((M, E), jnp.float32)],
    )(*args)


def ffn_block(x, lp, gamma, beta):
    M, E = x.shape
    args = [x, lp["w1"], lp["b1"], lp["w2"], lp["b2"], gamma, beta]
    return pl.pallas_call(
        _ffn_block_kernel,
        out_shape=jax.ShapeDtypeStruct((M, E), jnp.float32),
        in_specs=[_VMEM_SPEC] * len(args),
        out_specs=_VMEM_SPEC,
    )(*args)


def layernorm(x, gamma, beta):
    M, E = x.shape
    return pl.pallas_call(
        _ln_kernel,
        out_shape=jax.ShapeDtypeStruct((M, E), jnp.float32),
        in_specs=[_VMEM_SPEC] * 3,
        out_specs=_VMEM_SPEC,
    )(x, gamma, beta)


def final_norm_fc(x, gamma, beta, w_pad, b_pad):
    M, _ = x.shape
    Vp = w_pad.shape[1]
    return pl.pallas_call(
        _final_norm_fc_kernel,
        out_shape=jax.ShapeDtypeStruct((M, Vp), jnp.float32),
        in_specs=[_VMEM_SPEC] * 5,
        out_specs=_VMEM_SPEC,
    )(x, gamma, beta, w_pad, b_pad)


# ----------------------------------------------------------------------------
# Forward pass (PyTorch nn.Transformer semantics, post-LN, eval mode)
# ----------------------------------------------------------------------------

def embedded_transformer_forward(params, src, trg, cfg):
    E, H, pad_idx = cfg["d_model"], cfg["nhead"], cfg["pad_idx"]
    V = cfg["trg_vocab"]
    S, N = src.shape
    T = trg.shape[0]

    # batch-major internal layout: rows ordered n*L + l
    src_b = src.T                                                  # (N, S)
    trg_b = trg.T                                                  # (N, T)
    kpm = jnp.where(src_b == pad_idx, NEG_INF, 0.0).astype(jnp.float32)   # (N, S)

    pe = params["pe"]                                              # (max_len, E)
    # embedding gather stays in XLA (no clean Pallas equivalent for tiny gathers)
    x = jnp.take(params["embed_src"], src_b, axis=0) * math.sqrt(E) + pe[:S][None]
    y = jnp.take(params["embed_trg"], trg_b, axis=0) * math.sqrt(E) + pe[:T][None]
    x = x.reshape(N * S, E).astype(jnp.float32)
    y = y.reshape(N * T, E).astype(jnp.float32)
    # TODO(synk): dropout layers are identity (eval mode); stochastic dropout not emitted.

    # --- encoder ---
    mem = x
    for lp in params["encoder_layers"]:
        mem = self_attn_block(mem, lp["self_attn"], lp["norm1_w"], lp["norm1_b"],
                              n_batch=N, seq=S, nhead=H, causal=False, kpm=kpm)
        mem = ffn_block(mem, lp, lp["norm2_w"], lp["norm2_b"])
    mem = layernorm(mem, params["enc_norm_w"], params["enc_norm_b"])

    # --- decoder ---
    out = y
    for lp in params["decoder_layers"]:
        out = self_attn_block(out, lp["self_attn"], lp["norm1_w"], lp["norm1_b"],
                              n_batch=N, seq=T, nhead=H, causal=True, kpm=None)
        out = cross_attn_block(out, mem, lp["cross_attn"], lp["norm2_w"], lp["norm2_b"],
                               n_batch=N, lq=T, lk=S, nhead=H)
        out = ffn_block(out, lp, lp["norm3_w"], lp["norm3_b"])

    # final decoder LayerNorm fused with fc; fc output padded to 128 lanes
    logits_pad = final_norm_fc(out, params["dec_norm_w"], params["dec_norm_b"],
                               params["fc_w_pad"], params["fc_b_pad"])    # (N*T, Vpad)
    logits = logits_pad[:, :V].reshape(N, T, V).transpose(1, 0, 2)        # (T, N, V)
    return logits


# ----------------------------------------------------------------------------
# Deterministic parameter init (xavier-uniform on >1-dim params; pre-transposed)
# ----------------------------------------------------------------------------

def _xavier(key, shape):
    fan_out, fan_in = shape[0], shape[1]
    a = math.sqrt(6.0 / (fan_in + fan_out))
    return jax.random.uniform(key, shape, jnp.float32, -a, a)


def init_params(key, cfg):
    E, H = cfg["d_model"], cfg["nhead"]
    dff = cfg["dim_feedforward"]
    V = cfg["trg_vocab"]
    keys = iter(jax.random.split(key, 256))

    ones_row = lambda d: jnp.ones((1, d), jnp.float32)
    zeros_row = lambda d: jnp.zeros((1, d), jnp.float32)

    def self_attn_params():
        w_in = _xavier(next(keys), (3 * E, E))
        w_out = _xavier(next(keys), (E, E))
        return {"wqkv": w_in.T, "bqkv": zeros_row(3 * E),
                "wo": w_out.T, "bo": zeros_row(E)}

    def cross_attn_params():
        w_in = _xavier(next(keys), (3 * E, E))
        w_out = _xavier(next(keys), (E, E))
        return {"wq": w_in[:E].T, "bq": zeros_row(E),
                "wkv": w_in[E:].T, "bkv": zeros_row(2 * E),
                "wo": w_out.T, "bo": zeros_row(E)}

    def ffn_params():
        return {"w1": _xavier(next(keys), (dff, E)).T, "b1": zeros_row(dff),
                "w2": _xavier(next(keys), (E, dff)).T, "b2": zeros_row(E)}

    enc_layers = []
    for _ in range(cfg["num_encoder_layers"]):
        lp = {"self_attn": self_attn_params()}
        lp.update(ffn_params())
        for i in (1, 2):
            lp[f"norm{i}_w"] = ones_row(E)
            lp[f"norm{i}_b"] = zeros_row(E)
        enc_layers.append(lp)

    dec_layers = []
    for _ in range(cfg["num_decoder_layers"]):
        lp = {"self_attn": self_attn_params(), "cross_attn": cross_attn_params()}
        lp.update(ffn_params())
        for i in (1, 2, 3):
            lp[f"norm{i}_w"] = ones_row(E)
            lp[f"norm{i}_b"] = zeros_row(E)
        dec_layers.append(lp)

    # PositionalEncoding buffer pe: (max_len, d_model)
    max_len = cfg["max_len"]
    pos = jnp.arange(max_len, dtype=jnp.float32)[:, None]
    div = jnp.exp(jnp.arange(0, E, 2, dtype=jnp.float32) * (-math.log(10000.0) / E))
    pe = jnp.zeros((max_len, E), jnp.float32)
    pe = pe.at[:, 0::2].set(jnp.sin(pos * div))
    pe = pe.at[:, 1::2].set(jnp.cos(pos * div))

    # fc weight pre-transposed and lane-padded to a multiple of 128
    V_pad = max(128, ((V + 127) // 128) * 128)
    fc_w = _xavier(next(keys), (V, E))
    fc_w_pad = jnp.zeros((E, V_pad), jnp.float32).at[:, :V].set(fc_w.T)
    fc_b_pad = jnp.zeros((1, V_pad), jnp.float32)

    return {
        "embed_src": _xavier(next(keys), (cfg["src_vocab"], E)),
        "embed_trg": _xavier(next(keys), (cfg["trg_vocab"], E)),
        "pe": pe,
        "encoder_layers": enc_layers,
        "decoder_layers": dec_layers,
        "enc_norm_w": ones_row(E), "enc_norm_b": zeros_row(E),
        "dec_norm_w": ones_row(E), "dec_norm_b": zeros_row(E),
        "fc_w_pad": fc_w_pad, "fc_b_pad": fc_b_pad,
    }


# ----------------------------------------------------------------------------
if __name__ == "__main__":
    cfg = dict(d_model=32, nhead=4, num_encoder_layers=2, num_decoder_layers=2,
               dim_feedforward=64, src_vocab=50, trg_vocab=40, pad_idx=0,
               dropout=0.0, max_len=100)

    root = jax.random.PRNGKey(0)
    k_params, k_src, k_trg = jax.random.split(root, 3)
    params = init_params(k_params, cfg)

    S, T, N = 12, 8, 2
    src = jax.random.randint(k_src, (S, N), 1, cfg["src_vocab"], dtype=jnp.int32)
    src = src.at[-1, :].set(cfg["pad_idx"])   # exercise the src key-padding mask
    trg = jax.random.randint(k_trg, (T, N), 1, cfg["trg_vocab"], dtype=jnp.int32)

    fwd = jax.jit(partial(embedded_transformer_forward, cfg=cfg))
    out = fwd(params, src, trg)
    jax.block_until_ready(out)

    assert out.shape == (T, N, cfg["trg_vocab"]), out.shape
    assert bool(jnp.all(jnp.isfinite(out)))
    print("KERNEL_OK")
</pallas_src>

<mosaic_0001>
module attributes {stable_mosaic.version = 11 : i64} {
  func.func @_ffn_block_kernel(%arg0: memref<24x32xf32, #tpu.memory_space<vmem>>, %arg1: memref<32x64xf32, #tpu.memory_space<vmem>>, %arg2: memref<1x64xf32, #tpu.memory_space<vmem>>, %arg3: memref<64x32xf32, #tpu.memory_space<vmem>>, %arg4: memref<1x32xf32, #tpu.memory_space<vmem>>, %arg5: memref<1x32xf32, #tpu.memory_space<vmem>>, %arg6: memref<1x32xf32, #tpu.memory_space<vmem>>, %arg7: memref<24x32xf32, #tpu.memory_space<vmem>>) attributes {dimension_semantics = [], scalar_prefetch = 0 : i64, scratch_operands = 0 : i64, tpu.core_type = #tpu.core_type<tc>} {
    %c0 = arith.constant 0 : index
    %c0_0 = arith.constant 0 : index
    %0 = vector.load %arg0[%c0, %c0_0] : memref<24x32xf32, #tpu.memory_space<vmem>>, vector<24x32xf32>
    %c0_1 = arith.constant 0 : index
    %c0_2 = arith.constant 0 : index
    %1 = vector.load %arg1[%c0_1, %c0_2] : memref<32x64xf32, #tpu.memory_space<vmem>>, vector<32x64xf32>
    %cst = arith.constant dense<0.000000e+00> : vector<24x64xf32>
    %2 = tpu.matmul %0, %1, %cst {dimension_numbers = #tpu.dot_dimension_numbers<[1], [0], [0], [1], [0, 0, 1, 1], [], []>} : vector<24x32xf32>, vector<32x64xf32>, vector<24x64xf32> -> vector<24x64xf32>
    %c0_3 = arith.constant 0 : index
    %c0_4 = arith.constant 0 : index
    %3 = vector.load %arg2[%c0_3, %c0_4] : memref<1x64xf32, #tpu.memory_space<vmem>>, vector<1x64xf32>
    %4 = vector.broadcast %3 : vector<1x64xf32> to vector<24x64xf32>
    %5 = arith.addf %2, %4 : vector<24x64xf32>
    %cst_5 = arith.constant 0.000000e+00 : f32
    %6 = vector.broadcast %cst_5 : f32 to vector<24x64xf32>
    %7 = arith.maximumf %5, %6 : vector<24x64xf32>
    %c0_6 = arith.constant 0 : index
    %c0_7 = arith.constant 0 : index
    %8 = vector.load %arg3[%c0_6, %c0_7] : memref<64x32xf32, #tpu.memory_space<vmem>>, vector<64x32xf32>
    %cst_8 = arith.constant dense<0.000000e+00> : vector<24x32xf32>
    %9 = tpu.matmul %7, %8, %cst_8 {dimension_numbers = #tpu.dot_dimension_numbers<[1], [0], [0], [1], [0, 0, 1, 1], [], []>} : vector<24x64xf32>, vector<64x32xf32>, vector<24x32xf32> -> vector<24x32xf32>
    %c0_9 = arith.constant 0 : index
    %c0_10 = arith.constant 0 : index
    %10 = vector.load %arg4[%c0_9, %c0_10] : memref<1x32xf32, #tpu.memory_space<vmem>>, vector<1x32xf32>
    %11 = vector.broadcast %10 : vector<1x32xf32> to vector<24x32xf32>
    %12 = arith.addf %9, %11 : vector<24x32xf32>
    %c0_11 = arith.constant 0 : index
    %c0_12 = arith.constant 0 : index
    %13 = vector.load %arg5[%c0_11, %c0_12] : memref<1x32xf32, #tpu.memory_space<vmem>>, vector<1x32xf32>
    %c0_13 = arith.constant 0 : index
    %c0_14 = arith.constant 0 : index
    %14 = vector.load %arg6[%c0_13, %c0_14] : memref<1x32xf32, #tpu.memory_space<vmem>>, vector<1x32xf32>
    %15 = arith.addf %12, %0 : vector<24x32xf32>
    %cst_15 = arith.constant dense<0.000000e+00> : vector<24xf32>
    %16 = vector.multi_reduction <add>, %15, %cst_15 [1] : vector<24x32xf32> to vector<24xf32>
    %17 = vector.shape_cast %16 : vector<24xf32> to vector<24x1xf32>
    %cst_16 = arith.constant 3.200000e+01 : f32
    %18 = vector.broadcast %cst_16 : f32 to vector<24x1xf32>
    %19 = arith.divf %17, %18 : vector<24x1xf32>
    %20 = vector.broadcast %19 : vector<24x1xf32> to vector<24x32xf32>
    %21 = arith.subf %15, %20 : vector<24x32xf32>
    %22 = arith.mulf %21, %21 : vector<24x32xf32>
    %cst_17 = arith.constant dense<0.000000e+00> : vector<24xf32>
    %23 = vector.multi_reduction <add>, %22, %cst_17 [1] : vector<24x32xf32> to vector<24xf32>
    %24 = vector.shape_cast %23 : vector<24xf32> to vector<24x1xf32>
    %cst_18 = arith.constant 3.200000e+01 : f32
    %25 = vector.broadcast %cst_18 : f32 to vector<24x1xf32>
    %26 = arith.divf %24, %25 : vector<24x1xf32>
    %cst_19 = arith.constant 9.99999974E-6 : f32
    %27 = vector.broadcast %cst_19 : f32 to vector<24x1xf32>
    %28 = arith.addf %26, %27 : vector<24x1xf32>
    %29 = math.rsqrt %28 : vector<24x1xf32>
    %30 = vector.broadcast %29 : vector<24x1xf32> to vector<24x32xf32>
    %31 = arith.mulf %21, %30 : vector<24x32xf32>
    %32 = vector.broadcast %13 : vector<1x32xf32> to vector<24x32xf32>
    %33 = arith.mulf %31, %32 : vector<24x32xf32>
    %34 = vector.broadcast %14 : vector<1x32xf32> to vector<24x32xf32>
    %35 = arith.addf %33, %34 : vector<24x32xf32>
    %c0_20 = arith.constant 0 : index
    %c0_21 = arith.constant 0 : index
    %36 = vector.load %arg7[%c0_20, %c0_21] : memref<24x32xf32, #tpu.memory_space<vmem>>, vector<24x32xf32>
    tpu.vector_store %arg7[%c0_20, %c0_21], %35 {strides = array<i32>} : memref<24x32xf32, #tpu.memory_space<vmem>>, vector<24x32xf32>,
    return
  }
}

module attributes {stable_mosaic.version = 11 : i64} {
  func.func @_self_attn_block_kernel(%arg0: memref<24x32xf32, #tpu.memory_space<vmem>>, %arg1: memref<32x96xf32, #tpu.memory_space<vmem>>, %arg2: memref<1x96xf32, #tpu.memory_space<vmem>>, %arg3: memref<32x32xf32, #tpu.memory_space<vmem>>, %arg4: memref<1x32xf32, #tpu.memory_space<vmem>>, %arg5: memref<1x32xf32, #tpu.memory_space<vmem>>, %arg6: memref<1x32xf32, #tpu.memory_space<vmem>>, %arg7: memref<2x12xf32, #tpu.memory_space<vmem>>, %arg8: memref<24x32xf32, #tpu.memory_space<vmem>>, %arg9: memref<24x96xf32, #tpu.memory_space<vmem>>, %arg10: memref<24x32xf32, #tpu.memory_space<vmem>>) attributes {dimension_semantics = [], scalar_prefetch = 0 : i64, scratch_operands = 2 : i64, tpu.core_type = #tpu.core_type<tc>} {
    %c0 = arith.constant 0 : index
    %c0_0 = arith.constant 0 : index
    %0 = vector.load %arg0[%c0, %c0_0] : memref<24x32xf32, #tpu.memory_space<vmem>>, vector<24x32xf32>
    %c0_1 = arith.constant 0 : index
    %c0_2 = arith.constant 0 : index
    %1 = vector.load %arg1[%c0_1, %c0_2] : memref<32x96xf32, #tpu.memory_space<vmem>>, vector<32x96xf32>
    %cst = arith.constant dense<0.000000e+00> : vector<24x96xf32>
    %2 = tpu.matmul %0, %1, %cst {dimension_numbers = #tpu.dot_dimension_numbers<[1], [0], [0], [1], [0, 0, 1, 1], [], []>} : vector<24x32xf32>, vector<32x96xf32>, vector<24x96xf32> -> vector<24x96xf32>
    %c0_3 = arith.constant 0 : index
    %c0_4 = arith.constant 0 : index
    %3 = vector.load %arg2[%c0_3, %c0_4] : memref<1x96xf32, #tpu.memory_space<vmem>>, vector<1x96xf32>
    %4 = vector.broadcast %3 : vector<1x96xf32> to vector<24x96xf32>
    %5 = arith.addf %2, %4 : vector<24x96xf32>
    %c0_5 = arith.constant 0 : index
    %c0_6 = arith.constant 0 : index
    %6 = vector.load %arg9[%c0_5, %c0_6] : memref<24x96xf32, #tpu.memory_space<vmem>>, vector<24x96xf32>
    tpu.vector_store %arg9[%c0_5, %c0_6], %5 {strides = array<i32>} : memref<24x96xf32, #tpu.memory_space<vmem>>, vector<24x96xf32>,
    %c0_7 = arith.constant 0 : index
    %c0_8 = arith.constant 0 : index
    %7 = vector.load %arg7[%c0_7, %c0_8] : memref<2x12xf32, #tpu.memory_space<vmem>>, vector<1x12xf32>
    %c0_9 = arith.constant 0 : index
    %c0_10 = arith.constant 0 : index
    %8 = vector.load %arg9[%c0_9, %c0_10] : memref<24x96xf32, #tpu.memory_space<vmem>>, vector<12x8xf32>
    %c0_11 = arith.constant 0 : index
    %c32 = arith.constant 32 : index
    %9 = vector.load %arg9[%c0_11, %c32] : memref<24x96xf32, #tpu.memory_space<vmem>>, vector<12x8xf32>
    %c0_12 = arith.constant 0 : index
    %c64 = arith.constant 64 : index
    %10 = vector.load %arg9[%c0_12, %c64] : memref<24x96xf32, #tpu.memory_space<vmem>>, vector<12x8xf32>
    %cst_13 = arith.constant dense<0.000000e+00> : vector<12x12xf32>
    %11 = tpu.matmul %8, %9, %cst_13 {dimension_numbers = #tpu.dot_dimension_numbers<[1], [1], [0], [0], [0, 0, 1, 0], [], []>} : vector<12x8xf32>, vector<12x8xf32>, vector<12x12xf32> -> vector<12x12xf32>
    %cst_14 = arith.constant 0.353553385 : f32
    %12 = vector.broadcast %cst_14 : f32 to vector<12x12xf32>
    %13 = arith.mulf %11, %12 : vector<12x12xf32>
    %14 = vector.broadcast %7 : vector<1x12xf32> to vector<12x12xf32>
    %15 = arith.addf %13, %14 : vector<12x12xf32>
    %cst_15 = arith.constant dense<0xFF800000> : vector<12xf32>
    %16 = vector.multi_reduction <maximumf>, %15, %cst_15 [1] : vector<12x12xf32> to vector<12xf32>
    %17 = vector.shape_cast %16 : vector<12xf32> to vector<12x1xf32>
    %18 = vector.broadcast %17 : vector<12x1xf32> to vector<12x12xf32>
    %19 = arith.subf %15, %18 : vector<12x12xf32>
    %20 = math.exp %19 : vector<12x12xf32>
    %cst_16 = arith.constant dense<0.000000e+00> : vector<12xf32>
    %21 = vector.multi_reduction <add>, %20, %cst_16 [1] : vector<12x12xf32> to vector<12xf32>
    %22 = vector.shape_cast %21 : vector<12xf32> to vector<12x1xf32>
    %23 = tpu.reciprocal %22 {approx = true} : vector<12x1xf32> -> vector<12x1xf32>
    %24 = vector.broadcast %23 : vector<12x1xf32> to vector<12x12xf32>
    %25 = arith.mulf %20, %24 : vector<12x12xf32>
    %cst_17 = arith.constant dense<0.000000e+00> : vector<12x8xf32>
    %26 = tpu.matmul %25, %10, %cst_17 {dimension_numbers = #tpu.dot_dimension_numbers<[1], [0], [0], [1], [0, 0, 1, 1], [], []>} : vector<12x12xf32>, vector<12x8xf32>, vector<12x8xf32> -> vector<12x8xf32>
    %c0_18 = arith.constant 0 : index
    %c0_19 = arith.constant 0 : index
    %27 = vector.load %arg10[%c0_18, %c0_19] : memref<24x32xf32, #tpu.memory_space<vmem>>, vector<12x8xf32>
    tpu.vector_store %arg10[%c0_18, %c0_19], %26 {strides = array<i32>} : memref<24x32xf32, #tpu.memory_space<vmem>>, vector<12x8xf32>,
    %c0_20 = arith.constant 0 : index
    %c8 = arith.constant 8 : index
    %28 = vector.load %arg9[%c0_20, %c8] : memref<24x96xf32, #tpu.memory_space<vmem>>, vector<12x8xf32>
    %c0_21 = arith.constant 0 : index
    %c40 = arith.constant 40 : index
    %29 = vector.load %arg9[%c0_21, %c40] : memref<24x96xf32, #tpu.memory_space<vmem>>, vector<12x8xf32>
    %c0_22 = arith.constant 0 : index
    %c72 = arith.constant 72 : index
    %30 = vector.load %arg9[%c0_22, %c72] : memref<24x96xf32, #tpu.memory_space<vmem>>, vector<12x8xf32>
    %cst_23 = arith.constant dense<0.000000e+00> : vector<12x12xf32>
    %31 = tpu.matmul %28, %29, %cst_23 {dimension_numbers = #tpu.dot_dimension_numbers<[1], [1], [0], [0], [0, 0, 1, 0], [], []>} : vector<12x8xf32>, vector<12x8xf32>, vector<12x12xf32> -> vector<12x12xf32>
    %cst_24 = arith.constant 0.353553385 : f32
    %32 = vector.broadcast %cst_24 : f32 to vector<12x12xf32>
    %33 = arith.mulf %31, %32 : vector<12x12xf32>
    %34 = vector.broadcast %7 : vector<1x12xf32> to vector<12x12xf32>
    %35 = arith.addf %33, %34 : vector<12x12xf32>
    %cst_25 = arith.constant dense<0xFF800000> : vector<12xf32>
    %36 = vector.multi_reduction <maximumf>, %35, %cst_25 [1] : vector<12x12xf32> to vector<12xf32>
    %37 = vector.shape_cast %36 : vector<12xf32> to vector<12x1xf32>
    %38 = vector.broadcast %37 : vector<12x1xf32> to vector<12x12xf32>
    %39 = arith.subf %35, %38 : vector<12x12xf32>
    %40 = math.exp %39 : vector<12x12xf32>
    %cst_26 = arith.constant dense<0.000000e+00> : vector<12xf32>
    %41 = vector.multi_reduction <add>, %40, %cst_26 [1] : vector<12x12xf32> to vector<12xf32>
    %42 = vector.shape_cast %41 : vector<12xf32> to vector<12x1xf32>
    %43 = tpu.reciprocal %42 {approx = true} : vector<12x1xf32> -> vector<12x1xf32>
    %44 = vector.broadcast %43 : vector<12x1xf32> to vector<12x12xf32>
    %45 = arith.mulf %40, %44 : vector<12x12xf32>
    %cst_27 = arith.constant dense<0.000000e+00> : vector<12x8xf32>
    %46 = tpu.matmul %45, %30, %cst_27 {dimension_numbers = #tpu.dot_dimension_numbers<[1], [0], [0], [1], [0, 0, 1, 1], [], []>} : vector<12x12xf32>, vector<12x8xf32>, vector<12x8xf32> -> vector<12x8xf32>
    %c0_28 = arith.constant 0 : index
    %c8_29 = arith.constant 8 : index
    %47 = vector.load %arg10[%c0_28, %c8_29] : memref<24x32xf32, #tpu.memory_space<vmem>>, vector<12x8xf32>
    tpu.vector_store %arg10[%c0_28, %c8_29], %46 {strides = array<i32>} : memref<24x32xf32, #tpu.memory_space<vmem>>, vector<12x8xf32>,
    %c0_30 = arith.constant 0 : index
    %c16 = arith.constant 16 : index
    %48 = vector.load %arg9[%c0_30, %c16] : memref<24x96xf32, #tpu.memory_space<vmem>>, vector<12x8xf32>
    %c0_31 = arith.constant 0 : index
    %c48 = arith.constant 48 : index
    %49 = vector.load %arg9[%c0_31, %c48] : memref<24x96xf32, #tpu.memory_space<vmem>>, vector<12x8xf32>
    %c0_32 = arith.constant 0 : index
    %c80 = arith.constant 80 : index
    %50 = vector.load %arg9[%c0_32, %c80] : memref<24x96xf32, #tpu.memory_space<vmem>>, vector<12x8xf32>
    %cst_33 = arith.constant dense<0.000000e+00> : vector<12x12xf32>
    %51 = tpu.matmul %48, %49, %cst_33 {dimension_numbers = #tpu.dot_dimension_numbers<[1], [1], [0], [0], [0, 0, 1, 0], [], []>} : vector<12x8xf32>, vector<12x8xf32>, vector<12x12xf32> -> vector<12x12xf32>
    %cst_34 = arith.constant 0.353553385 : f32
    %52 = vector.broadcast %cst_34 : f32 to vector<12x12xf32>
    %53 = arith.mulf %51, %52 : vector<12x12xf32>
    %54 = vector.broadcast %7 : vector<1x12xf32> to vector<12x12xf32>
    %55 = arith.addf %53, %54 : vector<12x12xf32>
    %cst_35 = arith.constant dense<0xFF800000> : vector<12xf32>
    %56 = vector.multi_reduction <maximumf>, %55, %cst_35 [1] : vector<12x12xf32> to vector<12xf32>
    %57 = vector.shape_cast %56 : vector<12xf32> to vector<12x1xf32>
    %58 = vector.broadcast %57 : vector<12x1xf32> to vector<12x12xf32>
    %59 = arith.subf %55, %58 : vector<12x12xf32>
    %60 = math.exp %59 : vector<12x12xf32>
    %cst_36 = arith.constant dense<0.000000e+00> : vector<12xf32>
    %61 = vector.multi_reduction <add>, %60, %cst_36 [1] : vector<12x12xf32> to vector<12xf32>
    %62 = vector.shape_cast %61 : vector<12xf32> to vector<12x1xf32>
    %63 = tpu.reciprocal %62 {approx = true} : vector<12x1xf32> -> vector<12x1xf32>
    %64 = vector.broadcast %63 : vector<12x1xf32> to vector<12x12xf32>
    %65 = arith.mulf %60, %64 : vector<12x12xf32>
    %cst_37 = arith.constant dense<0.000000e+00> : vector<12x8xf32>
    %66 = tpu.matmul %65, %50, %cst_37 {dimension_numbers = #tpu.dot_dimension_numbers<[1], [0], [0], [1], [0, 0, 1, 1], [], []>} : vector<12x12xf32>, vector<12x8xf32>, vector<12x8xf32> -> vector<12x8xf32>
    %c0_38 = arith.constant 0 : index
    %c16_39 = arith.constant 16 : index
    %67 = vector.load %arg10[%c0_38, %c16_39] : memref<24x32xf32, #tpu.memory_space<vmem>>, vector<12x8xf32>
    tpu.vector_store %arg10[%c0_38, %c16_39], %66 {strides = array<i32>} : memref<24x32xf32, #tpu.memory_space<vmem>>, vector<12x8xf32>,
    %c0_40 = arith.constant 0 : index
    %c24 = arith.constant 24 : index
    %68 = vector.load %arg9[%c0_40, %c24] : memref<24x96xf32, #tpu.memory_space<vmem>>, vector<12x8xf32>
    %c0_41 = arith.constant 0 : index
    %c56 = arith.constant 56 : index
    %69 = vector.load %arg9[%c0_41, %c56] : memref<24x96xf32, #tpu.memory_space<vmem>>, vector<12x8xf32>
    %c0_42 = arith.constant 0 : index
    %c88 = arith.constant 88 : index
    %70 = vector.load %arg9[%c0_42, %c88] : memref<24x96xf32, #tpu.memory_space<vmem>>, vector<12x8xf32>
    %cst_43 = arith.constant dense<0.000000e+00> : vector<12x12xf32>
    %71 = tpu.matmul %68, %69, %cst_43 {dimension_numbers = #tpu.dot_dimension_numbers<[1], [1], [0], [0], [0, 0, 1, 0], [], []>} : vector<12x8xf32>, vector<12x8xf32>, vector<12x12xf32> -> vector<12x12xf32>
    %cst_44 = arith.constant 0.353553385 : f32
    %72 = vector.broadcast %cst_44 : f32 to vector<12x12xf32>
    %73 = arith.mulf %71, %72 : vector<12x12xf32>
    %74 = vector.broadcast %7 : vector<1x12xf32> to vector<12x12xf32>
    %75 = arith.addf %73, %74 : vector<12x12xf32>
    %cst_45 = arith.constant dense<0xFF800000> : vector<12xf32>
    %76 = vector.multi_reduction <maximumf>, %75, %cst_45 [1] : vector<12x12xf32> to vector<12xf32>
    %77 = vector.shape_cast %76 : vector<12xf32> to vector<12x1xf32>
    %78 = vector.broadcast %77 : vector<12x1xf32> to vector<12x12xf32>
    %79 = arith.subf %75, %78 : vector<12x12xf32>
    %80 = math.exp %79 : vector<12x12xf32>
    %cst_46 = arith.constant dense<0.000000e+00> : vector<12xf32>
    %81 = vector.multi_reduction <add>, %80, %cst_46 [1] : vector<12x12xf32> to vector<12xf32>
    %82 = vector.shape_cast %81 : vector<12xf32> to vector<12x1xf32>
    %83 = tpu.reciprocal %82 {approx = true} : vector<12x1xf32> -> vector<12x1xf32>
    %84 = vector.broadcast %83 : vector<12x1xf32> to vector<12x12xf32>
    %85 = arith.mulf %80, %84 : vector<12x12xf32>
    %cst_47 = arith.constant dense<0.000000e+00> : vector<12x8xf32>
    %86 = tpu.matmul %85, %70, %cst_47 {dimension_numbers = #tpu.dot_dimension_numbers<[1], [0], [0], [1], [0, 0, 1, 1], [], []>} : vector<12x12xf32>, vector<12x8xf32>, vector<12x8xf32> -> vector<12x8xf32>
    %c0_48 = arith.constant 0 : index
    %c24_49 = arith.constant 24 : index
    %87 = vector.load %arg10[%c0_48, %c24_49] : memref<24x32xf32, #tpu.memory_space<vmem>>, vector<12x8xf32>
    tpu.vector_store %arg10[%c0_48, %c24_49], %86 {strides = array<i32>} : memref<24x32xf32, #tpu.memory_space<vmem>>, vector<12x8xf32>,
    %c1 = arith.constant 1 : index
    %c0_50 = arith.constant 0 : index
    %88 = vector.load %arg7[%c1, %c0_50] : memref<2x12xf32, #tpu.memory_space<vmem>>, vector<1x12xf32>
    %c12 = arith.constant 12 : index
    %c0_51 = arith.constant 0 : index
    %89 = vector.load %arg9[%c12, %c0_51] : memref<24x96xf32, #tpu.memory_space<vmem>>, vector<12x8xf32>
    %c12_52 = arith.constant 12 : index
    %c32_53 = arith.constant 32 : index
    %90 = vector.load %arg9[%c12_52, %c32_53] : memref<24x96xf32, #tpu.memory_space<vmem>>, vector<12x8xf32>
    %c12_54 = arith.constant 12 : index
    %c64_55 = arith.constant 64 : index
    %91 = vector.load %arg9[%c12_54, %c64_55] : memref<24x96xf32, #tpu.memory_space<vmem>>, vector<12x8xf32>
    %cst_56 = arith.constant dense<0.000000e+00> : vector<12x12xf32>
    %92 = tpu.matmul %89, %90, %cst_56 {dimension_numbers = #tpu.dot_dimension_numbers<[1], [1], [0], [0], [0, 0, 1, 0], [], []>} : vector<12x8xf32>, vector<12x8xf32>, vector<12x12xf32> -> vector<12x12xf32>
    %cst_57 = arith.constant 0.353553385 : f32
    %93 = vector.broadcast %cst_57 : f32 to vector<12x12xf32>
    %94 = arith.mulf %92, %93 : vector<12x12xf32>
    %95 = vector.broadcast %88 : vector<1x12xf32> to vector<12x12xf32>
    %96 = arith.addf %94, %95 : vector<12x12xf32>
    %cst_58 = arith.constant dense<0xFF800000> : vector<12xf32>
    %97 = vector.multi_reduction <maximumf>, %96, %cst_58 [1] : vector<12x12xf32> to vector<12xf32>
    %98 = vector.shape_cast %97 : vector<12xf32> to vector<12x1xf32>
    %99 = vector.broadcast %98 : vector<12x1xf32> to vector<12x12xf32>
    %100 = arith.subf %96, %99 : vector<12x12xf32>
    %101 = math.exp %100 : vector<12x12xf32>
    %cst_59 = arith.constant dense<0.000000e+00> : vector<12xf32>
    %102 = vector.multi_reduction <add>, %101, %cst_59 [1] : vector<12x12xf32> to vector<12xf32>
    %103 = vector.shape_cast %102 : vector<12xf32> to vector<12x1xf32>
    %104 = tpu.reciprocal %103 {approx = true} : vector<12x1xf32> -> vector<12x1xf32>
    %105 = vector.broadcast %104 : vector<12x1xf32> to vector<12x12xf32>
    %106 = arith.mulf %101, %105 : vector<12x12xf32>
    %cst_60 = arith.constant dense<0.000000e+00> : vector<12x8xf32>
    %107 = tpu.matmul %106, %91, %cst_60 {dimension_numbers = #tpu.dot_dimension_numbers<[1], [0], [0], [1], [0, 0, 1, 1], [], []>} : vector<12x12xf32>, vector<12x8xf32>, vector<12x8xf32> -> vector<12x8xf32>
    %c12_61 = arith.constant 12 : index
    %c0_62 = arith.constant 0 : index
    %108 = vector.load %arg10[%c12_61, %c0_62] : memref<24x32xf32, #tpu.memory_space<vmem>>, vector<12x8xf32>
    tpu.vector_store %arg10[%c12_61, %c0_62], %107 {strides = array<i32>} : memref<24x32xf32, #tpu.memory_space<vmem>>, vector<12x8xf32>,
    %c12_63 = arith.constant 12 : index
    %c8_64 = arith.constant 8 : index
    %109 = vector.load %arg9[%c12_63, %c8_64] : memref<24x96xf32, #tpu.memory_space<vmem>>, vector<12x8xf32>
    %c12_65 = arith.constant 12 : index
    %c40_66 = arith.constant 40 : index
    %110 = vector.load %arg9[%c12_65, %c40_66] : memref<24x96xf32, #tpu.memory_space<vmem>>, vector<12x8xf32>
    %c12_67 = arith.constant 12 : index
    %c72_68 = arith.constant 72 : index
    %111 = vector.load %arg9[%c12_67, %c72_68] : memref<24x96xf32, #tpu.memory_space<vmem>>, vector<12x8xf32>
    %cst_69 = arith.constant dense<0.000000e+00> : vector<12x12xf32>
    %112 = tpu.matmul %109, %110, %cst_69 {dimension_numbers = #tpu.dot_dimension_numbers<[1], [1], [0], [0], [0, 0, 1, 0], [], []>} : vector<12x8xf32>, vector<12x8xf32>, vector<12x12xf32> -> vector<12x12xf32>
    %cst_70 = arith.constant 0.353553385 : f32
    %113 = vector.broadcast %cst_70 : f32 to vector<12x12xf32>
    %114 = arith.mulf %112, %113 : vector<12x12xf32>
    %115 = vector.broadcast %88 : vector<1x12xf32> to vector<12x12xf32>
    %116 = arith.addf %114, %115 : vector<12x12xf32>
    %cst_71 = arith.constant dense<0xFF800000> : vector<12xf32>
    %117 = vector.multi_reduction <maximumf>, %116, %cst_71 [1] : vector<12x12xf32> to vector<12xf32>
    %118 = vector.shape_cast %117 : vector<12xf32> to vector<12x1xf32>
    %119 = vector.broadcast %118 : vector<12x1xf32> to vector<12x12xf32>
    %120 = arith.subf %116, %119 : vector<12x12xf32>
    %121 = math.exp %120 : vector<12x12xf32>
    %cst_72 = arith.constant dense<0.000000e+00> : vector<12xf32>
    %122 = vector.multi_reduction <add>, %121, %cst_72 [1] : vector<12x12xf32> to vector<12xf32>
    %123 = vector.shape_cast %122 : vector<12xf32> to vector<12x1xf32>
    %124 = tpu.reciprocal %123 {approx = true} : vector<12x1xf32> -> vector<12x1xf32>
    %125 = vector.broadcast %124 : vector<12x1xf32> to vector<12x12xf32>
    %126 = arith.mulf %121, %125 : vector<12x12xf32>
    %cst_73 = arith.constant dense<0.000000e+00> : vector<12x8xf32>
    %127 = tpu.matmul %126, %111, %cst_73 {dimension_numbers = #tpu.dot_dimension_numbers<[1], [0], [0], [1], [0, 0, 1, 1], [], []>} : vector<12x12xf32>, vector<12x8xf32>, vector<12x8xf32> -> vector<12x8xf32>
    %c12_74 = arith.constant 12 : index
    %c8_75 = arith.constant 8 : index
    %128 = vector.load %arg10[%c12_74, %c8_75] : memref<24x32xf32, #tpu.memory_space<vmem>>, vector<12x8xf32>
    tpu.vector_store %arg10[%c12_74, %c8_75], %127 {strides = array<i32>} : memref<24x32xf32, #tpu.memory_space<vmem>>, vector<12x8xf32>,
    %c12_76 = arith.constant 12 : index
    %c16_77 = arith.constant 16 : index
    %129 = vector.load %arg9[%c12_76, %c16_77] : memref<24x96xf32, #tpu.memory_space<vmem>>, vector<12x8xf32>
    %c12_78 = arith.constant 12 : index
    %c48_79 = arith.constant 48 : index
    %130 = vector.load %arg9[%c12_78, %c48_79] : memref<24x96xf32, #tpu.memory_space<vmem>>, vector<12x8xf32>
    %c12_80 = arith.constant 12 : index
    %c80_81 = arith.constant 80 : index
    %131 = vector.load %arg9[%c12_80, %c80_81] : memref<24x96xf32, #tpu.memory_space<vmem>>, vector<12x8xf32>
    %cst_82 = arith.constant dense<0.000000e+00> : vector<12x12xf32>
    %132 = tpu.matmul %129, %130, %cst_82 {dimension_numbers = #tpu.dot_dimension_numbers<[1], [1], [0], [0], [0, 0, 1, 0], [], []>} : vector<12x8xf32>, vector<12x8xf32>, vector<12x12xf32> -> vector<12x12xf32>
    %cst_83 = arith.constant 0.353553385 : f32
    %133 = vector.broadcast %cst_83 : f32 to vector<12x12xf32>
    %134 = arith.mulf %132, %133 : vector<12x12xf32>
    %135 = vector.broadcast %88 : vector<1x12xf32> to vector<12x12xf32>
    %136 = arith.addf %134, %135 : vector<12x12xf32>
    %cst_84 = arith.constant dense<0xFF800000> : vector<12xf32>
    %137 = vector.multi_reduction <maximumf>, %136, %cst_84 [1] : vector<12x12xf32> to vector<12xf32>
    %138 = vector.shape_cast %137 : vector<12xf32> to vector<12x1xf32>
    %139 = vector.broadcast %138 : vector<12x1xf32> to vector<12x12xf32>
    %140 = arith.subf %136, %139 : vector<12x12xf32>
    %141 = math.exp %140 : vector<12x12xf32>
    %cst_85 = arith.constant dense<0.000000e+00> : vector<12xf32>
    %142 = vector.multi_reduction <add>, %141, %cst_85 [1] : vector<12x12xf32> to vector<12xf32>
    %143 = vector.shape_cast %142 : vector<12xf32> to vector<12x1xf32>
    %144 = tpu.reciprocal %143 {approx = true} : vector<12x1xf32> -> vector<12x1xf32>
    %145 = vector.broadcast %144 : vector<12x1xf32> to vector<12x12xf32>
    %146 = arith.mulf %141, %145 : vector<12x12xf32>
    %cst_86 = arith.constant dense<0.000000e+00> : vector<12x8xf32>
    %147 = tpu.matmul %146, %131, %cst_86 {dimension_numbers = #tpu.dot_dimension_numbers<[1], [0], [0], [1], [0, 0, 1, 1], [], []>} : vector<12x12xf32>, vector<12x8xf32>, vector<12x8xf32> -> vector<12x8xf32>
    %c12_87 = arith.constant 12 : index
    %c16_88 = arith.constant 16 : index
    %148 = vector.load %arg10[%c12_87, %c16_88] : memref<24x32xf32, #tpu.memory_space<vmem>>, vector<12x8xf32>
    tpu.vector_store %arg10[%c12_87, %c16_88], %147 {strides = array<i32>} : memref<24x32xf32, #tpu.memory_space<vmem>>, vector<12x8xf32>,
    %c12_89 = arith.constant 12 : index
    %c24_90 = arith.constant 24 : index
    %149 = vector.load %arg9[%c12_89, %c24_90] : memref<24x96xf32, #tpu.memory_space<vmem>>, vector<12x8xf32>
    %c12_91 = arith.constant 12 : index
    %c56_92 = arith.constant 56 : index
    %150 = vector.load %arg9[%c12_91, %c56_92] : memref<24x96xf32, #tpu.memory_space<vmem>>, vector<12x8xf32>
    %c12_93 = arith.constant 12 : index
    %c88_94 = arith.constant 88 : index
    %151 = vector.load %arg9[%c12_93, %c88_94] : memref<24x96xf32, #tpu.memory_space<vmem>>, vector<12x8xf32>
    %cst_95 = arith.constant dense<0.000000e+00> : vector<12x12xf32>
    %152 = tpu.matmul %149, %150, %cst_95 {dimension_numbers = #tpu.dot_dimension_numbers<[1], [1], [0], [0], [0, 0, 1, 0], [], []>} : vector<12x8xf32>, vector<12x8xf32>, vector<12x12xf32> -> vector<12x12xf32>
    %cst_96 = arith.constant 0.353553385 : f32
    %153 = vector.broadcast %cst_96 : f32 to vector<12x12xf32>
    %154 = arith.mulf %152, %153 : vector<12x12xf32>
    %155 = vector.broadcast %88 : vector<1x12xf32> to vector<12x12xf32>
    %156 = arith.addf %154, %155 : vector<12x12xf32>
    %cst_97 = arith.constant dense<0xFF800000> : vector<12xf32>
    %157 = vector.multi_reduction <maximumf>, %156, %cst_97 [1] : vector<12x12xf32> to vector<12xf32>
    %158 = vector.shape_cast %157 : vector<12xf32> to vector<12x1xf32>
    %159 = vector.broadcast %158 : vector<12x1xf32> to vector<12x12xf32>
    %160 = arith.subf %156, %159 : vector<12x12xf32>
    %161 = math.exp %160 : vector<12x12xf32>
    %cst_98 = arith.constant dense<0.000000e+00> : vector<12xf32>
    %162 = vector.multi_reduction <add>, %161, %cst_98 [1] : vector<12x12xf32> to vector<12xf32>
    %163 = vector.shape_cast %162 : vector<12xf32> to vector<12x1xf32>
    %164 = tpu.reciprocal %163 {approx = true} : vector<12x1xf32> -> vector<12x1xf32>
    %165 = vector.broadcast %164 : vector<12x1xf32> to vector<12x12xf32>
    %166 = arith.mulf %161, %165 : vector<12x12xf32>
    %cst_99 = arith.constant dense<0.000000e+00> : vector<12x8xf32>
    %167 = tpu.matmul %166, %151, %cst_99 {dimension_numbers = #tpu.dot_dimension_numbers<[1], [0], [0], [1], [0, 0, 1, 1], [], []>} : vector<12x12xf32>, vector<12x8xf32>, vector<12x8xf32> -> vector<12x8xf32>
    %c12_100 = arith.constant 12 : index
    %c24_101 = arith.constant 24 : index
    %168 = vector.load %arg10[%c12_100, %c24_101] : memref<24x32xf32, #tpu.memory_space<vmem>>, vector<12x8xf32>
    tpu.vector_store %arg10[%c12_100, %c24_101], %167 {strides = array<i32>} : memref<24x32xf32, #tpu.memory_space<vmem>>, vector<12x8xf32>,
    %c0_102 = arith.constant 0 : index
    %c0_103 = arith.constant 0 : index
    %169 = vector.load %arg10[%c0_102, %c0_103] : memref<24x32xf32, #tpu.memory_space<vmem>>, vector<24x32xf32>
    %c0_104 = arith.constant 0 : index
    %c0_105 = arith.constant 0 : index
    %170 = vector.load %arg3[%c0_104, %c0_105] : memref<32x32xf32, #tpu.memory_space<vmem>>, vector<32x32xf32>
    %cst_106 = arith.constant dense<0.000000e+00> : vector<24x32xf32>
    %171 = tpu.matmul %169, %170, %cst_106 {dimension_numbers = #tpu.dot_dimension_numbers<[1], [0], [0], [1], [0, 0, 1, 1], [], []>} : vector<24x32xf32>, vector<32x32xf32>, vector<24x32xf32> -> vector<24x32xf32>
    %c0_107 = arith.constant 0 : index
    %c0_108 = arith.constant 0 : index
    %172 = vector.load %arg4[%c0_107, %c0_108] : memref<1x32xf32, #tpu.memory_space<vmem>>, vector<1x32xf32>
    %173 = vector.broadcast %172 : vector<1x32xf32> to vector<24x32xf32>
    %174 = arith.addf %171, %173 : vector<24x32xf32>
    %c0_109 = arith.constant 0 : index
    %c0_110 = arith.constant 0 : index
    %175 = vector.load %arg5[%c0_109, %c0_110] : memref<1x32xf32, #tpu.memory_space<vmem>>, vector<1x32xf32>
    %c0_111 = arith.constant 0 : index
    %c0_112 = arith.constant 0 : index
    %176 = vector.load %arg6[%c0_111, %c0_112] : memref<1x32xf32, #tpu.memory_space<vmem>>, vector<1x32xf32>
    %177 = arith.addf %174, %0 : vector<24x32xf32>
    %cst_113 = arith.constant dense<0.000000e+00> : vector<24xf32>
    %178 = vector.multi_reduction <add>, %177, %cst_113 [1] : vector<24x32xf32> to vector<24xf32>
    %179 = vector.shape_cast %178 : vector<24xf32> to vector<24x1xf32>
    %cst_114 = arith.constant 3.200000e+01 : f32
    %180 = vector.broadcast %cst_114 : f32 to vector<24x1xf32>
    %181 = arith.divf %179, %180 : vector<24x1xf32>
    %182 = vector.broadcast %181 : vector<24x1xf32> to vector<24x32xf32>
    %183 = arith.subf %177, %182 : vector<24x32xf32>
    %184 = arith.mulf %183, %183 : vector<24x32xf32>
    %cst_115 = arith.constant dense<0.000000e+00> : vector<24xf32>
    %185 = vector.multi_reduction <add>, %184, %cst_115 [1] : vector<24x32xf32> to vector<24xf32>
    %186 = vector.shape_cast %185 : vector<24xf32> to vector<24x1xf32>
    %cst_116 = arith.constant 3.200000e+01 : f32
    %187 = vector.broadcast %cst_116 : f32 to vector<24x1xf32>
    %188 = arith.divf %186, %187 : vector<24x1xf32>
    %cst_117 = arith.constant 9.99999974E-6 : f32
    %189 = vector.broadcast %cst_117 : f32 to vector<24x1xf32>
    %190 = arith.addf %188, %189 : vector<24x1xf32>
    %191 = math.rsqrt %190 : vector<24x1xf32>
    %192 = vector.broadcast %191 : vector<24x1xf32> to vector<24x32xf32>
    %193 = arith.mulf %183, %192 : vector<24x32xf32>
    %194 = vector.broadcast %175 : vector<1x32xf32> to vector<24x32xf32>
    %195 = arith.mulf %193, %194 : vector<24x32xf32>
    %196 = vector.broadcast %176 : vector<1x32xf32> to vector<24x32xf32>
    %197 = arith.addf %195, %196 : vector<24x32xf32>
    %c0_118 = arith.constant 0 : index
    %c0_119 = arith.constant 0 : index
    %198 = vector.load %arg8[%c0_118, %c0_119] : memref<24x32xf32, #tpu.memory_space<vmem>>, vector<24x32xf32>
    tpu.vector_store %arg8[%c0_118, %c0_119], %197 {strides = array<i32>} : memref<24x32xf32, #tpu.memory_space<vmem>>, vector<24x32xf32>,
    return
  }
}

module attributes {stable_mosaic.version = 11 : i64} {
  func.func @_ln_kernel(%arg0: memref<24x32xf32, #tpu.memory_space<vmem>>, %arg1: memref<1x32xf32, #tpu.memory_space<vmem>>, %arg2: memref<1x32xf32, #tpu.memory_space<vmem>>, %arg3: memref<24x32xf32, #tpu.memory_space<vmem>>) attributes {dimension_semantics = [], scalar_prefetch = 0 : i64, scratch_operands = 0 : i64, tpu.core_type = #tpu.core_type<tc>} {
    %c0 = arith.constant 0 : index
    %c0_0 = arith.constant 0 : index
    %0 = vector.load %arg0[%c0, %c0_0] : memref<24x32xf32, #tpu.memory_space<vmem>>, vector<24x32xf32>
    %cst = arith.constant dense<0.000000e+00> : vector<24xf32>
    %1 = vector.multi_reduction <add>, %0, %cst [1] : vector<24x32xf32> to vector<24xf32>
    %2 = vector.shape_cast %1 : vector<24xf32> to vector<24x1xf32>
    %cst_1 = arith.constant 3.200000e+01 : f32
    %3 = vector.broadcast %cst_1 : f32 to vector<24x1xf32>
    %4 = arith.divf %2, %3 : vector<24x1xf32>
    %5 = vector.broadcast %4 : vector<24x1xf32> to vector<24x32xf32>
    %6 = arith.subf %0, %5 : vector<24x32xf32>
    %7 = arith.mulf %6, %6 : vector<24x32xf32>
    %cst_2 = arith.constant dense<0.000000e+00> : vector<24xf32>
    %8 = vector.multi_reduction <add>, %7, %cst_2 [1] : vector<24x32xf32> to vector<24xf32>
    %9 = vector.shape_cast %8 : vector<24xf32> to vector<24x1xf32>
    %cst_3 = arith.constant 3.200000e+01 : f32
    %10 = vector.broadcast %cst_3 : f32 to vector<24x1xf32>
    %11 = arith.divf %9, %10 : vector<24x1xf32>
    %cst_4 = arith.constant 9.99999974E-6 : f32
    %12 = vector.broadcast %cst_4 : f32 to vector<24x1xf32>
    %13 = arith.addf %11, %12 : vector<24x1xf32>
    %14 = math.rsqrt %13 : vector<24x1xf32>
    %15 = vector.broadcast %14 : vector<24x1xf32> to vector<24x32xf32>
    %16 = arith.mulf %6, %15 : vector<24x32xf32>
    %c0_5 = arith.constant 0 : index
    %c0_6 = arith.constant 0 : index
    %17 = vector.load %arg1[%c0_5, %c0_6] : memref<1x32xf32, #tpu.memory_space<vmem>>, vector<1x32xf32>
    %18 = vector.broadcast %17 : vector<1x32xf32> to vector<24x32xf32>
    %19 = arith.mulf %16, %18 : vector<24x32xf32>
    %c0_7 = arith.constant 0 : index
    %c0_8 = arith.constant 0 : index
    %20 = vector.load %arg2[%c0_7, %c0_8] : memref<1x32xf32, #tpu.memory_space<vmem>>, vector<1x32xf32>
    %21 = vector.broadcast %20 : vector<1x32xf32> to vector<24x32xf32>
    %22 = arith.addf %19, %21 : vector<24x32xf32>
    %c0_9 = arith.constant 0 : index
    %c0_10 = arith.constant 0 : index
    %23 = vector.load %arg3[%c0_9, %c0_10] : memref<24x32xf32, #tpu.memory_space<vmem>>, vector<24x32xf32>
    tpu.vector_store %arg3[%c0_9, %c0_10], %22 {strides = array<i32>} : memref<24x32xf32, #tpu.memory_space<vmem>>, vector<24x32xf32>,
    return
  }
}

module attributes {stable_mosaic.version = 11 : i64} {
  func.func @_self_attn_block_kernel(%arg0: memref<16x32xf32, #tpu.memory_space<vmem>>, %arg1: memref<32x96xf32, #tpu.memory_space<vmem>>, %arg2: memref<1x96xf32, #tpu.memory_space<vmem>>, %arg3: memref<32x32xf32, #tpu.memory_space<vmem>>, %arg4: memref<1x32xf32, #tpu.memory_space<vmem>>, %arg5: memref<1x32xf32, #tpu.memory_space<vmem>>, %arg6: memref<1x32xf32, #tpu.memory_space<vmem>>, %arg7: memref<16x32xf32, #tpu.memory_space<vmem>>, %arg8: memref<16x96xf32, #tpu.memory_space<vmem>>, %arg9: memref<16x32xf32, #tpu.memory_space<vmem>>) attributes {dimension_semantics = [], scalar_prefetch = 0 : i64, scratch_operands = 2 : i64, tpu.core_type = #tpu.core_type<tc>} {
    %c0 = arith.constant 0 : index
    %c0_0 = arith.constant 0 : index
    %0 = vector.load %arg0[%c0, %c0_0] : memref<16x32xf32, #tpu.memory_space<vmem>>, vector<16x32xf32>
    %c0_1 = arith.constant 0 : index
    %c0_2 = arith.constant 0 : index
    %1 = vector.load %arg1[%c0_1, %c0_2] : memref<32x96xf32, #tpu.memory_space<vmem>>, vector<32x96xf32>
    %cst = arith.constant dense<0.000000e+00> : vector<16x96xf32>
    %2 = tpu.matmul %0, %1, %cst {dimension_numbers = #tpu.dot_dimension_numbers<[1], [0], [0], [1], [0, 0, 1, 1], [], []>} : vector<16x32xf32>, vector<32x96xf32>, vector<16x96xf32> -> vector<16x96xf32>
    %c0_3 = arith.constant 0 : index
    %c0_4 = arith.constant 0 : index
    %3 = vector.load %arg2[%c0_3, %c0_4] : memref<1x96xf32, #tpu.memory_space<vmem>>, vector<1x96xf32>
    %4 = vector.broadcast %3 : vector<1x96xf32> to vector<16x96xf32>
    %5 = arith.addf %2, %4 : vector<16x96xf32>
    %c0_5 = arith.constant 0 : index
    %c0_6 = arith.constant 0 : index
    %6 = vector.load %arg8[%c0_5, %c0_6] : memref<16x96xf32, #tpu.memory_space<vmem>>, vector<16x96xf32>
    tpu.vector_store %arg8[%c0_5, %c0_6], %5 {strides = array<i32>} : memref<16x96xf32, #tpu.memory_space<vmem>>, vector<16x96xf32>,
    %7 = tpu.iota {dimensions = array<i32: 0>} : vector<8x8xi32>
    %8 = tpu.iota {dimensions = array<i32: 1>} : vector<8x8xi32>
    %9 = arith.cmpi sgt, %8, %7 : vector<8x8xi32>
    %cst_7 = arith.constant -1.000000e+30 : f32
    %cst_8 = arith.constant 0.000000e+00 : f32
    %10 = vector.broadcast %cst_7 : f32 to vector<8x8xf32>
    %11 = vector.broadcast %cst_8 : f32 to vector<8x8xf32>
    %12 = arith.select %9, %10, %11 : vector<8x8xi1>, vector<8x8xf32>
    %c0_9 = arith.constant 0 : index
    %c0_10 = arith.constant 0 : index
    %13 = vector.load %arg8[%c0_9, %c0_10] : memref<16x96xf32, #tpu.memory_space<vmem>>, vector<8x8xf32>
    %c0_11 = arith.constant 0 : index
    %c32 = arith.constant 32 : index
    %14 = vector.load %arg8[%c0_11, %c32] : memref<16x96xf32, #tpu.memory_space<vmem>>, vector<8x8xf32>
    %c0_12 = arith.constant 0 : index
    %c64 = arith.constant 64 : index
    %15 = vector.load %arg8[%c0_12, %c64] : memref<16x96xf32, #tpu.memory_space<vmem>>, vector<8x8xf32>
    %cst_13 = arith.constant dense<0.000000e+00> : vector<8x8xf32>
    %16 = tpu.matmul %13, %14, %cst_13 {dimension_numbers = #tpu.dot_dimension_numbers<[1], [1], [0], [0], [0, 0, 1, 0], [], []>} : vector<8x8xf32>, vector<8x8xf32>, vector<8x8xf32> -> vector<8x8xf32>
    %cst_14 = arith.constant 0.353553385 : f32
    %17 = vector.broadcast %cst_14 : f32 to vector<8x8xf32>
    %18 = arith.mulf %16, %17 : vector<8x8xf32>
    %19 = arith.addf %18, %12 : vector<8x8xf32>
    %cst_15 = arith.constant dense<0xFF800000> : vector<8xf32>
    %20 = vector.multi_reduction <maximumf>, %19, %cst_15 [1] : vector<8x8xf32> to vector<8xf32>
    %21 = vector.shape_cast %20 : vector<8xf32> to vector<8x1xf32>
    %22 = vector.broadcast %21 : vector<8x1xf32> to vector<8x8xf32>
    %23 = arith.subf %19, %22 : vector<8x8xf32>
    %24 = math.exp %23 : vector<8x8xf32>
    %cst_16 = arith.constant dense<0.000000e+00> : vector<8xf32>
    %25 = vector.multi_reduction <add>, %24, %cst_16 [1] : vector<8x8xf32> to vector<8xf32>
    %26 = vector.shape_cast %25 : vector<8xf32> to vector<8x1xf32>
    %27 = tpu.reciprocal %26 {approx = true} : vector<8x1xf32> -> vector<8x1xf32>
    %28 = vector.broadcast %27 : vector<8x1xf32> to vector<8x8xf32>
    %29 = arith.mulf %24, %28 : vector<8x8xf32>
    %cst_17 = arith.constant dense<0.000000e+00> : vector<8x8xf32>
    %30 = tpu.matmul %29, %15, %cst_17 {dimension_numbers = #tpu.dot_dimension_numbers<[1], [0], [0], [1], [0, 0, 1, 1], [], []>} : vector<8x8xf32>, vector<8x8xf32>, vector<8x8xf32> -> vector<8x8xf32>
    %c0_18 = arith.constant 0 : index
    %c0_19 = arith.constant 0 : index
    %31 = vector.load %arg9[%c0_18, %c0_19] : memref<16x32xf32, #tpu.memory_space<vmem>>, vector<8x8xf32>
    tpu.vector_store %arg9[%c0_18, %c0_19], %30 {strides = array<i32>} : memref<16x32xf32, #tpu.memory_space<vmem>>, vector<8x8xf32>,
    %c0_20 = arith.constant 0 : index
    %c8 = arith.constant 8 : index
    %32 = vector.load %arg8[%c0_20, %c8] : memref<16x96xf32, #tpu.memory_space<vmem>>, vector<8x8xf32>
    %c0_21 = arith.constant 0 : index
    %c40 = arith.constant 40 : index
    %33 = vector.load %arg8[%c0_21, %c40] : memref<16x96xf32, #tpu.memory_space<vmem>>, vector<8x8xf32>
    %c0_22 = arith.constant 0 : index
    %c72 = arith.constant 72 : index
    %34 = vector.load %arg8[%c0_22, %c72] : memref<16x96xf32, #tpu.memory_space<vmem>>, vector<8x8xf32>
    %cst_23 = arith.constant dense<0.000000e+00> : vector<8x8xf32>
    %35 = tpu.matmul %32, %33, %cst_23 {dimension_numbers = #tpu.dot_dimension_numbers<[1], [1], [0], [0], [0, 0, 1, 0], [], []>} : vector<8x8xf32>, vector<8x8xf32>, vector<8x8xf32> -> vector<8x8xf32>
    %cst_24 = arith.constant 0.353553385 : f32
    %36 = vector.broadcast %cst_24 : f32 to vector<8x8xf32>
    %37 = arith.mulf %35, %36 : vector<8x8xf32>
    %38 = arith.addf %37, %12 : vector<8x8xf32>
    %cst_25 = arith.constant dense<0xFF800000> : vector<8xf32>
    %39 = vector.multi_reduction <maximumf>, %38, %cst_25 [1] : vector<8x8xf32> to vector<8xf32>
    %40 = vector.shape_cast %39 : vector<8xf32> to vector<8x1xf32>
    %41 = vector.broadcast %40 : vector<8x1xf32> to vector<8x8xf32>
    %42 = arith.subf %38, %41 : vector<8x8xf32>
    %43 = math.exp %42 : vector<8x8xf32>
    %cst_26 = arith.constant dense<0.000000e+00> : vector<8xf32>
    %44 = vector.multi_reduction <add>, %43, %cst_26 [1] : vector<8x8xf32> to vector<8xf32>
    %45 = vector.shape_cast %44 : vector<8xf32> to vector<8x1xf32>
    %46 = tpu.reciprocal %45 {approx = true} : vector<8x1xf32> -> vector<8x1xf32>
    %47 = vector.broadcast %46 : vector<8x1xf32> to vector<8x8xf32>
    %48 = arith.mulf %43, %47 : vector<8x8xf32>
    %cst_27 = arith.constant dense<0.000000e+00> : vector<8x8xf32>
    %49 = tpu.matmul %48, %34, %cst_27 {dimension_numbers = #tpu.dot_dimension_numbers<[1], [0], [0], [1], [0, 0, 1, 1], [], []>} : vector<8x8xf32>, vector<8x8xf32>, vector<8x8xf32> -> vector<8x8xf32>
    %c0_28 = arith.constant 0 : index
    %c8_29 = arith.constant 8 : index
    %50 = vector.load %arg9[%c0_28, %c8_29] : memref<16x32xf32, #tpu.memory_space<vmem>>, vector<8x8xf32>
    tpu.vector_store %arg9[%c0_28, %c8_29], %49 {strides = array<i32>} : memref<16x32xf32, #tpu.memory_space<vmem>>, vector<8x8xf32>,
    %c0_30 = arith.constant 0 : index
    %c16 = arith.constant 16 : index
    %51 = vector.load %arg8[%c0_30, %c16] : memref<16x96xf32, #tpu.memory_space<vmem>>, vector<8x8xf32>
    %c0_31 = arith.constant 0 : index
    %c48 = arith.constant 48 : index
    %52 = vector.load %arg8[%c0_31, %c48] : memref<16x96xf32, #tpu.memory_space<vmem>>, vector<8x8xf32>
    %c0_32 = arith.constant 0 : index
    %c80 = arith.constant 80 : index
    %53 = vector.load %arg8[%c0_32, %c80] : memref<16x96xf32, #tpu.memory_space<vmem>>, vector<8x8xf32>
    %cst_33 = arith.constant dense<0.000000e+00> : vector<8x8xf32>
    %54 = tpu.matmul %51, %52, %cst_33 {dimension_numbers = #tpu.dot_dimension_numbers<[1], [1], [0], [0], [0, 0, 1, 0], [], []>} : vector<8x8xf32>, vector<8x8xf32>, vector<8x8xf32> -> vector<8x8xf32>
    %cst_34 = arith.constant 0.353553385 : f32
    %55 = vector.broadcast %cst_34 : f32 to vector<8x8xf32>
    %56 = arith.mulf %54, %55 : vector<8x8xf32>
    %57 = arith.addf %56, %12 : vector<8x8xf32>
    %cst_35 = arith.constant dense<0xFF800000> : vector<8xf32>
    %58 = vector.multi_reduction <maximumf>, %57, %cst_35 [1] : vector<8x8xf32> to vector<8xf32>
    %59 = vector.shape_cast %58 : vector<8xf32> to vector<8x1xf32>
    %60 = vector.broadcast %59 : vector<8x1xf32> to vector<8x8xf32>
    %61 = arith.subf %57, %60 : vector<8x8xf32>
    %62 = math.exp %61 : vector<8x8xf32>
    %cst_36 = arith.constant dense<0.000000e+00> : vector<8xf32>
    %63 = vector.multi_reduction <add>, %62, %cst_36 [1] : vector<8x8xf32> to vector<8xf32>
    %64 = vector.shape_cast %63 : vector<8xf32> to vector<8x1xf32>
    %65 = tpu.reciprocal %64 {approx = true} : vector<8x1xf32> -> vector<8x1xf32>
    %66 = vector.broadcast %65 : vector<8x1xf32> to vector<8x8xf32>
    %67 = arith.mulf %62, %66 : vector<8x8xf32>
    %cst_37 = arith.constant dense<0.000000e+00> : vector<8x8xf32>
    %68 = tpu.matmul %67, %53, %cst_37 {dimension_numbers = #tpu.dot_dimension_numbers<[1], [0], [0], [1], [0, 0, 1, 1], [], []>} : vector<8x8xf32>, vector<8x8xf32>, vector<8x8xf32> -> vector<8x8xf32>
    %c0_38 = arith.constant 0 : index
    %c16_39 = arith.constant 16 : index
    %69 = vector.load %arg9[%c0_38, %c16_39] : memref<16x32xf32, #tpu.memory_space<vmem>>, vector<8x8xf32>
    tpu.vector_store %arg9[%c0_38, %c16_39], %68 {strides = array<i32>} : memref<16x32xf32, #tpu.memory_space<vmem>>, vector<8x8xf32>,
    %c0_40 = arith.constant 0 : index
    %c24 = arith.constant 24 : index
    %70 = vector.load %arg8[%c0_40, %c24] : memref<16x96xf32, #tpu.memory_space<vmem>>, vector<8x8xf32>
    %c0_41 = arith.constant 0 : index
    %c56 = arith.constant 56 : index
    %71 = vector.load %arg8[%c0_41, %c56] : memref<16x96xf32, #tpu.memory_space<vmem>>, vector<8x8xf32>
    %c0_42 = arith.constant 0 : index
    %c88 = arith.constant 88 : index
    %72 = vector.load %arg8[%c0_42, %c88] : memref<16x96xf32, #tpu.memory_space<vmem>>, vector<8x8xf32>
    %cst_43 = arith.constant dense<0.000000e+00> : vector<8x8xf32>
    %73 = tpu.matmul %70, %71, %cst_43 {dimension_numbers = #tpu.dot_dimension_numbers<[1], [1], [0], [0], [0, 0, 1, 0], [], []>} : vector<8x8xf32>, vector<8x8xf32>, vector<8x8xf32> -> vector<8x8xf32>
    %cst_44 = arith.constant 0.353553385 : f32
    %74 = vector.broadcast %cst_44 : f32 to vector<8x8xf32>
    %75 = arith.mulf %73, %74 : vector<8x8xf32>
    %76 = arith.addf %75, %12 : vector<8x8xf32>
    %cst_45 = arith.constant dense<0xFF800000> : vector<8xf32>
    %77 = vector.multi_reduction <maximumf>, %76, %cst_45 [1] : vector<8x8xf32> to vector<8xf32>
    %78 = vector.shape_cast %77 : vector<8xf32> to vector<8x1xf32>
    %79 = vector.broadcast %78 : vector<8x1xf32> to vector<8x8xf32>
    %80 = arith.subf %76, %79 : vector<8x8xf32>
    %81 = math.exp %80 : vector<8x8xf32>
    %cst_46 = arith.constant dense<0.000000e+00> : vector<8xf32>
    %82 = vector.multi_reduction <add>, %81, %cst_46 [1] : vector<8x8xf32> to vector<8xf32>
    %83 = vector.shape_cast %82 : vector<8xf32> to vector<8x1xf32>
    %84 = tpu.reciprocal %83 {approx = true} : vector<8x1xf32> -> vector<8x1xf32>
    %85 = vector.broadcast %84 : vector<8x1xf32> to vector<8x8xf32>
    %86 = arith.mulf %81, %85 : vector<8x8xf32>
    %cst_47 = arith.constant dense<0.000000e+00> : vector<8x8xf32>
    %87 = tpu.matmul %86, %72, %cst_47 {dimension_numbers = #tpu.dot_dimension_numbers<[1], [0], [0], [1], [0, 0, 1, 1], [], []>} : vector<8x8xf32>, vector<8x8xf32>, vector<8x8xf32> -> vector<8x8xf32>
    %c0_48 = arith.constant 0 : index
    %c24_49 = arith.constant 24 : index
    %88 = vector.load %arg9[%c0_48, %c24_49] : memref<16x32xf32, #tpu.memory_space<vmem>>, vector<8x8xf32>
    tpu.vector_store %arg9[%c0_48, %c24_49], %87 {strides = array<i32>} : memref<16x32xf32, #tpu.memory_space<vmem>>, vector<8x8xf32>,
    %c8_50 = arith.constant 8 : index
    %c0_51 = arith.constant 0 : index
    %89 = vector.load %arg8[%c8_50, %c0_51] : memref<16x96xf32, #tpu.memory_space<vmem>>, vector<8x8xf32>
    %c8_52 = arith.constant 8 : index
    %c32_53 = arith.constant 32 : index
    %90 = vector.load %arg8[%c8_52, %c32_53] : memref<16x96xf32, #tpu.memory_space<vmem>>, vector<8x8xf32>
    %c8_54 = arith.constant 8 : index
    %c64_55 = arith.constant 64 : index
    %91 = vector.load %arg8[%c8_54, %c64_55] : memref<16x96xf32, #tpu.memory_space<vmem>>, vector<8x8xf32>
    %cst_56 = arith.constant dense<0.000000e+00> : vector<8x8xf32>
    %92 = tpu.matmul %89, %90, %cst_56 {dimension_numbers = #tpu.dot_dimension_numbers<[1], [1], [0], [0], [0, 0, 1, 0], [], []>} : vector<8x8xf32>, vector<8x8xf32>, vector<8x8xf32> -> vector<8x8xf32>
    %cst_57 = arith.constant 0.353553385 : f32
    %93 = vector.broadcast %cst_57 : f32 to vector<8x8xf32>
    %94 = arith.mulf %92, %93 : vector<8x8xf32>
    %95 = arith.addf %94, %12 : vector<8x8xf32>
    %cst_58 = arith.constant dense<0xFF800000> : vector<8xf32>
    %96 = vector.multi_reduction <maximumf>, %95, %cst_58 [1] : vector<8x8xf32> to vector<8xf32>
    %97 = vector.shape_cast %96 : vector<8xf32> to vector<8x1xf32>
    %98 = vector.broadcast %97 : vector<8x1xf32> to vector<8x8xf32>
    %99 = arith.subf %95, %98 : vector<8x8xf32>
    %100 = math.exp %99 : vector<8x8xf32>
    %cst_59 = arith.constant dense<0.000000e+00> : vector<8xf32>
    %101 = vector.multi_reduction <add>, %100, %cst_59 [1] : vector<8x8xf32> to vector<8xf32>
    %102 = vector.shape_cast %101 : vector<8xf32> to vector<8x1xf32>
    %103 = tpu.reciprocal %102 {approx = true} : vector<8x1xf32> -> vector<8x1xf32>
    %104 = vector.broadcast %103 : vector<8x1xf32> to vector<8x8xf32>
    %105 = arith.mulf %100, %104 : vector<8x8xf32>
    %cst_60 = arith.constant dense<0.000000e+00> : vector<8x8xf32>
    %106 = tpu.matmul %105, %91, %cst_60 {dimension_numbers = #tpu.dot_dimension_numbers<[1], [0], [0], [1], [0, 0, 1, 1], [], []>} : vector<8x8xf32>, vector<8x8xf32>, vector<8x8xf32> -> vector<8x8xf32>
    %c8_61 = arith.constant 8 : index
    %c0_62 = arith.constant 0 : index
    %107 = vector.load %arg9[%c8_61, %c0_62] : memref<16x32xf32, #tpu.memory_space<vmem>>, vector<8x8xf32>
    tpu.vector_store %arg9[%c8_61, %c0_62], %106 {strides = array<i32>} : memref<16x32xf32, #tpu.memory_space<vmem>>, vector<8x8xf32>,
    %c8_63 = arith.constant 8 : index
    %c8_64 = arith.constant 8 : index
    %108 = vector.load %arg8[%c8_63, %c8_64] : memref<16x96xf32, #tpu.memory_space<vmem>>, vector<8x8xf32>
    %c8_65 = arith.constant 8 : index
    %c40_66 = arith.constant 40 : index
    %109 = vector.load %arg8[%c8_65, %c40_66] : memref<16x96xf32, #tpu.memory_space<vmem>>, vector<8x8xf32>
    %c8_67 = arith.constant 8 : index
    %c72_68 = arith.constant 72 : index
    %110 = vector.load %arg8[%c8_67, %c72_68] : memref<16x96xf32, #tpu.memory_space<vmem>>, vector<8x8xf32>
    %cst_69 = arith.constant dense<0.000000e+00> : vector<8x8xf32>
    %111 = tpu.matmul %108, %109, %cst_69 {dimension_numbers = #tpu.dot_dimension_numbers<[1], [1], [0], [0], [0, 0, 1, 0], [], []>} : vector<8x8xf32>, vector<8x8xf32>, vector<8x8xf32> -> vector<8x8xf32>
    %cst_70 = arith.constant 0.353553385 : f32
    %112 = vector.broadcast %cst_70 : f32 to vector<8x8xf32>
    %113 = arith.mulf %111, %112 : vector<8x8xf32>
    %114 = arith.addf %113, %12 : vector<8x8xf32>
    %cst_71 = arith.constant dense<0xFF800000> : vector<8xf32>
    %115 = vector.multi_reduction <maximumf>, %114, %cst_71 [1] : vector<8x8xf32> to vector<8xf32>
    %116 = vector.shape_cast %115 : vector<8xf32> to vector<8x1xf32>
    %117 = vector.broadcast %116 : vector<8x1xf32> to vector<8x8xf32>
    %118 = arith.subf %114, %117 : vector<8x8xf32>
    %119 = math.exp %118 : vector<8x8xf32>
    %cst_72 = arith.constant dense<0.000000e+00> : vector<8xf32>
    %120 = vector.multi_reduction <add>, %119, %cst_72 [1] : vector<8x8xf32> to vector<8xf32>
    %121 = vector.shape_cast %120 : vector<8xf32> to vector<8x1xf32>
    %122 = tpu.reciprocal %121 {approx = true} : vector<8x1xf32> -> vector<8x1xf32>
    %123 = vector.broadcast %122 : vector<8x1xf32> to vector<8x8xf32>
    %124 = arith.mulf %119, %123 : vector<8x8xf32>
    %cst_73 = arith.constant dense<0.000000e+00> : vector<8x8xf32>
    %125 = tpu.matmul %124, %110, %cst_73 {dimension_numbers = #tpu.dot_dimension_numbers<[1], [0], [0], [1], [0, 0, 1, 1], [], []>} : vector<8x8xf32>, vector<8x8xf32>, vector<8x8xf32> -> vector<8x8xf32>
    %c8_74 = arith.constant 8 : index
    %c8_75 = arith.constant 8 : index
    %126 = vector.load %arg9[%c8_74, %c8_75] : memref<16x32xf32, #tpu.memory_space<vmem>>, vector<8x8xf32>
    tpu.vector_store %arg9[%c8_74, %c8_75], %125 {strides = array<i32>} : memref<16x32xf32, #tpu.memory_space<vmem>>, vector<8x8xf32>,
    %c8_76 = arith.constant 8 : index
    %c16_77 = arith.constant 16 : index
    %127 = vector.load %arg8[%c8_76, %c16_77] : memref<16x96xf32, #tpu.memory_space<vmem>>, vector<8x8xf32>
    %c8_78 = arith.constant 8 : index
    %c48_79 = arith.constant 48 : index
    %128 = vector.load %arg8[%c8_78, %c48_79] : memref<16x96xf32, #tpu.memory_space<vmem>>, vector<8x8xf32>
    %c8_80 = arith.constant 8 : index
    %c80_81 = arith.constant 80 : index
    %129 = vector.load %arg8[%c8_80, %c80_81] : memref<16x96xf32, #tpu.memory_space<vmem>>, vector<8x8xf32>
    %cst_82 = arith.constant dense<0.000000e+00> : vector<8x8xf32>
    %130 = tpu.matmul %127, %128, %cst_82 {dimension_numbers = #tpu.dot_dimension_numbers<[1], [1], [0], [0], [0, 0, 1, 0], [], []>} : vector<8x8xf32>, vector<8x8xf32>, vector<8x8xf32> -> vector<8x8xf32>
    %cst_83 = arith.constant 0.353553385 : f32
    %131 = vector.broadcast %cst_83 : f32 to vector<8x8xf32>
    %132 = arith.mulf %130, %131 : vector<8x8xf32>
    %133 = arith.addf %132, %12 : vector<8x8xf32>
    %cst_84 = arith.constant dense<0xFF800000> : vector<8xf32>
    %134 = vector.multi_reduction <maximumf>, %133, %cst_84 [1] : vector<8x8xf32> to vector<8xf32>
    %135 = vector.shape_cast %134 : vector<8xf32> to vector<8x1xf32>
    %136 = vector.broadcast %135 : vector<8x1xf32> to vector<8x8xf32>
    %137 = arith.subf %133, %136 : vector<8x8xf32>
    %138 = math.exp %137 : vector<8x8xf32>
    %cst_85 = arith.constant dense<0.000000e+00> : vector<8xf32>
    %139 = vector.multi_reduction <add>, %138, %cst_85 [1] : vector<8x8xf32> to vector<8xf32>
    %140 = vector.shape_cast %139 : vector<8xf32> to vector<8x1xf32>
    %141 = tpu.reciprocal %140 {approx = true} : vector<8x1xf32> -> vector<8x1xf32>
    %142 = vector.broadcast %141 : vector<8x1xf32> to vector<8x8xf32>
    %143 = arith.mulf %138, %142 : vector<8x8xf32>
    %cst_86 = arith.constant dense<0.000000e+00> : vector<8x8xf32>
    %144 = tpu.matmul %143, %129, %cst_86 {dimension_numbers = #tpu.dot_dimension_numbers<[1], [0], [0], [1], [0, 0, 1, 1], [], []>} : vector<8x8xf32>, vector<8x8xf32>, vector<8x8xf32> -> vector<8x8xf32>
    %c8_87 = arith.constant 8 : index
    %c16_88 = arith.constant 16 : index
    %145 = vector.load %arg9[%c8_87, %c16_88] : memref<16x32xf32, #tpu.memory_space<vmem>>, vector<8x8xf32>
    tpu.vector_store %arg9[%c8_87, %c16_88], %144 {strides = array<i32>} : memref<16x32xf32, #tpu.memory_space<vmem>>, vector<8x8xf32>,
    %c8_89 = arith.constant 8 : index
    %c24_90 = arith.constant 24 : index
    %146 = vector.load %arg8[%c8_89, %c24_90] : memref<16x96xf32, #tpu.memory_space<vmem>>, vector<8x8xf32>
    %c8_91 = arith.constant 8 : index
    %c56_92 = arith.constant 56 : index
    %147 = vector.load %arg8[%c8_91, %c56_92] : memref<16x96xf32, #tpu.memory_space<vmem>>, vector<8x8xf32>
    %c8_93 = arith.constant 8 : index
    %c88_94 = arith.constant 88 : index
    %148 = vector.load %arg8[%c8_93, %c88_94] : memref<16x96xf32, #tpu.memory_space<vmem>>, vector<8x8xf32>
    %cst_95 = arith.constant dense<0.000000e+00> : vector<8x8xf32>
    %149 = tpu.matmul %146, %147, %cst_95 {dimension_numbers = #tpu.dot_dimension_numbers<[1], [1], [0], [0], [0, 0, 1, 0], [], []>} : vector<8x8xf32>, vector<8x8xf32>, vector<8x8xf32> -> vector<8x8xf32>
    %cst_96 = arith.constant 0.353553385 : f32
    %150 = vector.broadcast %cst_96 : f32 to vector<8x8xf32>
    %151 = arith.mulf %149, %150 : vector<8x8xf32>
    %152 = arith.addf %151, %12 : vector<8x8xf32>
    %cst_97 = arith.constant dense<0xFF800000> : vector<8xf32>
    %153 = vector.multi_reduction <maximumf>, %152, %cst_97 [1] : vector<8x8xf32> to vector<8xf32>
    %154 = vector.shape_cast %153 : vector<8xf32> to vector<8x1xf32>
    %155 = vector.broadcast %154 : vector<8x1xf32> to vector<8x8xf32>
    %156 = arith.subf %152, %155 : vector<8x8xf32>
    %157 = math.exp %156 : vector<8x8xf32>
    %cst_98 = arith.constant dense<0.000000e+00> : vector<8xf32>
    %158 = vector.multi_reduction <add>, %157, %cst_98 [1] : vector<8x8xf32> to vector<8xf32>
    %159 = vector.shape_cast %158 : vector<8xf32> to vector<8x1xf32>
    %160 = tpu.reciprocal %159 {approx = true} : vector<8x1xf32> -> vector<8x1xf32>
    %161 = vector.broadcast %160 : vector<8x1xf32> to vector<8x8xf32>
    %162 = arith.mulf %157, %161 : vector<8x8xf32>
    %cst_99 = arith.constant dense<0.000000e+00> : vector<8x8xf32>
    %163 = tpu.matmul %162, %148, %cst_99 {dimension_numbers = #tpu.dot_dimension_numbers<[1], [0], [0], [1], [0, 0, 1, 1], [], []>} : vector<8x8xf32>, vector<8x8xf32>, vector<8x8xf32> -> vector<8x8xf32>
    %c8_100 = arith.constant 8 : index
    %c24_101 = arith.constant 24 : index
    %164 = vector.load %arg9[%c8_100, %c24_101] : memref<16x32xf32, #tpu.memory_space<vmem>>, vector<8x8xf32>
    tpu.vector_store %arg9[%c8_100, %c24_101], %163 {strides = array<i32>} : memref<16x32xf32, #tpu.memory_space<vmem>>, vector<8x8xf32>,
    %c0_102 = arith.constant 0 : index
    %c0_103 = arith.constant 0 : index
    %165 = vector.load %arg9[%c0_102, %c0_103] : memref<16x32xf32, #tpu.memory_space<vmem>>, vector<16x32xf32>
    %c0_104 = arith.constant 0 : index
    %c0_105 = arith.constant 0 : index
    %166 = vector.load %arg3[%c0_104, %c0_105] : memref<32x32xf32, #tpu.memory_space<vmem>>, vector<32x32xf32>
    %cst_106 = arith.constant dense<0.000000e+00> : vector<16x32xf32>
    %167 = tpu.matmul %165, %166, %cst_106 {dimension_numbers = #tpu.dot_dimension_numbers<[1], [0], [0], [1], [0, 0, 1, 1], [], []>} : vector<16x32xf32>, vector<32x32xf32>, vector<16x32xf32> -> vector<16x32xf32>
    %c0_107 = arith.constant 0 : index
    %c0_108 = arith.constant 0 : index
    %168 = vector.load %arg4[%c0_107, %c0_108] : memref<1x32xf32, #tpu.memory_space<vmem>>, vector<1x32xf32>
    %169 = vector.broadcast %168 : vector<1x32xf32> to vector<16x32xf32>
    %170 = arith.addf %167, %169 : vector<16x32xf32>
    %c0_109 = arith.constant 0 : index
    %c0_110 = arith.constant 0 : index
    %171 = vector.load %arg5[%c0_109, %c0_110] : memref<1x32xf32, #tpu.memory_space<vmem>>, vector<1x32xf32>
    %c0_111 = arith.constant 0 : index
    %c0_112 = arith.constant 0 : index
    %172 = vector.load %arg6[%c0_111, %c0_112] : memref<1x32xf32, #tpu.memory_space<vmem>>, vector<1x32xf32>
    %173 = arith.addf %170, %0 : vector<16x32xf32>
    %cst_113 = arith.constant dense<0.000000e+00> : vector<16xf32>
    %174 = vector.multi_reduction <add>, %173, %cst_113 [1] : vector<16x32xf32> to vector<16xf32>
    %175 = vector.shape_cast %174 : vector<16xf32> to vector<16x1xf32>
    %cst_114 = arith.constant 3.200000e+01 : f32
    %176 = vector.broadcast %cst_114 : f32 to vector<16x1xf32>
    %177 = arith.divf %175, %176 : vector<16x1xf32>
    %178 = vector.broadcast %177 : vector<16x1xf32> to vector<16x32xf32>
    %179 = arith.subf %173, %178 : vector<16x32xf32>
    %180 = arith.mulf %179, %179 : vector<16x32xf32>
    %cst_115 = arith.constant dense<0.000000e+00> : vector<16xf32>
    %181 = vector.multi_reduction <add>, %180, %cst_115 [1] : vector<16x32xf32> to vector<16xf32>
    %182 = vector.shape_cast %181 : vector<16xf32> to vector<16x1xf32>
    %cst_116 = arith.constant 3.200000e+01 : f32
    %183 = vector.broadcast %cst_116 : f32 to vector<16x1xf32>
    %184 = arith.divf %182, %183 : vector<16x1xf32>
    %cst_117 = arith.constant 9.99999974E-6 : f32
    %185 = vector.broadcast %cst_117 : f32 to vector<16x1xf32>
    %186 = arith.addf %184, %185 : vector<16x1xf32>
    %187 = math.rsqrt %186 : vector<16x1xf32>
    %188 = vector.broadcast %187 : vector<16x1xf32> to vector<16x32xf32>
    %189 = arith.mulf %179, %188 : vector<16x32xf32>
    %190 = vector.broadcast %171 : vector<1x32xf32> to vector<16x32xf32>
    %191 = arith.mulf %189, %190 : vector<16x32xf32>
    %192 = vector.broadcast %172 : vector<1x32xf32> to vector<16x32xf32>
    %193 = arith.addf %191, %192 : vector<16x32xf32>
    %c0_118 = arith.constant 0 : index
    %c0_119 = arith.constant 0 : index
    %194 = vector.load %arg7[%c0_118, %c0_119] : memref<16x32xf32, #tpu.memory_space<vmem>>, vector<16x32xf32>
    tpu.vector_store %arg7[%c0_118, %c0_119], %193 {strides = array<i32>} : memref<16x32xf32, #tpu.memory_space<vmem>>, vector<16x32xf32>,
    return
  }
}

module attributes {stable_mosaic.version = 11 : i64} {
  func.func @_ffn_block_kernel(%arg0: memref<16x32xf32, #tpu.memory_space<vmem>>, %arg1: memref<32x64xf32, #tpu.memory_space<vmem>>, %arg2: memref<1x64xf32, #tpu.memory_space<vmem>>, %arg3: memref<64x32xf32, #tpu.memory_space<vmem>>, %arg4: memref<1x32xf32, #tpu.memory_space<vmem>>, %arg5: memref<1x32xf32, #tpu.memory_space<vmem>>, %arg6: memref<1x32xf32, #tpu.memory_space<vmem>>, %arg7: memref<16x32xf32, #tpu.memory_space<vmem>>) attributes {dimension_semantics = [], scalar_prefetch = 0 : i64, scratch_operands = 0 : i64, tpu.core_type = #tpu.core_type<tc>} {
    %c0 = arith.constant 0 : index
    %c0_0 = arith.constant 0 : index
    %0 = vector.load %arg0[%c0, %c0_0] : memref<16x32xf32, #tpu.memory_space<vmem>>, vector<16x32xf32>
    %c0_1 = arith.constant 0 : index
    %c0_2 = arith.constant 0 : index
    %1 = vector.load %arg1[%c0_1, %c0_2] : memref<32x64xf32, #tpu.memory_space<vmem>>, vector<32x64xf32>
    %cst = arith.constant dense<0.000000e+00> : vector<16x64xf32>
    %2 = tpu.matmul %0, %1, %cst {dimension_numbers = #tpu.dot_dimension_numbers<[1], [0], [0], [1], [0, 0, 1, 1], [], []>} : vector<16x32xf32>, vector<32x64xf32>, vector<16x64xf32> -> vector<16x64xf32>
    %c0_3 = arith.constant 0 : index
    %c0_4 = arith.constant 0 : index
    %3 = vector.load %arg2[%c0_3, %c0_4] : memref<1x64xf32, #tpu.memory_space<vmem>>, vector<1x64xf32>
    %4 = vector.broadcast %3 : vector<1x64xf32> to vector<16x64xf32>
    %5 = arith.addf %2, %4 : vector<16x64xf32>
    %cst_5 = arith.constant 0.000000e+00 : f32
    %6 = vector.broadcast %cst_5 : f32 to vector<16x64xf32>
    %7 = arith.maximumf %5, %6 : vector<16x64xf32>
    %c0_6 = arith.constant 0 : index
    %c0_7 = arith.constant 0 : index
    %8 = vector.load %arg3[%c0_6, %c0_7] : memref<64x32xf32, #tpu.memory_space<vmem>>, vector<64x32xf32>
    %cst_8 = arith.constant dense<0.000000e+00> : vector<16x32xf32>
    %9 = tpu.matmul %7, %8, %cst_8 {dimension_numbers = #tpu.dot_dimension_numbers<[1], [0], [0], [1], [0, 0, 1, 1], [], []>} : vector<16x64xf32>, vector<64x32xf32>, vector<16x32xf32> -> vector<16x32xf32>
    %c0_9 = arith.constant 0 : index
    %c0_10 = arith.constant 0 : index
    %10 = vector.load %arg4[%c0_9, %c0_10] : memref<1x32xf32, #tpu.memory_space<vmem>>, vector<1x32xf32>
    %11 = vector.broadcast %10 : vector<1x32xf32> to vector<16x32xf32>
    %12 = arith.addf %9, %11 : vector<16x32xf32>
    %c0_11 = arith.constant 0 : index
    %c0_12 = arith.constant 0 : index
    %13 = vector.load %arg5[%c0_11, %c0_12] : memref<1x32xf32, #tpu.memory_space<vmem>>, vector<1x32xf32>
    %c0_13 = arith.constant 0 : index
    %c0_14 = arith.constant 0 : index
    %14 = vector.load %arg6[%c0_13, %c0_14] : memref<1x32xf32, #tpu.memory_space<vmem>>, vector<1x32xf32>
    %15 = arith.addf %12, %0 : vector<16x32xf32>
    %cst_15 = arith.constant dense<0.000000e+00> : vector<16xf32>
    %16 = vector.multi_reduction <add>, %15, %cst_15 [1] : vector<16x32xf32> to vector<16xf32>
    %17 = vector.shape_cast %16 : vector<16xf32> to vector<16x1xf32>
    %cst_16 = arith.constant 3.200000e+01 : f32
    %18 = vector.broadcast %cst_16 : f32 to vector<16x1xf32>
    %19 = arith.divf %17, %18 : vector<16x1xf32>
    %20 = vector.broadcast %19 : vector<16x1xf32> to vector<16x32xf32>
    %21 = arith.subf %15, %20 : vector<16x32xf32>
    %22 = arith.mulf %21, %21 : vector<16x32xf32>
    %cst_17 = arith.constant dense<0.000000e+00> : vector<16xf32>
    %23 = vector.multi_reduction <add>, %22, %cst_17 [1] : vector<16x32xf32> to vector<16xf32>
    %24 = vector.shape_cast %23 : vector<16xf32> to vector<16x1xf32>
    %cst_18 = arith.constant 3.200000e+01 : f32
    %25 = vector.broadcast %cst_18 : f32 to vector<16x1xf32>
    %26 = arith.divf %24, %25 : vector<16x1xf32>
    %cst_19 = arith.constant 9.99999974E-6 : f32
    %27 = vector.broadcast %cst_19 : f32 to vector<16x1xf32>
    %28 = arith.addf %26, %27 : vector<16x1xf32>
    %29 = math.rsqrt %28 : vector<16x1xf32>
    %30 = vector.broadcast %29 : vector<16x1xf32> to vector<16x32xf32>
    %31 = arith.mulf %21, %30 : vector<16x32xf32>
    %32 = vector.broadcast %13 : vector<1x32xf32> to vector<16x32xf32>
    %33 = arith.mulf %31, %32 : vector<16x32xf32>
    %34 = vector.broadcast %14 : vector<1x32xf32> to vector<16x32xf32>
    %35 = arith.addf %33, %34 : vector<16x32xf32>
    %c0_20 = arith.constant 0 : index
    %c0_21 = arith.constant 0 : index
    %36 = vector.load %arg7[%c0_20, %c0_21] : memref<16x32xf32, #tpu.memory_space<vmem>>, vector<16x32xf32>
    tpu.vector_store %arg7[%c0_20, %c0_21], %35 {strides = array<i32>} : memref<16x32xf32, #tpu.memory_space<vmem>>, vector<16x32xf32>,
    return
  }
}

module attributes {stable_mosaic.version = 11 : i64} {
  func.func @_cross_attn_block_kernel(%arg0: memref<16x32xf32, #tpu.memory_space<vmem>>, %arg1: memref<24x32xf32, #tpu.memory_space<vmem>>, %arg2: memref<32x32xf32, #tpu.memory_space<vmem>>, %arg3: memref<1x32xf32, #tpu.memory_space<vmem>>, %arg4: memref<32x64xf32, #tpu.memory_space<vmem>>, %arg5: memref<1x64xf32, #tpu.memory_space<vmem>>, %arg6: memref<32x32xf32, #tpu.memory_space<vmem>>, %arg7: memref<1x32xf32, #tpu.memory_space<vmem>>, %arg8: memref<1x32xf32, #tpu.memory_space<vmem>>, %arg9: memref<1x32xf32, #tpu.memory_space<vmem>>, %arg10: memref<16x32xf32, #tpu.memory_space<vmem>>, %arg11: memref<16x32xf32, #tpu.memory_space<vmem>>, %arg12: memref<24x64xf32, #tpu.memory_space<vmem>>, %arg13: memref<16x32xf32, #tpu.memory_space<vmem>>) attributes {dimension_semantics = [], scalar_prefetch = 0 : i64, scratch_operands = 3 : i64, tpu.core_type = #tpu.core_type<tc>} {
    %c0 = arith.constant 0 : index
    %c0_0 = arith.constant 0 : index
    %0 = vector.load %arg0[%c0, %c0_0] : memref<16x32xf32, #tpu.memory_space<vmem>>, vector<16x32xf32>
    %c0_1 = arith.constant 0 : index
    %c0_2 = arith.constant 0 : index
    %1 = vector.load %arg1[%c0_1, %c0_2] : memref<24x32xf32, #tpu.memory_space<vmem>>, vector<24x32xf32>
    %c0_3 = arith.constant 0 : index
    %c0_4 = arith.constant 0 : index
    %2 = vector.load %arg2[%c0_3, %c0_4] : memref<32x32xf32, #tpu.memory_space<vmem>>, vector<32x32xf32>
    %cst = arith.constant dense<0.000000e+00> : vector<16x32xf32>
    %3 = tpu.matmul %0, %2, %cst {dimension_numbers = #tpu.dot_dimension_numbers<[1], [0], [0], [1], [0, 0, 1, 1], [], []>} : vector<16x32xf32>, vector<32x32xf32>, vector<16x32xf32> -> vector<16x32xf32>
    %c0_5 = arith.constant 0 : index
    %c0_6 = arith.constant 0 : index
    %4 = vector.load %arg3[%c0_5, %c0_6] : memref<1x32xf32, #tpu.memory_space<vmem>>, vector<1x32xf32>
    %5 = vector.broadcast %4 : vector<1x32xf32> to vector<16x32xf32>
    %6 = arith.addf %3, %5 : vector<16x32xf32>
    %c0_7 = arith.constant 0 : index
    %c0_8 = arith.constant 0 : index
    %7 = vector.load %arg11[%c0_7, %c0_8] : memref<16x32xf32, #tpu.memory_space<vmem>>, vector<16x32xf32>
    tpu.vector_store %arg11[%c0_7, %c0_8], %6 {strides = array<i32>} : memref<16x32xf32, #tpu.memory_space<vmem>>, vector<16x32xf32>,
    %c0_9 = arith.constant 0 : index
    %c0_10 = arith.constant 0 : index
    %8 = vector.load %arg4[%c0_9, %c0_10] : memref<32x64xf32, #tpu.memory_space<vmem>>, vector<32x64xf32>
    %cst_11 = arith.constant dense<0.000000e+00> : vector<24x64xf32>
    %9 = tpu.matmul %1, %8, %cst_11 {dimension_numbers = #tpu.dot_dimension_numbers<[1], [0], [0], [1], [0, 0, 1, 1], [], []>} : vector<24x32xf32>, vector<32x64xf32>, vector<24x64xf32> -> vector<24x64xf32>
    %c0_12 = arith.constant 0 : index
    %c0_13 = arith.constant 0 : index
    %10 = vector.load %arg5[%c0_12, %c0_13] : memref<1x64xf32, #tpu.memory_space<vmem>>, vector<1x64xf32>
    %11 = vector.broadcast %10 : vector<1x64xf32> to vector<24x64xf32>
    %12 = arith.addf %9, %11 : vector<24x64xf32>
    %c0_14 = arith.constant 0 : index
    %c0_15 = arith.constant 0 : index
    %13 = vector.load %arg12[%c0_14, %c0_15] : memref<24x64xf32, #tpu.memory_space<vmem>>, vector<24x64xf32>
    tpu.vector_store %arg12[%c0_14, %c0_15], %12 {strides = array<i32>} : memref<24x64xf32, #tpu.memory_space<vmem>>, vector<24x64xf32>,
    %c0_16 = arith.constant 0 : index
    %c0_17 = arith.constant 0 : index
    %14 = vector.load %arg11[%c0_16, %c0_17] : memref<16x32xf32, #tpu.memory_space<vmem>>, vector<8x8xf32>
    %c0_18 = arith.constant 0 : index
    %c0_19 = arith.constant 0 : index
    %15 = vector.load %arg12[%c0_18, %c0_19] : memref<24x64xf32, #tpu.memory_space<vmem>>, vector<12x8xf32>
    %c0_20 = arith.constant 0 : index
    %c32 = arith.constant 32 : index
    %16 = vector.load %arg12[%c0_20, %c32] : memref<24x64xf32, #tpu.memory_space<vmem>>, vector<12x8xf32>
    %cst_21 = arith.constant dense<0.000000e+00> : vector<8x12xf32>
    %17 = tpu.matmul %14, %15, %cst_21 {dimension_numbers = #tpu.dot_dimension_numbers<[1], [1], [0], [0], [0, 0, 1, 0], [], []>} : vector<8x8xf32>, vector<12x8xf32>, vector<8x12xf32> -> vector<8x12xf32>
    %cst_22 = arith.constant 0.353553385 : f32
    %18 = vector.broadcast %cst_22 : f32 to vector<8x12xf32>
    %19 = arith.mulf %17, %18 : vector<8x12xf32>
    %cst_23 = arith.constant dense<0xFF800000> : vector<8xf32>
    %20 = vector.multi_reduction <maximumf>, %19, %cst_23 [1] : vector<8x12xf32> to vector<8xf32>
    %21 = vector.shape_cast %20 : vector<8xf32> to vector<8x1xf32>
    %22 = vector.broadcast %21 : vector<8x1xf32> to vector<8x12xf32>
    %23 = arith.subf %19, %22 : vector<8x12xf32>
    %24 = math.exp %23 : vector<8x12xf32>
    %cst_24 = arith.constant dense<0.000000e+00> : vector<8xf32>
    %25 = vector.multi_reduction <add>, %24, %cst_24 [1] : vector<8x12xf32> to vector<8xf32>
    %26 = vector.shape_cast %25 : vector<8xf32> to vector<8x1xf32>
    %27 = tpu.reciprocal %26 {approx = true} : vector<8x1xf32> -> vector<8x1xf32>
    %28 = vector.broadcast %27 : vector<8x1xf32> to vector<8x12xf32>
    %29 = arith.mulf %24, %28 : vector<8x12xf32>
    %cst_25 = arith.constant dense<0.000000e+00> : vector<8x8xf32>
    %30 = tpu.matmul %29, %16, %cst_25 {dimension_numbers = #tpu.dot_dimension_numbers<[1], [0], [0], [1], [0, 0, 1, 1], [], []>} : vector<8x12xf32>, vector<12x8xf32>, vector<8x8xf32> -> vector<8x8xf32>
    %c0_26 = arith.constant 0 : index
    %c0_27 = arith.constant 0 : index
    %31 = vector.load %arg13[%c0_26, %c0_27] : memref<16x32xf32, #tpu.memory_space<vmem>>, vector<8x8xf32>
    tpu.vector_store %arg13[%c0_26, %c0_27], %30 {strides = array<i32>} : memref<16x32xf32, #tpu.memory_space<vmem>>, vector<8x8xf32>,
    %c0_28 = arith.constant 0 : index
    %c8 = arith.constant 8 : index
    %32 = vector.load %arg11[%c0_28, %c8] : memref<16x32xf32, #tpu.memory_space<vmem>>, vector<8x8xf32>
    %c0_29 = arith.constant 0 : index
    %c8_30 = arith.constant 8 : index
    %33 = vector.load %arg12[%c0_29, %c8_30] : memref<24x64xf32, #tpu.memory_space<vmem>>, vector<12x8xf32>
    %c0_31 = arith.constant 0 : index
    %c40 = arith.constant 40 : index
    %34 = vector.load %arg12[%c0_31, %c40] : memref<24x64xf32, #tpu.memory_space<vmem>>, vector<12x8xf32>
    %cst_32 = arith.constant dense<0.000000e+00> : vector<8x12xf32>
    %35 = tpu.matmul %32, %33, %cst_32 {dimension_numbers = #tpu.dot_dimension_numbers<[1], [1], [0], [0], [0, 0, 1, 0], [], []>} : vector<8x8xf32>, vector<12x8xf32>, vector<8x12xf32> -> vector<8x12xf32>
    %cst_33 = arith.constant 0.353553385 : f32
    %36 = vector.broadcast %cst_33 : f32 to vector<8x12xf32>
    %37 = arith.mulf %35, %36 : vector<8x12xf32>
    %cst_34 = arith.constant dense<0xFF800000> : vector<8xf32>
    %38 = vector.multi_reduction <maximumf>, %37, %cst_34 [1] : vector<8x12xf32> to vector<8xf32>
    %39 = vector.shape_cast %38 : vector<8xf32> to vector<8x1xf32>
    %40 = vector.broadcast %39 : vector<8x1xf32> to vector<8x12xf32>
    %41 = arith.subf %37, %40 : vector<8x12xf32>
    %42 = math.exp %41 : vector<8x12xf32>
    %cst_35 = arith.constant dense<0.000000e+00> : vector<8xf32>
    %43 = vector.multi_reduction <add>, %42, %cst_35 [1] : vector<8x12xf32> to vector<8xf32>
    %44 = vector.shape_cast %43 : vector<8xf32> to vector<8x1xf32>
    %45 = tpu.reciprocal %44 {approx = true} : vector<8x1xf32> -> vector<8x1xf32>
    %46 = vector.broadcast %45 : vector<8x1xf32> to vector<8x12xf32>
    %47 = arith.mulf %42, %46 : vector<8x12xf32>
    %cst_36 = arith.constant dense<0.000000e+00> : vector<8x8xf32>
    %48 = tpu.matmul %47, %34, %cst_36 {dimension_numbers = #tpu.dot_dimension_numbers<[1], [0], [0], [1], [0, 0, 1, 1], [], []>} : vector<8x12xf32>, vector<12x8xf32>, vector<8x8xf32> -> vector<8x8xf32>
    %c0_37 = arith.constant 0 : index
    %c8_38 = arith.constant 8 : index
    %49 = vector.load %arg13[%c0_37, %c8_38] : memref<16x32xf32, #tpu.memory_space<vmem>>, vector<8x8xf32>
    tpu.vector_store %arg13[%c0_37, %c8_38], %48 {strides = array<i32>} : memref<16x32xf32, #tpu.memory_space<vmem>>, vector<8x8xf32>,
    %c0_39 = arith.constant 0 : index
    %c16 = arith.constant 16 : index
    %50 = vector.load %arg11[%c0_39, %c16] : memref<16x32xf32, #tpu.memory_space<vmem>>, vector<8x8xf32>
    %c0_40 = arith.constant 0 : index
    %c16_41 = arith.constant 16 : index
    %51 = vector.load %arg12[%c0_40, %c16_41] : memref<24x64xf32, #tpu.memory_space<vmem>>, vector<12x8xf32>
    %c0_42 = arith.constant 0 : index
    %c48 = arith.constant 48 : index
    %52 = vector.load %arg12[%c0_42, %c48] : memref<24x64xf32, #tpu.memory_space<vmem>>, vector<12x8xf32>
    %cst_43 = arith.constant dense<0.000000e+00> : vector<8x12xf32>
    %53 = tpu.matmul %50, %51, %cst_43 {dimension_numbers = #tpu.dot_dimension_numbers<[1], [1], [0], [0], [0, 0, 1, 0], [], []>} : vector<8x8xf32>, vector<12x8xf32>, vector<8x12xf32> -> vector<8x12xf32>
    %cst_44 = arith.constant 0.353553385 : f32
    %54 = vector.broadcast %cst_44 : f32 to vector<8x12xf32>
    %55 = arith.mulf %53, %54 : vector<8x12xf32>
    %cst_45 = arith.constant dense<0xFF800000> : vector<8xf32>
    %56 = vector.multi_reduction <maximumf>, %55, %cst_45 [1] : vector<8x12xf32> to vector<8xf32>
    %57 = vector.shape_cast %56 : vector<8xf32> to vector<8x1xf32>
    %58 = vector.broadcast %57 : vector<8x1xf32> to vector<8x12xf32>
    %59 = arith.subf %55, %58 : vector<8x12xf32>
    %60 = math.exp %59 : vector<8x12xf32>
    %cst_46 = arith.constant dense<0.000000e+00> : vector<8xf32>
    %61 = vector.multi_reduction <add>, %60, %cst_46 [1] : vector<8x12xf32> to vector<8xf32>
    %62 = vector.shape_cast %61 : vector<8xf32> to vector<8x1xf32>
    %63 = tpu.reciprocal %62 {approx = true} : vector<8x1xf32> -> vector<8x1xf32>
    %64 = vector.broadcast %63 : vector<8x1xf32> to vector<8x12xf32>
    %65 = arith.mulf %60, %64 : vector<8x12xf32>
    %cst_47 = arith.constant dense<0.000000e+00> : vector<8x8xf32>
    %66 = tpu.matmul %65, %52, %cst_47 {dimension_numbers = #tpu.dot_dimension_numbers<[1], [0], [0], [1], [0, 0, 1, 1], [], []>} : vector<8x12xf32>, vector<12x8xf32>, vector<8x8xf32> -> vector<8x8xf32>
    %c0_48 = arith.constant 0 : index
    %c16_49 = arith.constant 16 : index
    %67 = vector.load %arg13[%c0_48, %c16_49] : memref<16x32xf32, #tpu.memory_space<vmem>>, vector<8x8xf32>
    tpu.vector_store %arg13[%c0_48, %c16_49], %66 {strides = array<i32>} : memref<16x32xf32, #tpu.memory_space<vmem>>, vector<8x8xf32>,
    %c0_50 = arith.constant 0 : index
    %c24 = arith.constant 24 : index
    %68 = vector.load %arg11[%c0_50, %c24] : memref<16x32xf32, #tpu.memory_space<vmem>>, vector<8x8xf32>
    %c0_51 = arith.constant 0 : index
    %c24_52 = arith.constant 24 : index
    %69 = vector.load %arg12[%c0_51, %c24_52] : memref<24x64xf32, #tpu.memory_space<vmem>>, vector<12x8xf32>
    %c0_53 = arith.constant 0 : index
    %c56 = arith.constant 56 : index
    %70 = vector.load %arg12[%c0_53, %c56] : memref<24x64xf32, #tpu.memory_space<vmem>>, vector<12x8xf32>
    %cst_54 = arith.constant dense<0.000000e+00> : vector<8x12xf32>
    %71 = tpu.matmul %68, %69, %cst_54 {dimension_numbers = #tpu.dot_dimension_numbers<[1], [1], [0], [0], [0, 0, 1, 0], [], []>} : vector<8x8xf32>, vector<12x8xf32>, vector<8x12xf32> -> vector<8x12xf32>
    %cst_55 = arith.constant 0.353553385 : f32
    %72 = vector.broadcast %cst_55 : f32 to vector<8x12xf32>
    %73 = arith.mulf %71, %72 : vector<8x12xf32>
    %cst_56 = arith.constant dense<0xFF800000> : vector<8xf32>
    %74 = vector.multi_reduction <maximumf>, %73, %cst_56 [1] : vector<8x12xf32> to vector<8xf32>
    %75 = vector.shape_cast %74 : vector<8xf32> to vector<8x1xf32>
    %76 = vector.broadcast %75 : vector<8x1xf32> to vector<8x12xf32>
    %77 = arith.subf %73, %76 : vector<8x12xf32>
    %78 = math.exp %77 : vector<8x12xf32>
    %cst_57 = arith.constant dense<0.000000e+00> : vector<8xf32>
    %79 = vector.multi_reduction <add>, %78, %cst_57 [1] : vector<8x12xf32> to vector<8xf32>
    %80 = vector.shape_cast %79 : vector<8xf32> to vector<8x1xf32>
    %81 = tpu.reciprocal %80 {approx = true} : vector<8x1xf32> -> vector<8x1xf32>
    %82 = vector.broadcast %81 : vector<8x1xf32> to vector<8x12xf32>
    %83 = arith.mulf %78, %82 : vector<8x12xf32>
    %cst_58 = arith.constant dense<0.000000e+00> : vector<8x8xf32>
    %84 = tpu.matmul %83, %70, %cst_58 {dimension_numbers = #tpu.dot_dimension_numbers<[1], [0], [0], [1], [0, 0, 1, 1], [], []>} : vector<8x12xf32>, vector<12x8xf32>, vector<8x8xf32> -> vector<8x8xf32>
    %c0_59 = arith.constant 0 : index
    %c24_60 = arith.constant 24 : index
    %85 = vector.load %arg13[%c0_59, %c24_60] : memref<16x32xf32, #tpu.memory_space<vmem>>, vector<8x8xf32>
    tpu.vector_store %arg13[%c0_59, %c24_60], %84 {strides = array<i32>} : memref<16x32xf32, #tpu.memory_space<vmem>>, vector<8x8xf32>,
    %c8_61 = arith.constant 8 : index
    %c0_62 = arith.constant 0 : index
    %86 = vector.load %arg11[%c8_61, %c0_62] : memref<16x32xf32, #tpu.memory_space<vmem>>, vector<8x8xf32>
    %c12 = arith.constant 12 : index
    %c0_63 = arith.constant 0 : index
    %87 = vector.load %arg12[%c12, %c0_63] : memref<24x64xf32, #tpu.memory_space<vmem>>, vector<12x8xf32>
    %c12_64 = arith.constant 12 : index
    %c32_65 = arith.constant 32 : index
    %88 = vector.load %arg12[%c12_64, %c32_65] : memref<24x64xf32, #tpu.memory_space<vmem>>, vector<12x8xf32>
    %cst_66 = arith.constant dense<0.000000e+00> : vector<8x12xf32>
    %89 = tpu.matmul %86, %87, %cst_66 {dimension_numbers = #tpu.dot_dimension_numbers<[1], [1], [0], [0], [0, 0, 1, 0], [], []>} : vector<8x8xf32>, vector<12x8xf32>, vector<8x12xf32> -> vector<8x12xf32>
    %cst_67 = arith.constant 0.353553385 : f32
    %90 = vector.broadcast %cst_67 : f32 to vector<8x12xf32>
    %91 = arith.mulf %89, %90 : vector<8x12xf32>
    %cst_68 = arith.constant dense<0xFF800000> : vector<8xf32>
    %92 = vector.multi_reduction <maximumf>, %91, %cst_68 [1] : vector<8x12xf32> to vector<8xf32>
    %93 = vector.shape_cast %92 : vector<8xf32> to vector<8x1xf32>
    %94 = vector.broadcast %93 : vector<8x1xf32> to vector<8x12xf32>
    %95 = arith.subf %91, %94 : vector<8x12xf32>
    %96 = math.exp %95 : vector<8x12xf32>
    %cst_69 = arith.constant dense<0.000000e+00> : vector<8xf32>
    %97 = vector.multi_reduction <add>, %96, %cst_69 [1] : vector<8x12xf32> to vector<8xf32>
    %98 = vector.shape_cast %97 : vector<8xf32> to vector<8x1xf32>
    %99 = tpu.reciprocal %98 {approx = true} : vector<8x1xf32> -> vector<8x1xf32>
    %100 = vector.broadcast %99 : vector<8x1xf32> to vector<8x12xf32>
    %101 = arith.mulf %96, %100 : vector<8x12xf32>
    %cst_70 = arith.constant dense<0.000000e+00> : vector<8x8xf32>
    %102 = tpu.matmul %101, %88, %cst_70 {dimension_numbers = #tpu.dot_dimension_numbers<[1], [0], [0], [1], [0, 0, 1, 1], [], []>} : vector<8x12xf32>, vector<12x8xf32>, vector<8x8xf32> -> vector<8x8xf32>
    %c8_71 = arith.constant 8 : index
    %c0_72 = arith.constant 0 : index
    %103 = vector.load %arg13[%c8_71, %c0_72] : memref<16x32xf32, #tpu.memory_space<vmem>>, vector<8x8xf32>
    tpu.vector_store %arg13[%c8_71, %c0_72], %102 {strides = array<i32>} : memref<16x32xf32, #tpu.memory_space<vmem>>, vector<8x8xf32>,
    %c8_73 = arith.constant 8 : index
    %c8_74 = arith.constant 8 : index
    %104 = vector.load %arg11[%c8_73, %c8_74] : memref<16x32xf32, #tpu.memory_space<vmem>>, vector<8x8xf32>
    %c12_75 = arith.constant 12 : index
    %c8_76 = arith.constant 8 : index
    %105 = vector.load %arg12[%c12_75, %c8_76] : memref<24x64xf32, #tpu.memory_space<vmem>>, vector<12x8xf32>
    %c12_77 = arith.constant 12 : index
    %c40_78 = arith.constant 40 : index
    %106 = vector.load %arg12[%c12_77, %c40_78] : memref<24x64xf32, #tpu.memory_space<vmem>>, vector<12x8xf32>
    %cst_79 = arith.constant dense<0.000000e+00> : vector<8x12xf32>
    %107 = tpu.matmul %104, %105, %cst_79 {dimension_numbers = #tpu.dot_dimension_numbers<[1], [1], [0], [0], [0, 0, 1, 0], [], []>} : vector<8x8xf32>, vector<12x8xf32>, vector<8x12xf32> -> vector<8x12xf32>
    %cst_80 = arith.constant 0.353553385 : f32
    %108 = vector.broadcast %cst_80 : f32 to vector<8x12xf32>
    %109 = arith.mulf %107, %108 : vector<8x12xf32>
    %cst_81 = arith.constant dense<0xFF800000> : vector<8xf32>
    %110 = vector.multi_reduction <maximumf>, %109, %cst_81 [1] : vector<8x12xf32> to vector<8xf32>
    %111 = vector.shape_cast %110 : vector<8xf32> to vector<8x1xf32>
    %112 = vector.broadcast %111 : vector<8x1xf32> to vector<8x12xf32>
    %113 = arith.subf %109, %112 : vector<8x12xf32>
    %114 = math.exp %113 : vector<8x12xf32>
    %cst_82 = arith.constant dense<0.000000e+00> : vector<8xf32>
    %115 = vector.multi_reduction <add>, %114, %cst_82 [1] : vector<8x12xf32> to vector<8xf32>
    %116 = vector.shape_cast %115 : vector<8xf32> to vector<8x1xf32>
    %117 = tpu.reciprocal %116 {approx = true} : vector<8x1xf32> -> vector<8x1xf32>
    %118 = vector.broadcast %117 : vector<8x1xf32> to vector<8x12xf32>
    %119 = arith.mulf %114, %118 : vector<8x12xf32>
    %cst_83 = arith.constant dense<0.000000e+00> : vector<8x8xf32>
    %120 = tpu.matmul %119, %106, %cst_83 {dimension_numbers = #tpu.dot_dimension_numbers<[1], [0], [0], [1], [0, 0, 1, 1], [], []>} : vector<8x12xf32>, vector<12x8xf32>, vector<8x8xf32> -> vector<8x8xf32>
    %c8_84 = arith.constant 8 : index
    %c8_85 = arith.constant 8 : index
    %121 = vector.load %arg13[%c8_84, %c8_85] : memref<16x32xf32, #tpu.memory_space<vmem>>, vector<8x8xf32>
    tpu.vector_store %arg13[%c8_84, %c8_85], %120 {strides = array<i32>} : memref<16x32xf32, #tpu.memory_space<vmem>>, vector<8x8xf32>,
    %c8_86 = arith.constant 8 : index
    %c16_87 = arith.constant 16 : index
    %122 = vector.load %arg11[%c8_86, %c16_87] : memref<16x32xf32, #tpu.memory_space<vmem>>, vector<8x8xf32>
    %c12_88 = arith.constant 12 : index
    %c16_89 = arith.constant 16 : index
    %123 = vector.load %arg12[%c12_88, %c16_89] : memref<24x64xf32, #tpu.memory_space<vmem>>, vector<12x8xf32>
    %c12_90 = arith.constant 12 : index
    %c48_91 = arith.constant 48 : index
    %124 = vector.load %arg12[%c12_90, %c48_91] : memref<24x64xf32, #tpu.memory_space<vmem>>, vector<12x8xf32>
    %cst_92 = arith.constant dense<0.000000e+00> : vector<8x12xf32>
    %125 = tpu.matmul %122, %123, %cst_92 {dimension_numbers = #tpu.dot_dimension_numbers<[1], [1], [0], [0], [0, 0, 1, 0], [], []>} : vector<8x8xf32>, vector<12x8xf32>, vector<8x12xf32> -> vector<8x12xf32>
    %cst_93 = arith.constant 0.353553385 : f32
    %126 = vector.broadcast %cst_93 : f32 to vector<8x12xf32>
    %127 = arith.mulf %125, %126 : vector<8x12xf32>
    %cst_94 = arith.constant dense<0xFF800000> : vector<8xf32>
    %128 = vector.multi_reduction <maximumf>, %127, %cst_94 [1] : vector<8x12xf32> to vector<8xf32>
    %129 = vector.shape_cast %128 : vector<8xf32> to vector<8x1xf32>
    %130 = vector.broadcast %129 : vector<8x1xf32> to vector<8x12xf32>
    %131 = arith.subf %127, %130 : vector<8x12xf32>
    %132 = math.exp %131 : vector<8x12xf32>
    %cst_95 = arith.constant dense<0.000000e+00> : vector<8xf32>
    %133 = vector.multi_reduction <add>, %132, %cst_95 [1] : vector<8x12xf32> to vector<8xf32>
    %134 = vector.shape_cast %133 : vector<8xf32> to vector<8x1xf32>
    %135 = tpu.reciprocal %134 {approx = true} : vector<8x1xf32> -> vector<8x1xf32>
    %136 = vector.broadcast %135 : vector<8x1xf32> to vector<8x12xf32>
    %137 = arith.mulf %132, %136 : vector<8x12xf32>
    %cst_96 = arith.constant dense<0.000000e+00> : vector<8x8xf32>
    %138 = tpu.matmul %137, %124, %cst_96 {dimension_numbers = #tpu.dot_dimension_numbers<[1], [0], [0], [1], [0, 0, 1, 1], [], []>} : vector<8x12xf32>, vector<12x8xf32>, vector<8x8xf32> -> vector<8x8xf32>
    %c8_97 = arith.constant 8 : index
    %c16_98 = arith.constant 16 : index
    %139 = vector.load %arg13[%c8_97, %c16_98] : memref<16x32xf32, #tpu.memory_space<vmem>>, vector<8x8xf32>
    tpu.vector_store %arg13[%c8_97, %c16_98], %138 {strides = array<i32>} : memref<16x32xf32, #tpu.memory_space<vmem>>, vector<8x8xf32>,
    %c8_99 = arith.constant 8 : index
    %c24_100 = arith.constant 24 : index
    %140 = vector.load %arg11[%c8_99, %c24_100] : memref<16x32xf32, #tpu.memory_space<vmem>>, vector<8x8xf32>
    %c12_101 = arith.constant 12 : index
    %c24_102 = arith.constant 24 : index
    %141 = vector.load %arg12[%c12_101, %c24_102] : memref<24x64xf32, #tpu.memory_space<vmem>>, vector<12x8xf32>
    %c12_103 = arith.constant 12 : index
    %c56_104 = arith.constant 56 : index
    %142 = vector.load %arg12[%c12_103, %c56_104] : memref<24x64xf32, #tpu.memory_space<vmem>>, vector<12x8xf32>
    %cst_105 = arith.constant dense<0.000000e+00> : vector<8x12xf32>
    %143 = tpu.matmul %140, %141, %cst_105 {dimension_numbers = #tpu.dot_dimension_numbers<[1], [1], [0], [0], [0, 0, 1, 0], [], []>} : vector<8x8xf32>, vector<12x8xf32>, vector<8x12xf32> -> vector<8x12xf32>
    %cst_106 = arith.constant 0.353553385 : f32
    %144 = vector.broadcast %cst_106 : f32 to vector<8x12xf32>
    %145 = arith.mulf %143, %144 : vector<8x12xf32>
    %cst_107 = arith.constant dense<0xFF800000> : vector<8xf32>
    %146 = vector.multi_reduction <maximumf>, %145, %cst_107 [1] : vector<8x12xf32> to vector<8xf32>
    %147 = vector.shape_cast %146 : vector<8xf32> to vector<8x1xf32>
    %148 = vector.broadcast %147 : vector<8x1xf32> to vector<8x12xf32>
    %149 = arith.subf %145, %148 : vector<8x12xf32>
    %150 = math.exp %149 : vector<8x12xf32>
    %cst_108 = arith.constant dense<0.000000e+00> : vector<8xf32>
    %151 = vector.multi_reduction <add>, %150, %cst_108 [1] : vector<8x12xf32> to vector<8xf32>
    %152 = vector.shape_cast %151 : vector<8xf32> to vector<8x1xf32>
    %153 = tpu.reciprocal %152 {approx = true} : vector<8x1xf32> -> vector<8x1xf32>
    %154 = vector.broadcast %153 : vector<8x1xf32> to vector<8x12xf32>
    %155 = arith.mulf %150, %154 : vector<8x12xf32>
    %cst_109 = arith.constant dense<0.000000e+00> : vector<8x8xf32>
    %156 = tpu.matmul %155, %142, %cst_109 {dimension_numbers = #tpu.dot_dimension_numbers<[1], [0], [0], [1], [0, 0, 1, 1], [], []>} : vector<8x12xf32>, vector<12x8xf32>, vector<8x8xf32> -> vector<8x8xf32>
    %c8_110 = arith.constant 8 : index
    %c24_111 = arith.constant 24 : index
    %157 = vector.load %arg13[%c8_110, %c24_111] : memref<16x32xf32, #tpu.memory_space<vmem>>, vector<8x8xf32>
    tpu.vector_store %arg13[%c8_110, %c24_111], %156 {strides = array<i32>} : memref<16x32xf32, #tpu.memory_space<vmem>>, vector<8x8xf32>,
    %c0_112 = arith.constant 0 : index
    %c0_113 = arith.constant 0 : index
    %158 = vector.load %arg13[%c0_112, %c0_113] : memref<16x32xf32, #tpu.memory_space<vmem>>, vector<16x32xf32>
    %c0_114 = arith.constant 0 : index
    %c0_115 = arith.constant 0 : index
    %159 = vector.load %arg6[%c0_114, %c0_115] : memref<32x32xf32, #tpu.memory_space<vmem>>, vector<32x32xf32>
    %cst_116 = arith.constant dense<0.000000e+00> : vector<16x32xf32>
    %160 = tpu.matmul %158, %159, %cst_116 {dimension_numbers = #tpu.dot_dimension_numbers<[1], [0], [0], [1], [0, 0, 1, 1], [], []>} : vector<16x32xf32>, vector<32x32xf32>, vector<16x32xf32> -> vector<16x32xf32>
    %c0_117 = arith.constant 0 : index
    %c0_118 = arith.constant 0 : index
    %161 = vector.load %arg7[%c0_117, %c0_118] : memref<1x32xf32, #tpu.memory_space<vmem>>, vector<1x32xf32>
    %162 = vector.broadcast %161 : vector<1x32xf32> to vector<16x32xf32>
    %163 = arith.addf %160, %162 : vector<16x32xf32>
    %c0_119 = arith.constant 0 : index
    %c0_120 = arith.constant 0 : index
    %164 = vector.load %arg8[%c0_119, %c0_120] : memref<1x32xf32, #tpu.memory_space<vmem>>, vector<1x32xf32>
    %c0_121 = arith.constant 0 : index
    %c0_122 = arith.constant 0 : index
    %165 = vector.load %arg9[%c0_121, %c0_122] : memref<1x32xf32, #tpu.memory_space<vmem>>, vector<1x32xf32>
    %166 = arith.addf %163, %0 : vector<16x32xf32>
    %cst_123 = arith.constant dense<0.000000e+00> : vector<16xf32>
    %167 = vector.multi_reduction <add>, %166, %cst_123 [1] : vector<16x32xf32> to vector<16xf32>
    %168 = vector.shape_cast %167 : vector<16xf32> to vector<16x1xf32>
    %cst_124 = arith.constant 3.200000e+01 : f32
    %169 = vector.broadcast %cst_124 : f32 to vector<16x1xf32>
    %170 = arith.divf %168, %169 : vector<16x1xf32>
    %171 = vector.broadcast %170 : vector<16x1xf32> to vector<16x32xf32>
    %172 = arith.subf %166, %171 : vector<16x32xf32>
    %173 = arith.mulf %172, %172 : vector<16x32xf32>
    %cst_125 = arith.constant dense<0.000000e+00> : vector<16xf32>
    %174 = vector.multi_reduction <add>, %173, %cst_125 [1] : vector<16x32xf32> to vector<16xf32>
    %175 = vector.shape_cast %174 : vector<16xf32> to vector<16x1xf32>
    %cst_126 = arith.constant 3.200000e+01 : f32
    %176 = vector.broadcast %cst_126 : f32 to vector<16x1xf32>
    %177 = arith.divf %175, %176 : vector<16x1xf32>
    %cst_127 = arith.constant 9.99999974E-6 : f32
    %178 = vector.broadcast %cst_127 : f32 to vector<16x1xf32>
    %179 = arith.addf %177, %178 : vector<16x1xf32>
    %180 = math.rsqrt %179 : vector<16x1xf32>
    %181 = vector.broadcast %180 : vector<16x1xf32> to vector<16x32xf32>
    %182 = arith.mulf %172, %181 : vector<16x32xf32>
    %183 = vector.broadcast %164 : vector<1x32xf32> to vector<16x32xf32>
    %184 = arith.mulf %182, %183 : vector<16x32xf32>
    %185 = vector.broadcast %165 : vector<1x32xf32> to vector<16x32xf32>
    %186 = arith.addf %184, %185 : vector<16x32xf32>
    %c0_128 = arith.constant 0 : index
    %c0_129 = arith.constant 0 : index
    %187 = vector.load %arg10[%c0_128, %c0_129] : memref<16x32xf32, #tpu.memory_space<vmem>>, vector<16x32xf32>
    tpu.vector_store %arg10[%c0_128, %c0_129], %186 {strides = array<i32>} : memref<16x32xf32, #tpu.memory_space<vmem>>, vector<16x32xf32>,
    return
  }
}

module attributes {stable_mosaic.version = 11 : i64} {
  func.func @_final_norm_fc_kernel(%arg0: memref<16x32xf32, #tpu.memory_space<vmem>>, %arg1: memref<1x32xf32, #tpu.memory_space<vmem>>, %arg2: memref<1x32xf32, #tpu.memory_space<vmem>>, %arg3: memref<32x128xf32, #tpu.memory_space<vmem>>, %arg4: memref<1x128xf32, #tpu.memory_space<vmem>>, %arg5: memref<16x128xf32, #tpu.memory_space<vmem>>) attributes {dimension_semantics = [], scalar_prefetch = 0 : i64, scratch_operands = 0 : i64, tpu.core_type = #tpu.core_type<tc>} {
    %c0 = arith.constant 0 : index
    %c0_0 = arith.constant 0 : index
    %0 = vector.load %arg0[%c0, %c0_0] : memref<16x32xf32, #tpu.memory_space<vmem>>, vector<16x32xf32>
    %cst = arith.constant dense<0.000000e+00> : vector<16xf32>
    %1 = vector.multi_reduction <add>, %0, %cst [1] : vector<16x32xf32> to vector<16xf32>
    %2 = vector.shape_cast %1 : vector<16xf32> to vector<16x1xf32>
    %cst_1 = arith.constant 3.200000e+01 : f32
    %3 = vector.broadcast %cst_1 : f32 to vector<16x1xf32>
    %4 = arith.divf %2, %3 : vector<16x1xf32>
    %5 = vector.broadcast %4 : vector<16x1xf32> to vector<16x32xf32>
    %6 = arith.subf %0, %5 : vector<16x32xf32>
    %7 = arith.mulf %6, %6 : vector<16x32xf32>
    %cst_2 = arith.constant dense<0.000000e+00> : vector<16xf32>
    %8 = vector.multi_reduction <add>, %7, %cst_2 [1] : vector<16x32xf32> to vector<16xf32>
    %9 = vector.shape_cast %8 : vector<16xf32> to vector<16x1xf32>
    %cst_3 = arith.constant 3.200000e+01 : f32
    %10 = vector.broadcast %cst_3 : f32 to vector<16x1xf32>
    %11 = arith.divf %9, %10 : vector<16x1xf32>
    %cst_4 = arith.constant 9.99999974E-6 : f32
    %12 = vector.broadcast %cst_4 : f32 to vector<16x1xf32>
    %13 = arith.addf %11, %12 : vector<16x1xf32>
    %14 = math.rsqrt %13 : vector<16x1xf32>
    %15 = vector.broadcast %14 : vector<16x1xf32> to vector<16x32xf32>
    %16 = arith.mulf %6, %15 : vector<16x32xf32>
    %c0_5 = arith.constant 0 : index
    %c0_6 = arith.constant 0 : index
    %17 = vector.load %arg1[%c0_5, %c0_6] : memref<1x32xf32, #tpu.memory_space<vmem>>, vector<1x32xf32>
    %18 = vector.broadcast %17 : vector<1x32xf32> to vector<16x32xf32>
    %19 = arith.mulf %16, %18 : vector<16x32xf32>
    %c0_7 = arith.constant 0 : index
    %c0_8 = arith.constant 0 : index
    %20 = vector.load %arg2[%c0_7, %c0_8] : memref<1x32xf32, #tpu.memory_space<vmem>>, vector<1x32xf32>
    %21 = vector.broadcast %20 : vector<1x32xf32> to vector<16x32xf32>
    %22 = arith.addf %19, %21 : vector<16x32xf32>
    %c0_9 = arith.constant 0 : index
    %c0_10 = arith.constant 0 : index
    %23 = vector.load %arg3[%c0_9, %c0_10] : memref<32x128xf32, #tpu.memory_space<vmem>>, vector<32x128xf32>
    %cst_11 = arith.constant dense<0.000000e+00> : vector<16x128xf32>
    %24 = tpu.matmul %22, %23, %cst_11 {dimension_numbers = #tpu.dot_dimension_numbers<[1], [0], [0], [1], [0, 0, 1, 1], [], []>} : vector<16x32xf32>, vector<32x128xf32>, vector<16x128xf32> -> vector<16x128xf32>
    %c0_12 = arith.constant 0 : index
    %c0_13 = arith.constant 0 : index
    %25 = vector.load %arg4[%c0_12, %c0_13] : memref<1x128xf32, #tpu.memory_space<vmem>>, vector<1x128xf32>
    %26 = vector.broadcast %25 : vector<1x128xf32> to vector<16x128xf32>
    %27 = arith.addf %24, %26 : vector<16x128xf32>
    %c0_14 = arith.constant 0 : index
    %c0_15 = arith.constant 0 : index
    %28 = vector.load %arg5[%c0_14, %c0_15] : memref<16x128xf32, #tpu.memory_space<vmem>>, vector<16x128xf32>
    tpu.vector_store %arg5[%c0_14, %c0_15], %27 {strides = array<i32>} : memref<16x128xf32, #tpu.memory_space<vmem>>, vector<16x128xf32>,
    return
  }
}

</mosaic_0001>

<bundles_post_ra>
// kernel: embedded_transformer_forward.13
= control target key start
LH: loop header
LB: loop body
LE: loop exit
PB: predicated region body
PF: predicated region fallthrough
CT: control target
= control target key end

     0   :  { %v386_v0 = vmov 0.0   ;;  %vm387_vm0 = vmmov 0   ;;  %vm40_vm1 = vcmask 261120   ;;  %vm148_vm2 = vcmask 523264   ;;  %s530_s1 = inlined_call_operand.vmem [shape: f32[32,64], index: 1, kind: input, shape index: {}]   ;;  %s531_s3 = inlined_call_operand.vmem [shape: f32[64,32], index: 3, kind: input, shape index: {}]   ;;  %s532_s0 = inlined_call_operand.vmem [shape: f32[24,32], index: 0, kind: input, shape index: {}]   ;;  %s533_s2 = inlined_call_operand.vmem [shape: f32[1,64], index: 2, kind: input, shape index: {}]   ;;  %s534_s4 = inlined_call_operand.vmem [shape: f32[1,32], index: 4, kind: input, shape index: {}]   ;;  %s535_s5 = inlined_call_operand.vmem [shape: f32[1,32], index: 5, kind: input, shape index: {}]   ;;  %s536_s6 = inlined_call_operand.vmem [shape: f32[1,32], index: 6, kind: input, shape index: {}]   ;;  %s537_s7 = inlined_call_operand.vmem [shape: f32[24,32], index: 7, kind: output, shape index: {}]  }
   0x1   :  { %336 = vmatprep.subr.mxu0 %v386_v0  ;;  %v32_v1 = vld [vmem:[%s530_s1 + $0x18] sm:$0xff]  ;;  %v31_v2 = vld [vmem:[%s530_s1 + $0x10] sm:$0xff]  ;;  %344 = vmatprep.mubr.msk.f32.mxu0 %vm387_vm0, %v386_v0  ;;  %v30_v3 = vld [vmem:[%s530_s1 + $0x8] sm:$0xff] }
   0x2   :  { %337 = vmatpush3.msra.mxu0 %v32_v1  ;;  %353 = vmatprep.subr.mxu1 %v386_v0  ;;  %v140_v4 = vld [vmem:[%s531_s3 + $0x38] sm:$0xff]  ;;  %v139_v5 = vld [vmem:[%s531_s3 + $0x30] sm:$0xff]  ;;  %v29_v6 = vld [vmem:[%s530_s1] sm:$0xff] }
   0x3   :  { %338 = vmatprep.subr.mxu0 %v386_v0  ;;  %369 = vmatprep.mubr.msk.f32.mxu1 %vm387_vm0, %v386_v0  ;;  %v138_v7 = vld [vmem:[%s531_s3 + $0x28] sm:$0xff]  ;;  %v26_v8 = vld [vmem:[%s532_s0] sm:$0xff]  ;;  %v136_v10 = vld [vmem:[%s531_s3 + $0x18] sm:$0xff] }
   0x4   :  { %339 = vmatpush3.msra.mxu0 %v31_v2  ;;  %354 = vmatpush3.msra.mxu1 %v140_v4  ;;  %v137_v9 = vld [vmem:[%s531_s3 + $0x20] sm:$0xff]  ;;  %v27_v11 = vld [vmem:[%s532_s0 + $0x8] sm:$0xff]  ;;  %v28_v12 = vld [vmem:[%s532_s0 + $0x10] sm:$0xff] }
   0x5   :  { %340 = vmatprep.subr.mxu0 %v386_v0  ;;  %355 = vmatprep.subr.mxu1 %v386_v0  ;;  %v135_v13 = vld [vmem:[%s531_s3 + $0x10] sm:$0xff]  ;;  %v134_v14 = vld [vmem:[%s531_s3 + $0x8] sm:$0xff]  ;;  %v133_v15 = vld [vmem:[%s531_s3] sm:$0xff] }
   0x6   :  { %341 = vmatpush3.msra.mxu0 %v30_v3  ;;  %356 = vmatpush3.msra.mxu1 %v139_v5  ;;  %v308_v16 = vld [vmem:[%s533_s2] ss:$0 sm:$0xff] }
   0x7   :  { %342 = vmatprep.subr.mxu0 %v386_v0  ;;  %357 = vmatprep.subr.mxu1 %v386_v0  ;;  %v312_v29 = vld [vmem:[%s534_s4] ss:$0 sm:$0xff] }
   0x8   :  { %343 = vmatpush3.msra.mxu0 %v29_v6  ;;  %358 = vmatpush3.msra.mxu1 %v138_v7  ;;  %v316_v6 = vld [vmem:[%s535_s5] ss:$0 sm:$0xff] }
   0x9   :  { %345 = vmatmul.mubr.msk.f32.vlgmr.msra.gmra.mxu0 %vm40_vm1, %v26_v8  ;;  %359 = vmatprep.subr.mxu1 %v386_v0 }
   0xa   :  { %347 = vmatprep.mubr.msk.f32.mxu0 %vm387_vm0, %v386_v0  ;;  %360 = vmatpush3.msra.mxu1 %v137_v9 }
   0xb   :  { %361 = vmatprep.subr.mxu1 %v386_v0 }
   0xc   :  { %362 = vmatpush3.msra.mxu1 %v136_v10 }
   0xd   :  { %348 = vmatmul.mubr.msk.f32.gmra.mxu0 %vm40_vm1, %v27_v11  ;;  %363 = vmatprep.subr.mxu1 %v386_v0 }
   0xe   :  { %350 = vmatprep.mubr.msk.f32.mxu0 %vm387_vm0, %v386_v0  ;;  %364 = vmatpush3.msra.mxu1 %v135_v13 }
   0xf   :  { %365 = vmatprep.subr.mxu1 %v386_v0 }
  0x10   :  { %366 = vmatpush3.msra.mxu1 %v134_v14 }
  0x11   :  { %351 = vmatmul.mubr.msk.f32.gmra.mxu0 %vm40_vm1, %v28_v12  ;;  %367 = vmatprep.subr.mxu1 %v386_v0 }
  0x12   :  { %368 = vmatpush3.msra.mxu1 %v133_v15 }
  0xc9   :  { %v116_v17 = vpop.f32.mrf.mxu0 }
  0xca   :  { %v117_v18 = vadd.f32 %v308_v16, %v116_v17 }
  0xcb   :  { %v346_v19 = vpop.f32.mrf.mxu0 }
  0xcc   :  { %v130_v20 = vmax.f32 %v117_v18, 0.0 }
  0xcd   :  { %v121_v21 = vpop.f32.mrf.mxu0 }
  0xce   :  { %v122_v22 = vadd.f32 %v308_v16, %v121_v21  ;;  %370 = vmatmul.mubr.msk.f32.vlgmr.msra.gmra.mxu1 %vm148_vm2, %v130_v20 }
  0xcf   :  { %v349_v23 = vpop.f32.mrf.mxu0  ;;  %372 = vmatprep.mubr.msk.f32.mxu1 %vm387_vm0, %v386_v0 }
  0xd0   :  { %v131_v24 = vmax.f32 %v122_v22, 0.0 }
  0xd1   :  { %v126_v25 = vpop.f32.mrf.mxu0 }
  0xd2   :  { %v127_v26 = vadd.f32 %v308_v16, %v126_v25  ;;  %373 = vmatmul.mubr.msk.f32.gmra.mxu1 %vm148_vm2, %v131_v24 }
  0xd3   :  { %v352_v27 = vpop.f32.mrf.mxu0  ;;  %375 = vmatprep.mubr.msk.f32.mxu1 %vm387_vm0, %v386_v0 }
  0xd4   :  { %v132_v28 = vmax.f32 %v127_v26, 0.0 }
  0xd6   :  { %376 = vmatmul.mubr.msk.f32.gmra.mxu1 %vm148_vm2, %v132_v28 }
 0x18e   :  { %v224_v30 = vpop.f32.mrf.mxu1 }
 0x18f   :  { %v225_v31 = vadd.f32 %v312_v29, %v224_v30 }
 0x190   :  { %v371_v32 = vpop.f32.mrf.mxu1 }
 0x191   :  { %v240_v33 = vadd.f32 %v225_v31, %v26_v8  ;;  %v317_v8 = vld [vmem:[%s536_s6] ss:$0 sm:$0xff] }
 0x192   :  { %v229_v34 = vpop.f32.mrf.mxu1 }
 0x193   :  { %v230_v35 = vadd.f32 %v312_v29, %v229_v34  ;;  %v243_v36 = vsel %vm40_vm1, %v240_v33, 0.0 }
 0x194   :  { %244 = vadd.xlane.f32.xlu0 %v243_v36  ;;  %v374_v37 = vpop.f32.mrf.mxu1 }
 0x195   :  { %v241_v38 = vadd.f32 %v230_v35, %v27_v11 }
 0x196   :  { %v234_v39 = vpop.f32.mrf.mxu1 }
 0x197   :  { %v235_v40 = vadd.f32 %v312_v29, %v234_v39  ;;  %v246_v41 = vsel %vm40_vm1, %v241_v38, 0.0 }
 0x198   :  { %247 = vadd.xlane.f32.xlu0 %v246_v41  ;;  %v377_v42 = vpop.f32.mrf.mxu1 }
 0x199   :  { %v242_v43 = vadd.f32 %v235_v40, %v28_v12 }
 0x19b   :  { %v249_v44 = vsel %vm40_vm1, %v242_v43, 0.0 }
 0x19c   :  { %250 = vadd.xlane.f32.xlu1 %v249_v44 }
 0x21d   :  { %v245_v45 = vpop.xlane.xlu0 %244 }
 0x21e   :  { %v253_v46 = vmul.f32 0.03125, %v245_v45 }
 0x220   :  { %v256_v47 = vsub.f32 %v240_v33, %v253_v46 }
 0x221   :  { %v248_v48 = vpop.xlane.xlu0 %247 }
 0x222   :  { %v254_v49 = vmul.f32 0.03125, %v248_v48  ;;  %v259_v50 = vmul.f32 %v256_v47, %v256_v47 }
 0x224   :  { %v257_v51 = vsub.f32 %v241_v38, %v254_v49  ;;  %v262_v52 = vsel %vm40_vm1, %v259_v50, 0.0 }
 0x225   :  { %263 = vadd.xlane.f32.xlu1 %v262_v52  ;;  %v251_v53 = vpop.xlane.xlu1 %250 }
 0x226   :  { %v255_v54 = vmul.f32 0.03125, %v251_v53  ;;  %v260_v55 = vmul.f32 %v257_v51, %v257_v51 }
 0x228   :  { %v258_v56 = vsub.f32 %v242_v43, %v255_v54  ;;  %v265_v57 = vsel %vm40_vm1, %v260_v55, 0.0 }
 0x229   :  { %266 = vadd.xlane.f32.xlu0 %v265_v57 }
 0x22a   :  { %v261_v58 = vmul.f32 %v258_v56, %v258_v56 }
 0x22c   :  { %v268_v59 = vsel %vm40_vm1, %v261_v58, 0.0 }
 0x22d   :  { %269 = vadd.xlane.f32.xlu1 %v268_v59 }
 0x2ae   :  { %v264_v60 = vpop.xlane.xlu1 %263 }
 0x2af   :  { %v271_v61 = vmul.f32 0.03125, %v264_v60 }
 0x2b1   :  { %v274_v62 = vadd.f32 1e-05, %v271_v61 }
 0x2b2   :  { %v267_v63 = vpop.xlane.xlu0 %266 }
 0x2b3   :  { %380 = vrsqrt.f32 %v274_v62  ;;  %v272_v0 = vmul.f32 0.03125, %v267_v63 }
 0x2b5   :  { %v275_v1 = vadd.f32 1e-05, %v272_v0 }
 0x2b6   :  { %v270_v2 = vpop.xlane.xlu1 %269 }
 0x2b7   :  { %382 = vrsqrt.f32 %v275_v1  ;;  %v273_v3 = vmul.f32 0.03125, %v270_v2 }
 0x2b9   :  { %v276_v4 = vadd.f32 1e-05, %v273_v3 }
 0x2bb   :  { %384 = vrsqrt.f32 %v276_v4 }
 0x2c0   :  { %v381_v5 = vpop.eup %380 }
 0x2c1   :  { %v280_v7 = vmul.f32 %v381_v5, %v256_v47 }
 0x2c3   :  { %v289_v9 = vmul.f32 %v316_v6, %v280_v7 }
 0x2c4   :  { %v383_v10 = vpop.eup %382 }
 0x2c5   :  { %v298_v11 = vadd.f32 %v317_v8, %v289_v9  ;;  %v281_v12 = vmul.f32 %v383_v10, %v257_v51 }
 0x2c7   :  { %301 = vst.msk [vmem:[%s537_s7] sm:$0xff] %vm40_vm1, %v298_v11  ;;  %v290_v13 = vmul.f32 %v316_v6, %v281_v12 }
 0x2c8   :  { %v385_v14 = vpop.eup %384 }
 0x2c9   :  { %v299_v15 = vadd.f32 %v317_v8, %v290_v13  ;;  %v282_v16 = vmul.f32 %v385_v14, %v258_v56 }
 0x2cb   :  { %302 = vst.msk [vmem:[%s537_s7 + $0x8] sm:$0xff] %vm40_vm1, %v299_v15  ;;  %v291_v17 = vmul.f32 %v316_v6, %v282_v16 }
 0x2cd   :  { %v300_v18 = vadd.f32 %v317_v8, %v291_v17 }
 0x2cf   :  { %303 = vst.msk [vmem:[%s537_s7 + $0x10] sm:$0xff] %vm40_vm1, %v300_v18 }

// kernel: embedded_transformer_forward.16
= control target key start
LH: loop header
LB: loop body
LE: loop exit
PB: predicated region body
PF: predicated region fallthrough
CT: control target
= control target key end

     0   :  { %vm17_vm0 = vcmask 261120   ;;  %s146_s0 = inlined_call_operand.vmem [shape: f32[24,32], index: 0, kind: input, shape index: {}]   ;;  %s147_s1 = inlined_call_operand.vmem [shape: f32[1,32], index: 1, kind: input, shape index: {}]   ;;  %s148_s2 = inlined_call_operand.vmem [shape: f32[1,32], index: 2, kind: input, shape index: {}]   ;;  %s149_s3 = inlined_call_operand.vmem [shape: f32[24,32], index: 3, kind: output, shape index: {}]  }
   0x1   :  { %v14_v0 = vld [vmem:[%s146_s0] sm:$0xff]  ;;  %v16_v1 = vld [vmem:[%s146_s0 + $0x10] sm:$0xff]  ;;  %v15_v2 = vld [vmem:[%s146_s0 + $0x8] sm:$0xff] }
   0x2   :  { %v18_v3 = vsel %vm17_vm0, %v14_v0, 0.0  ;;  %v24_v4 = vsel %vm17_vm0, %v16_v1, 0.0  ;;  %v21_v5 = vsel %vm17_vm0, %v15_v2, 0.0  ;;  %v85_v31 = vld [vmem:[%s147_s1] ss:$0 sm:$0xff] }
   0x3   :  { %19 = vadd.xlane.f32.xlu0 %v18_v3  ;;  %25 = vadd.xlane.f32.xlu1 %v24_v4  ;;  %v86_v33 = vld [vmem:[%s148_s2] ss:$0 sm:$0xff] }
   0x7   :  { %22 = vadd.xlane.f32.xlu0 %v21_v5 }
  0x8c   :  { %v20_v6 = vpop.xlane.xlu0 %19  ;;  %v26_v7 = vpop.xlane.xlu1 %25 }
  0x8d   :  { %v28_v8 = vmul.f32 0.03125, %v20_v6  ;;  %v30_v9 = vmul.f32 0.03125, %v26_v7 }
  0x8f   :  { %v31_v10 = vsub.f32 %v14_v0, %v28_v8  ;;  %v33_v11 = vsub.f32 %v16_v1, %v30_v9 }
  0x90   :  { %v23_v12 = vpop.xlane.xlu0 %22 }
  0x91   :  { %v29_v13 = vmul.f32 0.03125, %v23_v12  ;;  %v34_v14 = vmul.f32 %v31_v10, %v31_v10  ;;  %v36_v15 = vmul.f32 %v33_v11, %v33_v11 }
  0x93   :  { %v32_v16 = vsub.f32 %v15_v2, %v29_v13  ;;  %v37_v17 = vsel %vm17_vm0, %v34_v14, 0.0  ;;  %v43_v18 = vsel %vm17_vm0, %v36_v15, 0.0 }
  0x94   :  { %38 = vadd.xlane.f32.xlu1 %v37_v17 }
  0x95   :  { %v35_v19 = vmul.f32 %v32_v16, %v32_v16 }
  0x97   :  { %v40_v20 = vsel %vm17_vm0, %v35_v19, 0.0 }
  0x98   :  { %44 = vadd.xlane.f32.xlu1 %v43_v18  ;;  %41 = vadd.xlane.f32.xlu0 %v40_v20 }
 0x11d   :  { %v39_v21 = vpop.xlane.xlu1 %38 }
 0x11e   :  { %v46_v22 = vmul.f32 0.03125, %v39_v21 }
 0x120   :  { %v49_v23 = vadd.f32 1e-05, %v46_v22 }
 0x121   :  { %v45_v24 = vpop.xlane.xlu1 %44  ;;  %v42_v25 = vpop.xlane.xlu0 %41 }
 0x122   :  { %87 = vrsqrt.f32 %v49_v23  ;;  %v48_v26 = vmul.f32 0.03125, %v45_v24  ;;  %v47_v27 = vmul.f32 0.03125, %v42_v25 }
 0x124   :  { %v51_v28 = vadd.f32 1e-05, %v48_v26  ;;  %v50_v29 = vadd.f32 1e-05, %v47_v27 }
 0x126   :  { %89 = vrsqrt.f32 %v51_v28 }
 0x127   :  { %91 = vrsqrt.f32 %v50_v29 }
 0x12f   :  { %v88_v30 = vpop.eup %87 }
 0x130   :  { %v55_v32 = vmul.f32 %v88_v30, %v31_v10 }
 0x132   :  { %v65_v34 = vmul.f32 %v85_v31, %v55_v32 }
 0x133   :  { %v90_v35 = vpop.eup %89 }
 0x134   :  { %v92_v36 = vpop.eup %91  ;;  %v75_v37 = vadd.f32 %v86_v33, %v65_v34  ;;  %v57_v38 = vmul.f32 %v90_v35, %v33_v11 }
 0x135   :  { %v56_v39 = vmul.f32 %v92_v36, %v32_v16 }
 0x136   :  { %78 = vst.msk [vmem:[%s149_s3] sm:$0xff] %vm17_vm0, %v75_v37  ;;  %v67_v40 = vmul.f32 %v85_v31, %v57_v38 }
 0x137   :  { %v66_v41 = vmul.f32 %v85_v31, %v56_v39 }
 0x138   :  { %v77_v42 = vadd.f32 %v86_v33, %v67_v40 }
 0x139   :  { %v76_v43 = vadd.f32 %v86_v33, %v66_v41 }
 0x13a   :  { %80 = vst.msk [vmem:[%s149_s3 + $0x10] sm:$0xff] %vm17_vm0, %v77_v42 }
 0x13b   :  { %79 = vst.msk [vmem:[%s149_s3 + $0x8] sm:$0xff] %vm17_vm0, %v76_v43 }

// kernel: embedded_transformer_forward.19
= control target key start
LH: loop header
LB: loop body
LE: loop exit
PB: predicated region body
PF: predicated region fallthrough
CT: control target
= control target key end

     0   :  { %vm39_vm0 = vcmask 261120   ;;  %vm138_vm1 = vcmask 523264   ;;  %s439_s1 = inlined_call_operand.vmem [shape: f32[32,64], index: 1, kind: input, shape index: {}]   ;;  %s440_s0 = inlined_call_operand.vmem [shape: f32[16,32], index: 0, kind: input, shape index: {}]   ;;  %s441_s3 = inlined_call_operand.vmem [shape: f32[64,32], index: 3, kind: input, shape index: {}]   ;;  %s442_s2 = inlined_call_operand.vmem [shape: f32[1,64], index: 2, kind: input, shape index: {}]   ;;  %s443_s4 = inlined_call_operand.vmem [shape: f32[1,32], index: 4, kind: input, shape index: {}]   ;;  %s444_s5 = inlined_call_operand.vmem [shape: f32[1,32], index: 5, kind: input, shape index: {}]   ;;  %s445_s6 = inlined_call_operand.vmem [shape: f32[1,32], index: 6, kind: input, shape index: {}]   ;;  %s446_s7 = inlined_call_operand.vmem [shape: f32[16,32], index: 7, kind: output, shape index: {}]  }
   0x1   :  { %v31_v0 = vld [vmem:[%s439_s1 + $0x18] sm:$0xff]  ;;  %v30_v1 = vld [vmem:[%s439_s1 + $0x10] sm:$0xff]  ;;  %v26_v2 = vld [vmem:[%s440_s0] sm:$0xff] }
   0x2   :  { %297 = vmatprep.subr.mxu0 %v31_v0  ;;  %v29_v3 = vld [vmem:[%s439_s1 + $0x8] sm:$0xff]  ;;  %305 = vmatprep.mubr.msk.f32.mxu0 %vm39_vm0, %v26_v2  ;;  %v130_v4 = vld [vmem:[%s441_s3 + $0x38] sm:$0xff]  ;;  %v129_v5 = vld [vmem:[%s441_s3 + $0x30] sm:$0xff] }
   0x3   :  { %298 = vmatpush3.msra.mxu0 %v31_v0  ;;  %308 = vmatprep.subr.mxu1 %v130_v4  ;;  %v28_v6 = vld [vmem:[%s439_s1] sm:$0xff]  ;;  %v128_v7 = vld [vmem:[%s441_s3 + $0x28] sm:$0xff]  ;;  %v126_v10 = vld [vmem:[%s441_s3 + $0x18] sm:$0xff] }
   0x4   :  { %299 = vmatprep.subr.mxu0 %v30_v1  ;;  %309 = vmatpush3.msra.mxu1 %v130_v4  ;;  %v27_v8 = vld [vmem:[%s440_s0 + $0x8] sm:$0xff]  ;;  %v127_v9 = vld [vmem:[%s441_s3 + $0x20] sm:$0xff]  ;;  %v125_v11 = vld [vmem:[%s441_s3 + $0x10] sm:$0xff] }
   0x5   :  { %300 = vmatpush3.msra.mxu0 %v30_v1  ;;  %310 = vmatprep.subr.mxu1 %v129_v5  ;;  %v124_v12 = vld [vmem:[%s441_s3 + $0x8] sm:$0xff]  ;;  %v123_v13 = vld [vmem:[%s441_s3] sm:$0xff] }
   0x6   :  { %301 = vmatprep.subr.mxu0 %v29_v3  ;;  %311 = vmatpush3.msra.mxu1 %v129_v5  ;;  %v273_v14 = vld [vmem:[%s442_s2] ss:$0 sm:$0xff] }
   0x7   :  { %302 = vmatpush3.msra.mxu0 %v29_v3  ;;  %312 = vmatprep.subr.mxu1 %v128_v7  ;;  %v276_v22 = vld [vmem:[%s443_s4] ss:$0 sm:$0xff] }
   0x8   :  { %303 = vmatprep.subr.mxu0 %v28_v6  ;;  %313 = vmatpush3.msra.mxu1 %v128_v7  ;;  %v279_v47 = vld [vmem:[%s444_s5] ss:$0 sm:$0xff] }
   0x9   :  { %304 = vmatpush3.msra.mxu0 %v28_v6  ;;  %314 = vmatprep.subr.mxu1 %v127_v9  ;;  %v280_v49 = vld [vmem:[%s445_s6] ss:$0 sm:$0xff] }
   0xa   :  { %306 = vmatmul.mubr.msk.f32.vlgmr.msra.gmra.mxu0 %vm39_vm0, %v27_v8  ;;  %315 = vmatpush3.msra.mxu1 %v127_v9 }
   0xb   :  { %316 = vmatprep.subr.mxu1 %v126_v10 }
   0xc   :  { %317 = vmatpush3.msra.mxu1 %v126_v10 }
   0xd   :  { %318 = vmatprep.subr.mxu1 %v125_v11 }
   0xe   :  { %319 = vmatpush3.msra.mxu1 %v125_v11 }
   0xf   :  { %320 = vmatprep.subr.mxu1 %v124_v12 }
  0x10   :  { %321 = vmatpush3.msra.mxu1 %v124_v12 }
  0x11   :  { %322 = vmatprep.subr.mxu1 %v123_v13 }
  0x12   :  { %323 = vmatpush3.msra.mxu1 %v123_v13 }
  0xca   :  { %v307_v15 = vpop.f32.mrf.mxu0 }
  0xcb   :  { %v118_v16 = vadd.f32 %v307_v15, %v273_v14 }
  0xcc   :  { %v112_v17 = vpop.f32.mrf.mxu0 }
  0xcd   :  { %v113_v18 = vadd.f32 %v273_v14, %v112_v17  ;;  %v122_v20 = vmax.f32 %v118_v16, 0.0 }
  0xcf   :  { %v121_v19 = vmax.f32 %v113_v18, 0.0 }
  0xd1   :  { %324 = vmatprep.mubr.msk.f32.mxu1 %vm138_vm1, %v121_v19 }
  0xd2   :  { %325 = vmatmul.mubr.msk.f32.vlgmr.msra.gmra.mxu1 %vm138_vm1, %v122_v20 }
 0x192   :  { %v326_v21 = vpop.f32.mrf.mxu1 }
 0x193   :  { %v217_v24 = vadd.f32 %v326_v21, %v276_v22 }
 0x194   :  { %v211_v23 = vpop.f32.mrf.mxu1 }
 0x195   :  { %v212_v25 = vadd.f32 %v276_v22, %v211_v23  ;;  %v223_v28 = vadd.f32 %v217_v24, %v27_v8 }
 0x197   :  { %v222_v26 = vadd.f32 %v212_v25, %v26_v2  ;;  %v227_v29 = vsel %vm39_vm0, %v223_v28, 0.0 }
 0x199   :  { %v224_v27 = vsel %vm39_vm0, %v222_v26, 0.0 }
 0x19a   :  { %225 = vadd.xlane.f32.xlu0 %v224_v27 }
 0x19e   :  { %228 = vadd.xlane.f32.xlu0 %v227_v29 }
 0x223   :  { %v226_v30 = vpop.xlane.xlu0 %225 }
 0x224   :  { %v231_v31 = vmul.f32 0.03125, %v226_v30 }
 0x226   :  { %v233_v32 = vsub.f32 %v222_v26, %v231_v31 }
 0x227   :  { %v229_v33 = vpop.xlane.xlu0 %228 }
 0x228   :  { %v232_v34 = vmul.f32 0.03125, %v229_v33  ;;  %v235_v35 = vmul.f32 %v233_v32, %v233_v32 }
 0x22a   :  { %v234_v36 = vsub.f32 %v223_v28, %v232_v34  ;;  %v237_v37 = vsel %vm39_vm0, %v235_v35, 0.0 }
 0x22b   :  { %238 = vadd.xlane.f32.xlu1 %v237_v37 }
 0x22c   :  { %v236_v38 = vmul.f32 %v234_v36, %v234_v36 }
 0x22e   :  { %v240_v39 = vsel %vm39_vm0, %v236_v38, 0.0 }
 0x22f   :  { %241 = vadd.xlane.f32.xlu1 %v240_v39 }
 0x2b4   :  { %v239_v40 = vpop.xlane.xlu1 %238 }
 0x2b5   :  { %v243_v41 = vmul.f32 0.03125, %v239_v40 }
 0x2b7   :  { %v245_v42 = vadd.f32 1e-05, %v243_v41 }
 0x2b8   :  { %v242_v43 = vpop.xlane.xlu1 %241 }
 0x2b9   :  { %327 = vrsqrt.f32 %v245_v42  ;;  %v244_v44 = vmul.f32 0.03125, %v242_v43 }
 0x2bb   :  { %v246_v45 = vadd.f32 1e-05, %v244_v44 }
 0x2bd   :  { %329 = vrsqrt.f32 %v246_v45 }
 0x2c6   :  { %v328_v46 = vpop.eup %327 }
 0x2c7   :  { %v249_v48 = vmul.f32 %v328_v46, %v233_v32 }
 0x2c9   :  { %v257_v50 = vmul.f32 %v279_v47, %v249_v48 }
 0x2ca   :  { %v330_v51 = vpop.eup %329 }
 0x2cb   :  { %v265_v52 = vadd.f32 %v280_v49, %v257_v50  ;;  %v250_v53 = vmul.f32 %v330_v51, %v234_v36 }
 0x2cd   :  { %267 = vst.msk [vmem:[%s446_s7] sm:$0xff] %vm39_vm0, %v265_v52  ;;  %v258_v54 = vmul.f32 %v279_v47, %v250_v53 }
 0x2cf   :  { %v266_v55 = vadd.f32 %v280_v49, %v258_v54 }
 0x2d1   :  { %268 = vst.msk [vmem:[%s446_s7 + $0x8] sm:$0xff] %vm39_vm0, %v266_v55 }

// kernel: embedded_transformer_forward.12
= control target key start
LH: loop header
LB: loop body
LE: loop exit
PB: predicated region body
PF: predicated region fallthrough
CT: control target
= control target key end

     0   :  { %v2440_v0 = vmov 0.0   ;;  %vm2441_vm0 = vmmov 0   ;;  %vm43_vm1 = vcmask 261120   ;;  %vm133_vm2 = vcmask 785408   ;;  %s2443_s20 = smov 96   ;;  %s2444_s21 = smov 120   ;;  %s2864_s1 = inlined_call_operand.vmem [shape: f32[32,96], index: 1, kind: input, shape index: {}]   ;;  %s2865_s0 = inlined_call_operand.vmem [shape: f32[24,32], index: 0, kind: input, shape index: {}]   ;;  %s2866_s2 = inlined_call_operand.vmem [shape: f32[1,96], index: 2, kind: input, shape index: {}]   ;;  %s2867_s7 = inlined_call_operand.vmem [shape: f32[2,12], index: 7, kind: input, shape index: {}]   ;;  %s2868_s3 = inlined_call_operand.vmem [shape: f32[32,32], index: 3, kind: input, shape index: {}]   ;;  %s2869_s4 = inlined_call_operand.vmem [shape: f32[1,32], index: 4, kind: input, shape index: {}]   ;;  %s2870_s5 = inlined_call_operand.vmem [shape: f32[1,32], index: 5, kind: input, shape index: {}]   ;;  %s2871_s6 = inlined_call_operand.vmem [shape: f32[1,32], index: 6, kind: input, shape index: {}]   ;;  %s2872_s8 = inlined_call_operand.vmem [shape: f32[24,32], index: 8, kind: output, shape index: {}]  }
   0x1   :  { %2205 = vmatprep.subr.mxu0 %v2440_v0  ;;  %v35_v1 = vld [vmem:[%s2864_s1 + $0x18] sm:$0xff]  ;;  %v34_v2 = vld [vmem:[%s2864_s1 + $0x10] sm:$0xff]  ;;  %2213 = vmatprep.mubr.msk.f32.mxu0 %vm2441_vm0, %v2440_v0  ;;  %v33_v3 = vld [vmem:[%s2864_s1 + $0x8] sm:$0xff]  ;;  %vm146_vm3 = vcmask 64512   ;;  %vm242_vm4 = vcmask 93184   ;;  %vm238_vm5 = vcmask 97280  }
   0x2   :  { %2206 = vmatpush3.msra.mxu0 %v35_v1  ;;  %v32_v4 = vld [vmem:[%s2864_s1] sm:$0xff]  ;;  %v30_v6 = vld [vmem:[%s2865_s0 + $0x8] sm:$0xff]  ;;  %v31_v7 = vld [vmem:[%s2865_s0 + $0x10] sm:$0xff]  ;;  %s2445_s24 = smov 64   ;;  %s2446_s25 = smov 56   ;;  %vm273_vm6 = vcmask 1043456  }
   0x3   :  { %2207 = vmatprep.subr.mxu0 %v2440_v0  ;;  %v29_v5 = vld [vmem:[%s2865_s0] sm:$0xff]  ;;  %s2447_s26 = smov 80   ;;  %s2448_s27 = smov 112   ;;  %vm352_vm7 = vcmask 60416   ;;  %vm571_vm8 = vcmask 130112   ;;  %vm792_vm9 = vcmask 195712  }
   0x4   :  { %2208 = vmatpush3.msra.mxu0 %v34_v2  ;;  %v2059_v8 = vld [vmem:[%s2866_s2] ss:$0 sm:$0xff]  ;;  %s2442_s2 = smov 88   ;;  %s2449_s28 = smov 48   ;;  %vm573_vm10 = vcmask 126016   ;;  %vm794_vm11 = vcmask 191616  }
   0x5   :  { %2209 = vmatprep.subr.mxu0 %v2440_v0  ;;  %v2565_v28 = vld [vmem:[%s2867_s7] ss:$0 sm:$0xff]  ;;  %s2450_s29 = smov 72   ;;  %s2451_s30 = smov 104   ;;  %vm1015_vm12 = vcmask 257216   ;;  %vm1013_vm13 = vcmask 261312  }
   0x6   :  { %2210 = vmatpush3.msra.mxu0 %v33_v3  ;;  %s2452_s9 = smov 40   ;;  %s2454_s12 = smov 16  }
   0x7   :  { %2211 = vmatprep.subr.mxu0 %v2440_v0  ;;  %s2455_s13 = smov 24  }
   0x8   :  { %2212 = vmatpush3.msra.mxu0 %v32_v4 }
   0x9   :  { %2214 = vmatmul.mubr.msk.f32.vlgmr.msra.gmra.mxu0 %vm43_vm1, %v29_v5 }
   0xa   :  { %2216 = vmatprep.mubr.msk.f32.mxu0 %vm2441_vm0, %v2440_v0 }
   0xd   :  { %2217 = vmatmul.mubr.msk.f32.gmra.mxu0 %vm43_vm1, %v30_v6 }
   0xe   :  { %2219 = vmatprep.mubr.msk.f32.mxu0 %vm2441_vm0, %v2440_v0 }
  0x11   :  { %2220 = vmatmul.mubr.msk.f32.gmra.mxu0 %vm43_vm1, %v31_v7 }
  0xc9   :  { %v119_v9 = vpop.f32.mrf.mxu0 }
  0xca   :  { %v120_v10 = vadd.f32 %v2059_v8, %v119_v9 }
  0xcb   :  { %v2215_v11 = vpop.f32.mrf.mxu0 }
  0xcc   :  { %134 = vst.msk [vmem:[#allocation2] sm:$0xff] %vm133_vm2, %v120_v10 }
  0xcd   :  { %v124_v12 = vpop.f32.mrf.mxu0 }
  0xce   :  { %v125_v13 = vadd.f32 %v2059_v8, %v124_v12 }
  0xcf   :  { %v2218_v14 = vpop.f32.mrf.mxu0 }
  0xd0   :  { %135 = vst.msk [vmem:[#allocation2 + $0x8] sm:$0xff] %vm133_vm2, %v125_v13 }
  0xd1   :  { %v129_v15 = vpop.f32.mrf.mxu0 }
  0xd2   :  { %v130_v16 = vadd.f32 %v2059_v8, %v129_v15 }
  0xd3   :  { %v2538_v17 = vld [vmem:[#allocation2] sm:$0xff]  ;;  %v2221_v18 = vpop.f32.mrf.mxu0 }
  0xd4   :  { %136 = vst.msk [vmem:[#allocation2 + $0x10] sm:$0xff] %vm133_vm2, %v130_v16  ;;  %2226 = vmatprep.mubr.msk.f32.mxu0 %vm146_vm3, %v2538_v17 }
  0xd7   :  { %v355_v19 = vld [vmem:[#allocation2 + $0x8] sm:$0xf] }
  0xd8   :  { %v139_v20 = vld [vmem:[#allocation2 + $0x8] sm:$0xf]  ;;  %364 = vrot.lane.b32.xlu1 %v355_v19, %s2442_s2 }
  0xd9   :  { %144 = vrot.lane.b32.xlu0 %v139_v20, %s2443_s20  ;;  %v576_v2 = vld [vmem:[#allocation2 + $0x8] sm:$0xf] }
  0xdc   :  { %362 = vrot.lane.b32.xlu1 %v2538_v17, %s2442_s2 }
  0xdd   :  { %142 = vrot.lane.b32.xlu0 %v2538_v17, %s2443_s20 }
  0xe0   :  { %360 = vrot.lane.b32.xlu1 %v355_v19, %s2444_s21 }
  0xe1   :  { %358 = vrot.lane.b32.xlu0 %v2538_v17, %s2444_s21 }
 0x14a   :  { %v365_v22 = vpop.permute.xlu1 %364 }
 0x14b   :  { %v145_v21 = vpop.permute.xlu0 %144 }
 0x14c   :  { %2222 = vmatprep.subr.msk.mxu0 %vm146_vm3, %v145_v21 }
 0x14d   :  { %2223 = vmatpush3.xpose.msk.msra.mxu0 %vm146_vm3, %v145_v21 }
 0x14e   :  { %v363_v25 = vpop.permute.xlu1 %362 }
 0x14f   :  { %v143_v23 = vpop.permute.xlu0 %142 }
 0x150   :  { %2224 = vmatprep.subr.msk.mxu0 %vm146_vm3, %v143_v23 }
 0x151   :  { %2225 = vmatpush3.xpose.msk.msra.mxu0 %vm146_vm3, %v143_v23 }
 0x152   :  { %2236 = vmatprep.subr.msk.mxu0 %vm146_vm3, %v365_v22  ;;  %v361_v26 = vpop.permute.xlu1 %360 }
 0x153   :  { %v359_v24 = vpop.permute.xlu0 %358 }
 0x154   :  { %2227 = vmatmul.mubr.msk.f32.vlgmr.msra.gmra.mxu0 %vm146_vm3, %v139_v20 }
 0x155   :  { %2237 = vmatpush3.xpose.msk.msra.mxu0 %vm146_vm3, %v365_v22  ;;  %2240 = vmatprep.mubr.msk.f32.mxu0 %vm146_vm3, %v359_v24 }
 0x156   :  { %2238 = vmatprep.subr.msk.mxu0 %vm146_vm3, %v363_v25 }
 0x159   :  { %2239 = vmatpush3.xpose.msk.msra.mxu0 %vm146_vm3, %v363_v25 }
 0x15c   :  { %2241 = vmatmul.mubr.msk.f32.vlgmr.msra.gmra.mxu0 %vm146_vm3, %v361_v26 }
 0x214   :  { %v2228_v27 = vpop.f32.mrf.mxu0 }
 0x215   :  { %v231_v29 = vmul.f32 0.35355338, %v2228_v27 }
 0x216   :  { %v221_v30 = vpop.f32.mrf.mxu0 }
 0x217   :  { %v230_v31 = vmul.f32 0.35355338, %v221_v30  ;;  %v237_v32 = vadd.f32 %v2565_v28, %v231_v29 }
 0x219   :  { %v243_v33 = vsel %vm242_vm4, %v237_v32, -inf  ;;  %v236_v34 = vadd.f32 %v2565_v28, %v230_v31 }
 0x21a   :  { %244 = vmax.xlane.f32.xlu1 %v243_v33 }
 0x21b   :  { %v239_v35 = vsel %vm238_vm5, %v236_v34, -inf }
 0x21c   :  { %v2242_v36 = vpop.f32.mrf.mxu0  ;;  %240 = vmax.xlane.f32.xlu0 %v239_v35 }
 0x21d   :  { %v450_v38 = vmul.f32 0.35355338, %v2242_v36  ;;  %v797_v36 = vld [vmem:[#allocation2 + $0x8] sm:$0xf] }
 0x21e   :  { %v440_v37 = vpop.f32.mrf.mxu0 }
 0x21f   :  { %v449_v39 = vmul.f32 0.35355338, %v440_v37  ;;  %v452_v42 = vadd.f32 %v2565_v28, %v450_v38 }
 0x221   :  { %v451_v40 = vadd.f32 %v2565_v28, %v449_v39  ;;  %v456_v43 = vsel %vm242_vm4, %v452_v42, -inf }
 0x223   :  { %v453_v41 = vsel %vm238_vm5, %v451_v40, -inf }
 0x224   :  { %454 = vmax.xlane.f32.xlu0 %v453_v41 }
 0x228   :  { %457 = vmax.xlane.f32.xlu0 %v456_v43 }
 0x22b   :  { %264 = vrot.lane.b32.xlu1 %v139_v20, %s2445_s24 }
 0x22f   :  { %477 = vrot.lane.b32.xlu1 %v355_v19, %s2446_s25 }
 0x233   :  { %475 = vrot.lane.b32.xlu1 %v2538_v17, %s2446_s25 }
 0x23e   :  { %262 = vrot.lane.b32.xlu0 %v2538_v17, %s2445_s24 }
 0x2a3   :  { %v245_v44 = vpop.xlane.xlu1 %244 }
 0x2a4   :  { %v247_v45 = vsub.f32 %v237_v32, %v245_v44 }
 0x2a5   :  { %v241_v46 = vpop.xlane.xlu0 %240 }
 0x2a6   :  { %v250_v47 = vmul.f32 1.442695, %v247_v45  ;;  %v246_v48 = vsub.f32 %v236_v34, %v241_v46 }
 0x2a7   :  { %v265_v49 = vpop.permute.xlu1 %264 }
 0x2a8   :  { %2367 = vpow2.f32 %v250_v47  ;;  %v248_v50 = vmul.f32 1.442695, %v246_v48  ;;  %2229 = vmatprep.subr.msk.mxu1 %vm273_vm6, %v265_v49 }
 0x2a9   :  { %2230 = vmatpush3.msk.msra.mxu1 %vm273_vm6, %v265_v49 }
 0x2aa   :  { %2369 = vpow2.f32 %v248_v50 }
 0x2ab   :  { %v478_v59 = vpop.permute.xlu1 %477 }
 0x2ad   :  { %v455_v51 = vpop.xlane.xlu0 %454 }
 0x2ae   :  { %v459_v63 = vsub.f32 %v451_v40, %v455_v51 }
 0x2af   :  { %v476_v5 = vpop.permute.xlu1 %475 }
 0x2b0   :  { %v461_v1 = vmul.f32 1.442695, %v459_v63 }
 0x2b1   :  { %v458_v52 = vpop.xlane.xlu0 %457 }
 0x2b2   :  { %v460_v53 = vsub.f32 %v452_v42, %v458_v52 }
 0x2b4   :  { %v463_v54 = vmul.f32 1.442695, %v460_v53 }
 0x2b5   :  { %v2368_v55 = vpop.eup %2367  ;;  %v263_v56 = vpop.permute.xlu0 %262 }
 0x2b6   :  { %2371 = vpow2.f32 %v463_v54  ;;  %2231 = vmatprep.subr.mxu1 %v263_v56  ;;  %v255_v57 = vsel %vm242_vm4, %v2368_v55, 0.0 }
 0x2b7   :  { %v2370_v58 = vpop.eup %2369  ;;  %256 = vadd.xlane.f32.xlu0 %v255_v57  ;;  %2232 = vmatpush3.msra.mxu1 %v263_v56  ;;  %2373 = vpow2.f32 %v461_v1 }
 0x2b8   :  { %2243 = vmatprep.subr.msk.mxu1 %vm273_vm6, %v478_v59  ;;  %v252_v60 = vsel %vm238_vm5, %v2370_v58, 0.0 }
 0x2b9   :  { %253 = vadd.xlane.f32.xlu1 %v252_v60 }
 0x2c3   :  { %v2372_v61 = vpop.eup %2371 }
 0x2c4   :  { %v468_v62 = vsel %vm242_vm4, %v2372_v61, 0.0  ;;  %v2374_v3 = vpop.eup %2373 }
 0x2c5   :  { %469 = vadd.xlane.f32.xlu0 %v468_v62  ;;  %v465_v4 = vsel %vm238_vm5, %v2374_v3, 0.0 }
 0x2ca   :  { %583 = vrot.lane.b32.xlu1 %v2538_v17, %s2447_s26 }
 0x2db   :  { %585 = vrot.lane.b32.xlu0 %v576_v2, %s2447_s26 }
 0x2df   :  { %579 = vrot.lane.b32.xlu0 %v2538_v17, %s2448_s27 }
 0x2ee   :  { %466 = vadd.xlane.f32.xlu1 %v465_v4 }
 0x2ff   :  { %581 = vrot.lane.b32.xlu1 %v576_v2, %s2448_s27 }
 0x340   :  { %v257_v6 = vpop.xlane.xlu0 %256 }
 0x341   :  { %2375 = vrcp.f32 %v257_v6  ;;  %v1019_v6 = vld [vmem:[#allocation2 + $0x14] sm:$0xf] }
 0x342   :  { %v254_v7 = vpop.xlane.xlu1 %253 }
 0x343   :  { %2377 = vrcp.f32 %v254_v7  ;;  %v2646_v7 = vld [vmem:[#allocation2 + $0xc] sm:$0xff] }
 0x346   :  { %v584_v14 = vpop.permute.xlu1 %583 }
 0x34e   :  { %v2376_v8 = vpop.eup %2375  ;;  %v470_v10 = vpop.xlane.xlu0 %469 }
 0x34f   :  { %v261_v12 = vmul.f32 %v2376_v8, %v2368_v55  ;;  %2379 = vrcp.f32 %v470_v10 }
 0x350   :  { %v2378_v9 = vpop.eup %2377 }
 0x351   :  { %v260_v11 = vmul.f32 %v2378_v9, %v2370_v58 }
 0x352   :  { %v586_v13 = vpop.permute.xlu0 %585 }
 0x353   :  { %2233 = vmatprep.mubr.msk.f32.mxu1 %vm238_vm5, %v260_v11 }
 0x354   :  { %2234 = vmatmul.mubr.msk.f32.vlgmr.msra.gmra.mxu1 %vm238_vm5, %v261_v12 }
 0x355   :  { %2244 = vmatpush3.msk.msra.mxu1 %vm273_vm6, %v478_v59 }
 0x356   :  { %2245 = vmatprep.subr.mxu1 %v476_v5  ;;  %v580_v21 = vpop.permute.xlu0 %579 }
 0x357   :  { %2246 = vmatpush3.msra.mxu1 %v476_v5 }
 0x358   :  { %2250 = vmatprep.subr.msk.mxu1 %vm146_vm3, %v586_v13 }
 0x35c   :  { %v2380_v16 = vpop.eup %2379 }
 0x35d   :  { %v474_v20 = vmul.f32 %v2380_v16, %v2372_v61 }
 0x377   :  { %v467_v15 = vpop.xlane.xlu1 %466 }
 0x378   :  { %2381 = vrcp.f32 %v467_v15 }
 0x37b   :  { %v582_v22 = vpop.permute.xlu1 %581 }
 0x385   :  { %v2382_v18 = vpop.eup %2381 }
 0x386   :  { %v473_v19 = vmul.f32 %v2382_v18, %v2374_v3 }
 0x388   :  { %2247 = vmatprep.mubr.msk.f32.mxu1 %vm238_vm5, %v473_v19 }
 0x389   :  { %2248 = vmatmul.mubr.msk.f32.vlgmr.msra.gmra.mxu1 %vm238_vm5, %v474_v20 }
 0x38a   :  { %2251 = vmatpush3.xpose.msk.msra.mxu1 %vm146_vm3, %v586_v13  ;;  %2254 = vmatprep.mubr.msk.f32.mxu1 %vm146_vm3, %v580_v21 }
 0x38b   :  { %2252 = vmatprep.subr.msk.mxu1 %vm146_vm3, %v584_v14 }
 0x38e   :  { %2253 = vmatpush3.xpose.msk.msra.mxu1 %vm146_vm3, %v584_v14 }
 0x391   :  { %2255 = vmatmul.mubr.msk.f32.vlgmr.msra.gmra.mxu1 %vm146_vm3, %v582_v22 }
 0x414   :  { %v2235_v23 = vpop.f32.mrf.mxu1 }
 0x415   :  { %353 = vst.msk [vmem:[#allocation3 + $0x8] sm:$0xf] %vm352_vm7, %v2235_v23 }
 0x416   :  { %v342_v24 = vpop.f32.mrf.mxu1 }
 0x417   :  { %351 = vst.msk [vmem:[#allocation3] sm:$0xff] %vm146_vm3, %v342_v24 }
 0x449   :  { %v2607_v25 = vpop.f32.mrf.mxu1 }
 0x44b   :  { %v2609_v26 = vpop.f32.mrf.mxu1 }
 0x451   :  { %v2256_v27 = vpop.f32.mrf.mxu1 }
 0x452   :  { %v671_v29 = vmul.f32 0.35355338, %v2256_v27 }
 0x453   :  { %v661_v30 = vpop.f32.mrf.mxu1 }
 0x454   :  { %v670_v31 = vmul.f32 0.35355338, %v661_v30  ;;  %v673_v32 = vadd.f32 %v2565_v28, %v671_v29 }
 0x456   :  { %v677_v33 = vsel %vm242_vm4, %v673_v32, -inf  ;;  %v672_v34 = vadd.f32 %v2565_v28, %v670_v31 }
 0x457   :  { %678 = vmax.xlane.f32.xlu1 %v677_v33  ;;  %v2672_v33 = vld [vmem:[%s2867_s7 + $0x1] ss:$0 sm:$0xff]  ;;  %s2453_s7 = smov 8  }
 0x458   :  { %v674_v35 = vsel %vm238_vm5, %v672_v34, -inf }
 0x459   :  { %675 = vmax.xlane.f32.xlu0 %v674_v35 }
 0x468   :  { %698 = vrot.lane.b32.xlu1 %v576_v2, %s2449_s28 }
 0x46c   :  { %806 = vrot.lane.b32.xlu1 %v797_v36, %s2450_s29 }
 0x470   :  { %804 = vrot.lane.b32.xlu1 %v2538_v17, %s2450_s29 }
 0x474   :  { %802 = vrot.lane.b32.xlu1 %v797_v36, %s2451_s30 }
 0x4e0   :  { %v679_v37 = vpop.xlane.xlu1 %678 }
 0x4e1   :  { %v681_v38 = vsub.f32 %v673_v32, %v679_v37 }
 0x4e2   :  { %v676_v39 = vpop.xlane.xlu0 %675 }
 0x4e3   :  { %v684_v40 = vmul.f32 1.442695, %v681_v38  ;;  %v680_v41 = vsub.f32 %v672_v34, %v676_v39 }
 0x4e4   :  { %v699_v42 = vpop.permute.xlu1 %698 }
 0x4e5   :  { %2383 = vpow2.f32 %v684_v40  ;;  %v682_v43 = vmul.f32 1.442695, %v680_v41  ;;  %2257 = vmatprep.subr.msk.mxu0 %vm273_vm6, %v699_v42  ;;  %v1230_v41 = vld [vmem:[#allocation2 + $0x14] sm:$0xf] }
 0x4e6   :  { %2258 = vmatpush3.msk.msra.mxu0 %vm273_vm6, %v699_v42 }
 0x4e7   :  { %2385 = vpow2.f32 %v682_v43 }
 0x4e8   :  { %v807_v51 = vpop.permute.xlu1 %806 }
 0x4ec   :  { %v805_v57 = vpop.permute.xlu1 %804 }
 0x4f0   :  { %v803_v58 = vpop.permute.xlu1 %802 }
 0x4f2   :  { %v2384_v44 = vpop.eup %2383 }
 0x4f3   :  { %v689_v45 = vsel %vm242_vm4, %v2384_v44, 0.0 }
 0x4f4   :  { %v2386_v46 = vpop.eup %2385  ;;  %690 = vadd.xlane.f32.xlu0 %v689_v45 }
 0x4f5   :  { %v686_v47 = vsel %vm238_vm5, %v2386_v46, 0.0 }
 0x4f8   :  { %687 = vadd.xlane.f32.xlu0 %v686_v47 }
 0x50e   :  { %696 = vrot.lane.b32.xlu0 %v2538_v17, %s2449_s28 }
 0x512   :  { %800 = vrot.lane.b32.xlu0 %v2538_v17, %s2451_s30 }
 0x57d   :  { %v691_v48 = vpop.xlane.xlu0 %690 }
 0x57e   :  { %2387 = vrcp.f32 %v691_v48 }
 0x581   :  { %v688_v49 = vpop.xlane.xlu0 %687 }
 0x582   :  { %2389 = vrcp.f32 %v688_v49 }
 0x585   :  { %v697_v50 = vpop.permute.xlu0 %696 }
 0x586   :  { %2259 = vmatprep.subr.mxu0 %v697_v50 }
 0x587   :  { %2260 = vmatpush3.msra.mxu0 %v697_v50 }
 0x588   :  { %2264 = vmatprep.subr.msk.mxu0 %vm146_vm3, %v807_v51 }
 0x589   :  { %v801_v56 = vpop.permute.xlu0 %800 }
 0x58b   :  { %v2388_v52 = vpop.eup %2387 }
 0x58c   :  { %v695_v55 = vmul.f32 %v2388_v52, %v2384_v44 }
 0x58f   :  { %v2390_v53 = vpop.eup %2389 }
 0x590   :  { %v694_v54 = vmul.f32 %v2390_v53, %v2386_v46 }
 0x592   :  { %2261 = vmatprep.mubr.msk.f32.mxu0 %vm238_vm5, %v694_v54 }
 0x593   :  { %2262 = vmatmul.mubr.msk.f32.vlgmr.msra.gmra.mxu0 %vm238_vm5, %v695_v55 }
 0x594   :  { %2265 = vmatpush3.xpose.msk.msra.mxu0 %vm146_vm3, %v807_v51  ;;  %2268 = vmatprep.mubr.msk.f32.mxu0 %vm146_vm3, %v801_v56 }
 0x595   :  { %2266 = vmatprep.subr.msk.mxu0 %vm146_vm3, %v805_v57 }
 0x598   :  { %2267 = vmatpush3.xpose.msk.msra.mxu0 %vm146_vm3, %v805_v57 }
 0x59b   :  { %2269 = vmatmul.mubr.msk.f32.vlgmr.msra.gmra.mxu0 %vm146_vm3, %v803_v58 }
 0x653   :  { %v2636_v59 = vpop.f32.mrf.mxu0 }
 0x655   :  { %v2638_v60 = vpop.f32.mrf.mxu0 }
 0x65b   :  { %v2270_v61 = vpop.f32.mrf.mxu0 }
 0x65c   :  { %v892_v62 = vmul.f32 0.35355338, %v2270_v61 }
 0x65d   :  { %v882_v63 = vpop.f32.mrf.mxu0 }
 0x65e   :  { %v891_v1 = vmul.f32 0.35355338, %v882_v63  ;;  %v894_v2 = vadd.f32 %v2565_v28, %v892_v62 }
 0x660   :  { %v898_v3 = vsel %vm242_vm4, %v894_v2, -inf  ;;  %v893_v4 = vadd.f32 %v2565_v28, %v891_v1 }
 0x661   :  { %899 = vmax.xlane.f32.xlu1 %v898_v3 }
 0x662   :  { %v895_v5 = vsel %vm238_vm5, %v893_v4, -inf }
 0x663   :  { %896 = vmax.xlane.f32.xlu0 %v895_v5 }
 0x672   :  { %919 = vrot.lane.b32.xlu1 %v797_v36, %s2452_s9 }
 0x676   :  { %1024 = vrot.lane.b32.xlu1 %v1019_v6, %s2443_s20 }
 0x67a   :  { %1022 = vrot.lane.b32.xlu1 %v2646_v7, %s2443_s20 }
 0x6ea   :  { %v900_v8 = vpop.xlane.xlu1 %899 }
 0x6eb   :  { %v902_v9 = vsub.f32 %v894_v2, %v900_v8 }
 0x6ec   :  { %v897_v10 = vpop.xlane.xlu0 %896 }
 0x6ed   :  { %v905_v11 = vmul.f32 1.442695, %v902_v9  ;;  %v901_v28 = vsub.f32 %v893_v4, %v897_v10 }
 0x6ee   :  { %v920_v12 = vpop.permute.xlu1 %919 }
 0x6ef   :  { %2391 = vpow2.f32 %v905_v11  ;;  %v903_v13 = vmul.f32 1.442695, %v901_v28  ;;  %2271 = vmatprep.subr.msk.mxu1 %vm273_vm6, %v920_v12 }
 0x6f0   :  { %2272 = vmatpush3.msk.msra.mxu1 %vm273_vm6, %v920_v12 }
 0x6f1   :  { %2393 = vpow2.f32 %v903_v13  ;;  %v1449_v13 = vld [vmem:[#allocation2 + $0x14] sm:$0xf] }
 0x6f2   :  { %v1025_v22 = vpop.permute.xlu1 %1024 }
 0x6f6   :  { %v1023_v30 = vpop.permute.xlu1 %1022 }
 0x6fc   :  { %v2392_v14 = vpop.eup %2391 }
 0x6fd   :  { %v910_v15 = vsel %vm242_vm4, %v2392_v14, 0.0 }
 0x6fe   :  { %v2394_v16 = vpop.eup %2393  ;;  %911 = vadd.xlane.f32.xlu0 %v910_v15 }
 0x6ff   :  { %v907_v18 = vsel %vm238_vm5, %v2394_v16, 0.0 }
 0x702   :  { %908 = vadd.xlane.f32.xlu0 %v907_v18 }
 0x718   :  { %917 = vrot.lane.b32.xlu0 %v2538_v17, %s2452_s9 }
 0x787   :  { %v912_v19 = vpop.xlane.xlu0 %911 }
 0x788   :  { %2395 = vrcp.f32 %v912_v19 }
 0x78b   :  { %v909_v20 = vpop.xlane.xlu0 %908 }
 0x78c   :  { %2397 = vrcp.f32 %v909_v20 }
 0x78f   :  { %v918_v21 = vpop.permute.xlu0 %917 }
 0x790   :  { %2273 = vmatprep.subr.mxu1 %v918_v21 }
 0x791   :  { %2274 = vmatpush3.msra.mxu1 %v918_v21 }
 0x792   :  { %2278 = vmatprep.subr.msk.mxu1 %vm146_vm3, %v1025_v22 }
 0x795   :  { %v2396_v23 = vpop.eup %2395 }
 0x796   :  { %v916_v29 = vmul.f32 %v2396_v23, %v2392_v14 }
 0x799   :  { %v2398_v24 = vpop.eup %2397 }
 0x79a   :  { %v915_v27 = vmul.f32 %v2398_v24, %v2394_v16 }
 0x79c   :  { %2275 = vmatprep.mubr.msk.f32.mxu1 %vm238_vm5, %v915_v27 }
 0x79d   :  { %2276 = vmatmul.mubr.msk.f32.vlgmr.msra.gmra.mxu1 %vm238_vm5, %v916_v29 }
 0x79e   :  { %2279 = vmatpush3.xpose.msk.msra.mxu1 %vm146_vm3, %v1025_v22  ;;  %2282 = vmatprep.mubr.msk.f32.mxu1 %vm146_vm3, %v2646_v7 }
 0x79f   :  { %2280 = vmatprep.subr.msk.mxu1 %vm146_vm3, %v1023_v30 }
 0x7a2   :  { %2281 = vmatpush3.xpose.msk.msra.mxu1 %vm146_vm3, %v1023_v30 }
 0x7a5   :  { %2283 = vmatmul.mubr.msk.f32.vlgmr.msra.gmra.mxu1 %vm146_vm3, %v1019_v6 }
 0x85d   :  { %v2665_v17 = vpop.f32.mrf.mxu1 }
 0x85f   :  { %v2667_v31 = vpop.f32.mrf.mxu1 }
 0x865   :  { %v2284_v32 = vpop.f32.mrf.mxu1 }
 0x866   :  { %v1110_v34 = vmul.f32 0.35355338, %v2284_v32 }
 0x867   :  { %v1100_v35 = vpop.f32.mrf.mxu1 }
 0x868   :  { %v1109_v36 = vmul.f32 0.35355338, %v1100_v35  ;;  %v1116_v37 = vadd.f32 %v2672_v33, %v1110_v34 }
 0x86a   :  { %v1120_v38 = vsel %vm242_vm4, %v1116_v37, -inf  ;;  %v1115_v39 = vadd.f32 %v2672_v33, %v1109_v36 }
 0x86b   :  { %1121 = vmax.xlane.f32.xlu1 %v1120_v38 }
 0x86c   :  { %v1117_v40 = vsel %vm238_vm5, %v1115_v39, -inf }
 0x86d   :  { %1118 = vmax.xlane.f32.xlu0 %v1117_v40 }
 0x87c   :  { %1141 = vrot.lane.b32.xlu1 %v1019_v6, %s2445_s24 }
 0x880   :  { %1239 = vrot.lane.b32.xlu1 %v1230_v41, %s2442_s2 }
 0x884   :  { %1237 = vrot.lane.b32.xlu1 %v2646_v7, %s2442_s2 }
 0x888   :  { %1235 = vrot.lane.b32.xlu1 %v1230_v41, %s2444_s21 }
 0x8f4   :  { %v1122_v42 = vpop.xlane.xlu1 %1121 }
 0x8f5   :  { %v1124_v43 = vsub.f32 %v1116_v37, %v1122_v42 }
 0x8f6   :  { %v1119_v44 = vpop.xlane.xlu0 %1118 }
 0x8f7   :  { %v1127_v45 = vmul.f32 1.442695, %v1124_v43  ;;  %v1123_v46 = vsub.f32 %v1115_v39, %v1119_v44 }
 0x8f8   :  { %v1142_v47 = vpop.permute.xlu1 %1141 }
 0x8f9   :  { %2399 = vpow2.f32 %v1127_v45  ;;  %v1125_v48 = vmul.f32 1.442695, %v1123_v46  ;;  %2285 = vmatprep.subr.msk.mxu0 %vm273_vm6, %v1142_v47 }
 0x8fa   :  { %2286 = vmatpush3.msk.msra.mxu0 %vm273_vm6, %v1142_v47 }
 0x8fb   :  { %2401 = vpow2.f32 %v1125_v48 }
 0x8fc   :  { %v1240_v56 = vpop.permute.xlu1 %1239 }
 0x900   :  { %v1238_v1 = vpop.permute.xlu1 %1237 }
 0x904   :  { %v1236_v2 = vpop.permute.xlu1 %1235 }
 0x906   :  { %v2400_v49 = vpop.eup %2399 }
 0x907   :  { %v1132_v50 = vsel %vm242_vm4, %v2400_v49, 0.0 }
 0x908   :  { %v2402_v51 = vpop.eup %2401  ;;  %1133 = vadd.xlane.f32.xlu0 %v1132_v50 }
 0x909   :  { %v1129_v52 = vsel %vm238_vm5, %v2402_v51, 0.0 }
 0x90c   :  { %1130 = vadd.xlane.f32.xlu0 %v1129_v52  ;;  %v1668_v52 = vld [vmem:[#allocation2 + $0x14] sm:$0xf] }
 0x922   :  { %1139 = vrot.lane.b32.xlu0 %v2646_v7, %s2445_s24 }
 0x926   :  { %1233 = vrot.lane.b32.xlu0 %v2646_v7, %s2444_s21 }
 0x991   :  { %v1134_v53 = vpop.xlane.xlu0 %1133 }
 0x992   :  { %2403 = vrcp.f32 %v1134_v53 }
 0x995   :  { %v1131_v54 = vpop.xlane.xlu0 %1130 }
 0x996   :  { %2405 = vrcp.f32 %v1131_v54 }
 0x999   :  { %v1140_v55 = vpop.permute.xlu0 %1139 }
 0x99a   :  { %2287 = vmatprep.subr.mxu0 %v1140_v55 }
 0x99b   :  { %2288 = vmatpush3.msra.mxu0 %v1140_v55 }
 0x99c   :  { %2292 = vmatprep.subr.msk.mxu0 %vm146_vm3, %v1240_v56 }
 0x99d   :  { %v1234_v63 = vpop.permute.xlu0 %1233 }
 0x99f   :  { %v2404_v57 = vpop.eup %2403 }
 0x9a0   :  { %v1138_v62 = vmul.f32 %v2404_v57, %v2400_v49 }
 0x9a3   :  { %v2406_v58 = vpop.eup %2405 }
 0x9a4   :  { %v1137_v61 = vmul.f32 %v2406_v58, %v2402_v51 }
 0x9a6   :  { %2289 = vmatprep.mubr.msk.f32.mxu0 %vm238_vm5, %v1137_v61 }
 0x9a7   :  { %2290 = vmatmul.mubr.msk.f32.vlgmr.msra.gmra.mxu0 %vm238_vm5, %v1138_v62 }
 0x9a8   :  { %2293 = vmatpush3.xpose.msk.msra.mxu0 %vm146_vm3, %v1240_v56  ;;  %2296 = vmatprep.mubr.msk.f32.mxu0 %vm146_vm3, %v1234_v63 }
 0x9a9   :  { %2294 = vmatprep.subr.msk.mxu0 %vm146_vm3, %v1238_v1 }
 0x9ac   :  { %2295 = vmatpush3.xpose.msk.msra.mxu0 %vm146_vm3, %v1238_v1 }
 0x9af   :  { %2297 = vmatmul.mubr.msk.f32.vlgmr.msra.gmra.mxu0 %vm146_vm3, %v1236_v2 }
 0xa67   :  { %v2291_v3 = vpop.f32.mrf.mxu0 }
 0xa68   :  { %1228 = vst.msk [vmem:[#allocation3 + $0x14] sm:$0xf] %vm352_vm7, %v2291_v3 }
 0xa69   :  { %v1218_v4 = vpop.f32.mrf.mxu0 }
 0xa6a   :  { %1227 = vst.msk [vmem:[#allocation3 + $0xc] sm:$0xff] %vm146_vm3, %v1218_v4 }
 0xa6f   :  { %v2298_v5 = vpop.f32.mrf.mxu0 }
 0xa70   :  { %v1325_v6 = vmul.f32 0.35355338, %v2298_v5 }
 0xa71   :  { %v1315_v8 = vpop.f32.mrf.mxu0 }
 0xa72   :  { %v1324_v9 = vmul.f32 0.35355338, %v1315_v8  ;;  %v1327_v10 = vadd.f32 %v2672_v33, %v1325_v6 }
 0xa74   :  { %v1331_v11 = vsel %vm242_vm4, %v1327_v10, -inf  ;;  %v1326_v28 = vadd.f32 %v2672_v33, %v1324_v9 }
 0xa75   :  { %1332 = vmax.xlane.f32.xlu1 %v1331_v11 }
 0xa76   :  { %v1328_v12 = vsel %vm238_vm5, %v1326_v28, -inf }
 0xa77   :  { %1329 = vmax.xlane.f32.xlu0 %v1328_v12 }
 0xa86   :  { %1352 = vrot.lane.b32.xlu1 %v1230_v41, %s2446_s25 }
 0xa8a   :  { %1458 = vrot.lane.b32.xlu1 %v1449_v13, %s2447_s26 }
 0xa8e   :  { %1456 = vrot.lane.b32.xlu1 %v2646_v7, %s2447_s26 }
 0xa92   :  { %1454 = vrot.lane.b32.xlu1 %v1449_v13, %s2448_s27 }
 0xafe   :  { %v1333_v14 = vpop.xlane.xlu1 %1332 }
 0xaff   :  { %v1335_v15 = vsub.f32 %v1327_v10, %v1333_v14 }
 0xb00   :  { %v1330_v16 = vpop.xlane.xlu0 %1329 }
 0xb01   :  { %v1338_v18 = vmul.f32 1.442695, %v1335_v15  ;;  %v1334_v19 = vsub.f32 %v1326_v28, %v1330_v16 }
 0xb02   :  { %v1353_v20 = vpop.permute.xlu1 %1352 }
 0xb03   :  { %2407 = vpow2.f32 %v1338_v18  ;;  %v1336_v21 = vmul.f32 1.442695, %v1334_v19  ;;  %2299 = vmatprep.subr.msk.mxu1 %vm273_vm6, %v1353_v20 }
 0xb04   :  { %2300 = vmatpush3.msk.msra.mxu1 %vm273_vm6, %v1353_v20 }
 0xb05   :  { %2409 = vpow2.f32 %v1336_v21 }
 0xb06   :  { %v1459_v34 = vpop.permute.xlu1 %1458 }
 0xb0a   :  { %v1457_v40 = vpop.permute.xlu1 %1456 }
 0xb0e   :  { %v1455_v41 = vpop.permute.xlu1 %1454 }
 0xb10   :  { %v2408_v22 = vpop.eup %2407 }
 0xb11   :  { %v1343_v23 = vsel %vm242_vm4, %v2408_v22, 0.0 }
 0xb12   :  { %v2410_v24 = vpop.eup %2409  ;;  %1344 = vadd.xlane.f32.xlu0 %v1343_v23 }
 0xb13   :  { %v1340_v27 = vsel %vm238_vm5, %v2410_v24, 0.0 }
 0xb16   :  { %1341 = vadd.xlane.f32.xlu0 %v1340_v27 }
 0xb2c   :  { %1350 = vrot.lane.b32.xlu0 %v2646_v7, %s2446_s25 }
 0xb30   :  { %1452 = vrot.lane.b32.xlu0 %v2646_v7, %s2448_s27 }
 0xb9b   :  { %v1345_v29 = vpop.xlane.xlu0 %1344 }
 0xb9c   :  { %2411 = vrcp.f32 %v1345_v29 }
 0xb9f   :  { %v1342_v30 = vpop.xlane.xlu0 %1341 }
 0xba0   :  { %2413 = vrcp.f32 %v1342_v30 }
 0xba3   :  { %v1351_v32 = vpop.permute.xlu0 %1350 }
 0xba4   :  { %2301 = vmatprep.subr.mxu1 %v1351_v32 }
 0xba5   :  { %2302 = vmatpush3.msra.mxu1 %v1351_v32 }
 0xba6   :  { %2306 = vmatprep.subr.msk.mxu1 %vm146_vm3, %v1459_v34 }
 0xba7   :  { %v1453_v39 = vpop.permute.xlu0 %1452 }
 0xba9   :  { %v2412_v35 = vpop.eup %2411 }
 0xbaa   :  { %v1349_v38 = vmul.f32 %v2412_v35, %v2408_v22 }
 0xbad   :  { %v2414_v36 = vpop.eup %2413 }
 0xbae   :  { %v1348_v37 = vmul.f32 %v2414_v36, %v2410_v24 }
 0xbb0   :  { %2303 = vmatprep.mubr.msk.f32.mxu1 %vm238_vm5, %v1348_v37 }
 0xbb1   :  { %2304 = vmatmul.mubr.msk.f32.vlgmr.msra.gmra.mxu1 %vm238_vm5, %v1349_v38 }
 0xbb2   :  { %2307 = vmatpush3.xpose.msk.msra.mxu1 %vm146_vm3, %v1459_v34  ;;  %2310 = vmatprep.mubr.msk.f32.mxu1 %vm146_vm3, %v1453_v39 }
 0xbb3   :  { %2308 = vmatprep.subr.msk.mxu1 %vm146_vm3, %v1457_v40 }
 0xbb6   :  { %2309 = vmatpush3.xpose.msk.msra.mxu1 %vm146_vm3, %v1457_v40 }
 0xbb9   :  { %2311 = vmatmul.mubr.msk.f32.vlgmr.msra.gmra.mxu1 %vm146_vm3, %v1455_v41 }
 0xc71   :  { %v2726_v42 = vpop.f32.mrf.mxu1 }
 0xc73   :  { %v2728_v43 = vpop.f32.mrf.mxu1 }
 0xc79   :  { %v2312_v44 = vpop.f32.mrf.mxu1 }
 0xc7a   :  { %v1544_v45 = vmul.f32 0.35355338, %v2312_v44 }
 0xc7b   :  { %v1534_v46 = vpop.f32.mrf.mxu1 }
 0xc7c   :  { %v1543_v47 = vmul.f32 0.35355338, %v1534_v46  ;;  %v1546_v48 = vadd.f32 %v2672_v33, %v1544_v45 }
 0xc7e   :  { %v1550_v49 = vsel %vm242_vm4, %v1546_v48, -inf  ;;  %v1545_v50 = vadd.f32 %v2672_v33, %v1543_v47 }
 0xc7f   :  { %1551 = vmax.xlane.f32.xlu1 %v1550_v49  ;;  %v1892_v49 = vld [vmem:[%s2868_s3 + $0x18] sm:$0xff] }
 0xc80   :  { %v1547_v51 = vsel %vm238_vm5, %v1545_v50, -inf }
 0xc81   :  { %1548 = vmax.xlane.f32.xlu0 %v1547_v51  ;;  %v1890_v51 = vld [vmem:[%s2868_s3 + $0x8] sm:$0xff] }
 0xc90   :  { %1571 = vrot.lane.b32.xlu1 %v1449_v13, %s2449_s28 }
 0xc94   :  { %1677 = vrot.lane.b32.xlu1 %v1668_v52, %s2450_s29 }
 0xc98   :  { %1675 = vrot.lane.b32.xlu1 %v2646_v7, %s2450_s29 }
 0xc9c   :  { %1673 = vrot.lane.b32.xlu1 %v1668_v52, %s2451_s30 }
 0xd08   :  { %v1552_v53 = vpop.xlane.xlu1 %1551 }
 0xd09   :  { %v1554_v54 = vsub.f32 %v1546_v48, %v1552_v53 }
 0xd0a   :  { %v1549_v55 = vpop.xlane.xlu0 %1548 }
 0xd0b   :  { %v1557_v56 = vmul.f32 1.442695, %v1554_v54  ;;  %v1553_v57 = vsub.f32 %v1545_v50, %v1549_v55  ;;  %v1891_v50 = vld [vmem:[%s2868_s3 + $0x10] sm:$0xff] }
 0xd0c   :  { %v1572_v58 = vpop.permute.xlu1 %1571 }
 0xd0d   :  { %2415 = vpow2.f32 %v1557_v56  ;;  %v1555_v61 = vmul.f32 1.442695, %v1553_v57  ;;  %2313 = vmatprep.subr.msk.mxu0 %vm273_vm6, %v1572_v58 }
 0xd0e   :  { %2314 = vmatpush3.msk.msra.mxu0 %vm273_vm6, %v1572_v58  ;;  %v2121_v58 = vld [vmem:[%s2869_s4] ss:$0 sm:$0xff] }
 0xd0f   :  { %2417 = vpow2.f32 %v1555_v61 }
 0xd10   :  { %v1678_v6 = vpop.permute.xlu1 %1677 }
 0xd14   :  { %v1676_v12 = vpop.permute.xlu1 %1675 }
 0xd18   :  { %v1674_v13 = vpop.permute.xlu1 %1673 }
 0xd1a   :  { %v2416_v62 = vpop.eup %2415 }
 0xd1b   :  { %v1562_v63 = vsel %vm242_vm4, %v2416_v62, 0.0 }
 0xd1c   :  { %v2418_v1 = vpop.eup %2417  ;;  %1563 = vadd.xlane.f32.xlu0 %v1562_v63 }
 0xd1d   :  { %v1559_v2 = vsel %vm238_vm5, %v2418_v1, 0.0 }
 0xd20   :  { %1560 = vadd.xlane.f32.xlu0 %v1559_v2 }
 0xd36   :  { %1569 = vrot.lane.b32.xlu0 %v2646_v7, %s2449_s28 }
 0xd3a   :  { %1671 = vrot.lane.b32.xlu0 %v2646_v7, %s2451_s30 }
 0xda5   :  { %v1564_v3 = vpop.xlane.xlu0 %1563 }
 0xda6   :  { %2419 = vrcp.f32 %v1564_v3 }
 0xda9   :  { %v1561_v4 = vpop.xlane.xlu0 %1560 }
 0xdaa   :  { %2421 = vrcp.f32 %v1561_v4 }
 0xdad   :  { %v1570_v5 = vpop.permute.xlu0 %1569 }
 0xdae   :  { %2315 = vmatprep.subr.mxu0 %v1570_v5 }
 0xdaf   :  { %2316 = vmatpush3.msra.mxu0 %v1570_v5 }
 0xdb0   :  { %2320 = vmatprep.subr.msk.mxu0 %vm146_vm3, %v1678_v6 }
 0xdb1   :  { %v1672_v28 = vpop.permute.xlu0 %1671 }
 0xdb3   :  { %v2420_v8 = vpop.eup %2419 }
 0xdb4   :  { %v1568_v11 = vmul.f32 %v2420_v8, %v2416_v62  ;;  %v2437_v62 = vld [vmem:[%s2865_s0] sm:$0xff] }
 0xdb7   :  { %v2422_v9 = vpop.eup %2421 }
 0xdb8   :  { %v1567_v10 = vmul.f32 %v2422_v9, %v2418_v1 }
 0xdba   :  { %2317 = vmatprep.mubr.msk.f32.mxu0 %vm238_vm5, %v1567_v10 }
 0xdbb   :  { %2318 = vmatmul.mubr.msk.f32.vlgmr.msra.gmra.mxu0 %vm238_vm5, %v1568_v11 }
 0xdbc   :  { %2321 = vmatpush3.xpose.msk.msra.mxu0 %vm146_vm3, %v1678_v6  ;;  %2324 = vmatprep.mubr.msk.f32.mxu0 %vm146_vm3, %v1672_v28 }
 0xdbd   :  { %2322 = vmatprep.subr.msk.mxu0 %vm146_vm3, %v1676_v12 }
 0xdc0   :  { %2323 = vmatpush3.xpose.msk.msra.mxu0 %vm146_vm3, %v1676_v12  ;;  %v2438_v12 = vld [vmem:[%s2865_s0 + $0x8] sm:$0xff] }
 0xdc3   :  { %2325 = vmatmul.mubr.msk.f32.vlgmr.msra.gmra.mxu0 %vm146_vm3, %v1674_v13 }
 0xe7b   :  { %v2755_v14 = vpop.f32.mrf.mxu0 }
 0xe7d   :  { %v1648_v15 = vpop.f32.mrf.mxu0 }
 0xe83   :  { %v2326_v16 = vpop.f32.mrf.mxu0 }
 0xe84   :  { %v1763_v18 = vmul.f32 0.35355338, %v2326_v16 }
 0xe85   :  { %v1753_v19 = vpop.f32.mrf.mxu0 }
 0xe86   :  { %v1762_v20 = vmul.f32 0.35355338, %v1753_v19  ;;  %v1765_v21 = vadd.f32 %v2672_v33, %v1763_v18  ;;  %v2439_v19 = vld [vmem:[%s2865_s0 + $0x10] sm:$0xff] }
 0xe88   :  { %v1764_v22 = vadd.f32 %v2672_v33, %v1762_v20  ;;  %v1769_v23 = vsel %vm242_vm4, %v1765_v21, -inf }
 0xe89   :  { %1770 = vmax.xlane.f32.xlu1 %v1769_v23 }
 0xe8a   :  { %v1766_v24 = vsel %vm238_vm5, %v1764_v22, -inf }
 0xe8b   :  { %1767 = vmax.xlane.f32.xlu0 %v1766_v24 }
 0xe9a   :  { %1790 = vrot.lane.b32.xlu1 %v1668_v52, %s2452_s9  ;;  %v1889_v52 = vld [vmem:[%s2868_s3] sm:$0xff] }
 0xe9e   :  { %565 = vrot.lane.b32.xlu1 %v2609_v26, %s2453_s7 }
 0xea2   :  { %786 = vrot.lane.b32.xlu1 %v2638_v60, %s2454_s12 }
 0xea6   :  { %567 = vrot.lane.b32.xlu1 %v2607_v25, %s2453_s7 }
 0xeaa   :  { %788 = vrot.lane.b32.xlu1 %v2636_v59, %s2454_s12 }
 0xeae   :  { %1009 = vrot.lane.b32.xlu1 %v2665_v17, %s2455_s13 }
 0xeb2   :  { %1442 = vrot.lane.b32.xlu1 %v2726_v42, %s2453_s7 }
 0xf12   :  { %v1771_v33 = vpop.xlane.xlu1 %1770 }
 0xf13   :  { %v1773_v27 = vsub.f32 %v1765_v21, %v1771_v33 }
 0xf14   :  { %v1768_v26 = vpop.xlane.xlu0 %1767 }
 0xf15   :  { %v1776_v29 = vmul.f32 1.442695, %v1773_v27  ;;  %v1772_v30 = vsub.f32 %v1764_v22, %v1768_v26 }
 0xf16   :  { %v1791_v32 = vpop.permute.xlu1 %1790 }
 0xf17   :  { %2423 = vpow2.f32 %v1776_v29  ;;  %v1774_v60 = vmul.f32 1.442695, %v1772_v30  ;;  %2327 = vmatprep.subr.msk.mxu1 %vm273_vm6, %v1791_v32 }
 0xf18   :  { %2328 = vmatpush3.msk.msra.mxu1 %vm273_vm6, %v1791_v32 }
 0xf19   :  { %2425 = vpow2.f32 %v1774_v60 }
 0xf1a   :  { %v566_v25 = vpop.permute.xlu1 %565 }
 0xf1b   :  { %572 = vst.msk [vmem:[#allocation3] sm:$0xff] %vm571_vm8, %v566_v25 }
 0xf1e   :  { %v787_v59 = vpop.permute.xlu1 %786 }
 0xf1f   :  { %793 = vst.msk [vmem:[#allocation3] sm:$0xff] %vm792_vm9, %v787_v59 }
 0xf22   :  { %v568_v17 = vpop.permute.xlu1 %567 }
 0xf23   :  { %574 = vst.msk [vmem:[#allocation3 + $0x8] sm:$0xf] %vm573_vm10, %v568_v17 }
 0xf24   :  { %v2424_v34 = vpop.eup %2423 }
 0xf25   :  { %v1781_v35 = vsel %vm242_vm4, %v2424_v34, 0.0 }
 0xf26   :  { %v2426_v36 = vpop.eup %2425  ;;  %v789_v37 = vpop.permute.xlu1 %788  ;;  %1782 = vadd.xlane.f32.xlu0 %v1781_v35 }
 0xf27   :  { %795 = vst.msk [vmem:[#allocation3 + $0x8] sm:$0xf] %vm794_vm11, %v789_v37  ;;  %v1778_v38 = vsel %vm238_vm5, %v2426_v36, 0.0  ;;  %v2125_v37 = vld [vmem:[%s2870_s5] ss:$0 sm:$0xff] }
 0xf2a   :  { %v1010_v39 = vpop.permute.xlu1 %1009  ;;  %1779 = vadd.xlane.f32.xlu0 %v1778_v38 }
 0xf2b   :  { %1016 = vst.msk [vmem:[#allocation3 + $0x8] sm:$0xf] %vm1015_vm12, %v1010_v39  ;;  %v2126_v39 = vld [vmem:[%s2871_s6] ss:$0 sm:$0xff] }
 0xf2e   :  { %v1443_v40 = vpop.permute.xlu1 %1442 }
 0xf2f   :  { %1447 = vst.msk [vmem:[#allocation3 + $0x14] sm:$0xf] %vm573_vm10, %v1443_v40 }
 0xf40   :  { %1788 = vrot.lane.b32.xlu0 %v2646_v7, %s2452_s9 }
 0xf44   :  { %1007 = vrot.lane.b32.xlu0 %v2667_v31, %s2455_s13 }
 0xf48   :  { %1440 = vrot.lane.b32.xlu0 %v2728_v43, %s2453_s7 }
 0xf4c   :  { %1659 = vrot.lane.b32.xlu0 %v1648_v15, %s2454_s12 }
 0xfaf   :  { %v1783_v41 = vpop.xlane.xlu0 %1782 }
 0xfb0   :  { %2427 = vrcp.f32 %v1783_v41 }
 0xfb3   :  { %v1780_v42 = vpop.xlane.xlu0 %1779 }
 0xfb4   :  { %2429 = vrcp.f32 %v1780_v42 }
 0xfb7   :  { %v1789_v44 = vpop.permute.xlu0 %1788 }
 0xfb8   :  { %2329 = vmatprep.subr.mxu1 %v1789_v44 }
 0xfb9   :  { %2330 = vmatpush3.msra.mxu1 %v1789_v44 }
 0xfba   :  { %2334 = vmatprep.subr.mxu1 %v2440_v0 }
 0xfbb   :  { %v1008_v45 = vpop.permute.xlu0 %1007 }
 0xfbc   :  { %1014 = vst.msk [vmem:[#allocation3] sm:$0xff] %vm1013_vm13, %v1008_v45 }
 0xfbd   :  { %v2428_v31 = vpop.eup %2427 }
 0xfbe   :  { %v1787_v48 = vmul.f32 %v2428_v31, %v2424_v34 }
 0xfbf   :  { %v1441_v7 = vpop.permute.xlu0 %1440 }
 0xfc0   :  { %1446 = vst.msk [vmem:[#allocation3 + $0xc] sm:$0xff] %vm571_vm8, %v1441_v7 }
 0xfc1   :  { %v2430_v43 = vpop.eup %2429 }
 0xfc2   :  { %v1786_v46 = vmul.f32 %v2430_v43, %v2426_v36 }
 0xfc3   :  { %v1660_v47 = vpop.permute.xlu0 %1659  ;;  %v1886_v53 = vld [vmem:[#allocation3] sm:$0xff] }
 0xfc4   :  { %1665 = vst.msk [vmem:[#allocation3 + $0xc] sm:$0xff] %vm792_vm9, %v1660_v47  ;;  %2331 = vmatprep.mubr.msk.f32.mxu1 %vm238_vm5, %v1786_v46 }
 0xfc5   :  { %2332 = vmatmul.mubr.msk.f32.vlgmr.msra.gmra.mxu1 %vm238_vm5, %v1787_v48 }
 0xfc6   :  { %2335 = vmatpush3.msra.mxu1 %v1892_v49  ;;  %2342 = vmatprep.mubr.msk.f32.mxu1 %vm2441_vm0, %v2440_v0 }
 0xfc7   :  { %2336 = vmatprep.subr.mxu1 %v2440_v0 }
 0xfc8   :  { %2337 = vmatpush3.msra.mxu1 %v1891_v50 }
 0xfc9   :  { %2338 = vmatprep.subr.mxu1 %v2440_v0 }
 0xfca   :  { %2339 = vmatpush3.msra.mxu1 %v1890_v51 }
 0xfcb   :  { %2340 = vmatprep.subr.mxu1 %v2440_v0 }
 0xfcc   :  { %2341 = vmatpush3.msra.mxu1 %v1889_v52 }
 0xfcd   :  { %2343 = vmatmul.mubr.msk.f32.vlgmr.msra.gmra.mxu1 %vm43_vm1, %v1886_v53 }
 0xfce   :  { %2345 = vmatprep.mubr.msk.f32.mxu1 %vm2441_vm0, %v2440_v0 }
0x1085   :  { %v2333_v54 = vpop.f32.mrf.mxu1 }
0x1086   :  { %1880 = vrot.lane.b32.xlu1 %v2333_v54, %s2455_s13 }
0x1087   :  { %v1867_v55 = vpop.f32.mrf.mxu1 }
0x1088   :  { %1878 = vrot.lane.b32.xlu0 %v1867_v55, %s2455_s13 }
0x108c   :  { %1661 = vrot.lane.b32.xlu0 %v2755_v14, %s2454_s12 }
0x108d   :  { %v1975_v56 = vpop.f32.mrf.mxu1 }
0x108e   :  { %v1976_v61 = vadd.f32 %v2121_v58, %v1975_v56 }
0x108f   :  { %v2344_v57 = vpop.f32.mrf.mxu1 }
0x1090   :  { %v1991_v63 = vadd.f32 %v2437_v62, %v1976_v61 }
0x1092   :  { %v1994_v1 = vsel %vm43_vm1, %v1991_v63, 0.0 }
0x10ab   :  { %1995 = vadd.xlane.f32.xlu0 %v1994_v1 }
0x10f8   :  { %v1881_v4 = vpop.permute.xlu1 %1880 }
0x10fa   :  { %v1879_v2 = vpop.permute.xlu0 %1878 }
0x10fb   :  { %1884 = vst.msk [vmem:[#allocation3 + $0xc] sm:$0xff] %vm1013_vm13, %v1879_v2 }
0x10fe   :  { %v1662_v3 = vpop.permute.xlu0 %1661 }
0x10ff   :  { %1666 = vst.msk [vmem:[#allocation3 + $0x14] sm:$0xf] %vm794_vm11, %v1662_v3 }
0x1100   :  { %1885 = vst.msk [vmem:[#allocation3 + $0x14] sm:$0xf] %vm1015_vm12, %v1881_v4 }
0x1102   :  { %v1887_v5 = vld [vmem:[#allocation3 + $0x8] sm:$0xff] }
0x1103   :  { %2346 = vmatmul.mubr.msk.f32.gmra.mxu1 %vm43_vm1, %v1887_v5 }
0x1104   :  { %2348 = vmatprep.mubr.msk.f32.mxu1 %vm2441_vm0, %v2440_v0 }
0x1107   :  { %v1888_v6 = vld [vmem:[#allocation3 + $0x10] sm:$0xff] }
0x1108   :  { %2349 = vmatmul.mubr.msk.f32.gmra.mxu1 %vm43_vm1, %v1888_v6 }
0x1134   :  { %v1996_v8 = vpop.xlane.xlu0 %1995 }
0x1135   :  { %v2004_v11 = vmul.f32 0.03125, %v1996_v8 }
0x1137   :  { %v2007_v16 = vsub.f32 %v1991_v63, %v2004_v11 }
0x1139   :  { %v2010_v22 = vmul.f32 %v2007_v16, %v2007_v16 }
0x113b   :  { %v2013_v23 = vsel %vm43_vm1, %v2010_v22, 0.0 }
0x11c3   :  { %v1980_v9 = vpop.f32.mrf.mxu1 }
0x11c4   :  { %v1981_v10 = vadd.f32 %v2121_v58, %v1980_v9 }
0x11c5   :  { %v2347_v28 = vpop.f32.mrf.mxu1 }
0x11c6   :  { %v1992_v13 = vadd.f32 %v2438_v12, %v1981_v10 }
0x11c8   :  { %v1985_v14 = vpop.f32.mrf.mxu1  ;;  %v1997_v15 = vsel %vm43_vm1, %v1992_v13, 0.0 }
0x11c9   :  { %v1986_v18 = vadd.f32 %v2121_v58, %v1985_v14  ;;  %1998 = vadd.xlane.f32.xlu1 %v1997_v15 }
0x11ca   :  { %v2350_v0 = vpop.f32.mrf.mxu1 }
0x11cb   :  { %v1993_v20 = vadd.f32 %v2439_v19, %v1986_v18 }
0x11cd   :  { %v2000_v21 = vsel %vm43_vm1, %v1993_v20, 0.0 }
0x11ce   :  { %2001 = vadd.xlane.f32.xlu0 %v2000_v21 }
0x11d2   :  { %2014 = vadd.xlane.f32.xlu0 %v2013_v23 }
0x1252   :  { %v1999_v24 = vpop.xlane.xlu1 %1998 }
0x1253   :  { %v2005_v33 = vmul.f32 0.03125, %v1999_v24 }
0x1255   :  { %v2008_v27 = vsub.f32 %v1992_v13, %v2005_v33 }
0x1257   :  { %v2002_v26 = vpop.xlane.xlu0 %2001  ;;  %v2011_v29 = vmul.f32 %v2008_v27, %v2008_v27 }
0x1258   :  { %v2006_v30 = vmul.f32 0.03125, %v2002_v26 }
0x1259   :  { %v2016_v32 = vsel %vm43_vm1, %v2011_v29, 0.0 }
0x125a   :  { %v2009_v60 = vsub.f32 %v1993_v20, %v2006_v30  ;;  %2017 = vadd.xlane.f32.xlu1 %v2016_v32 }
0x125b   :  { %v2015_v25 = vpop.xlane.xlu0 %2014 }
0x125c   :  { %v2022_v59 = vmul.f32 0.03125, %v2015_v25  ;;  %v2012_v17 = vmul.f32 %v2009_v60, %v2009_v60 }
0x125e   :  { %v2025_v34 = vadd.f32 1e-05, %v2022_v59  ;;  %v2019_v35 = vsel %vm43_vm1, %v2012_v17, 0.0 }
0x125f   :  { %2020 = vadd.xlane.f32.xlu0 %v2019_v35 }
0x1260   :  { %2431 = vrsqrt.f32 %v2025_v34 }
0x126d   :  { %v2432_v36 = vpop.eup %2431 }
0x126e   :  { %v2031_v38 = vmul.f32 %v2432_v36, %v2007_v16 }
0x1270   :  { %v2040_v40 = vmul.f32 %v2125_v37, %v2031_v38 }
0x1272   :  { %v2049_v41 = vadd.f32 %v2126_v39, %v2040_v40 }
0x1274   :  { %2052 = vst.msk [vmem:[%s2872_s8] sm:$0xff] %vm43_vm1, %v2049_v41 }
0x12e3   :  { %v2018_v42 = vpop.xlane.xlu1 %2017 }
0x12e4   :  { %v2023_v44 = vmul.f32 0.03125, %v2018_v42 }
0x12e6   :  { %v2026_v45 = vadd.f32 1e-05, %v2023_v44 }
0x12e8   :  { %2433 = vrsqrt.f32 %v2026_v45  ;;  %v2021_v7 = vpop.xlane.xlu0 %2020 }
0x12e9   :  { %v2024_v31 = vmul.f32 0.03125, %v2021_v7 }
0x12eb   :  { %v2027_v43 = vadd.f32 1e-05, %v2024_v31 }
0x12ed   :  { %2435 = vrsqrt.f32 %v2027_v43 }
0x12f5   :  { %v2434_v46 = vpop.eup %2433 }
0x12f6   :  { %v2032_v47 = vmul.f32 %v2434_v46, %v2008_v27 }
0x12f8   :  { %v2041_v48 = vmul.f32 %v2125_v37, %v2032_v47 }
0x12fa   :  { %v2436_v49 = vpop.eup %2435  ;;  %v2050_v50 = vadd.f32 %v2126_v39, %v2041_v48 }
0x12fb   :  { %v2033_v51 = vmul.f32 %v2436_v49, %v2009_v60 }
0x12fc   :  { %2053 = vst.msk [vmem:[%s2872_s8 + $0x8] sm:$0xff] %vm43_vm1, %v2050_v50 }
0x12fd   :  { %v2042_v52 = vmul.f32 %v2125_v37, %v2033_v51 }
0x12ff   :  { %v2051_v53 = vadd.f32 %v2126_v39, %v2042_v52 }
0x1301   :  { %2054 = vst.msk [vmem:[%s2872_s8 + $0x10] sm:$0xff] %vm43_vm1, %v2051_v53 }

// kernel: embedded_transformer_forward.17
= control target key start
LH: loop header
LB: loop body
LE: loop exit
PB: predicated region body
PF: predicated region fallthrough
CT: control target
= control target key end

     0   :  { %vm39_vm0 = vcmask 261120   ;;  %v1891_v6 = vmov 0.0   ;;  %vm121_vm1 = vcmask 785408   ;;  %vm1892_vm2 = vmmov 0   ;;  %s1896_s15 = smov 120   ;;  %s1897_s16 = smov 80   ;;  %s2192_s1 = inlined_call_operand.vmem [shape: f32[32,96], index: 1, kind: input, shape index: {}]   ;;  %s2193_s0 = inlined_call_operand.vmem [shape: f32[16,32], index: 0, kind: input, shape index: {}]   ;;  %s2194_s2 = inlined_call_operand.vmem [shape: f32[1,96], index: 2, kind: input, shape index: {}]   ;;  %s2195_s3 = inlined_call_operand.vmem [shape: f32[32,32], index: 3, kind: input, shape index: {}]   ;;  %s2196_s4 = inlined_call_operand.vmem [shape: f32[1,32], index: 4, kind: input, shape index: {}]   ;;  %s2197_s5 = inlined_call_operand.vmem [shape: f32[1,32], index: 5, kind: input, shape index: {}]   ;;  %s2198_s6 = inlined_call_operand.vmem [shape: f32[1,32], index: 6, kind: input, shape index: {}]   ;;  %s2199_s7 = inlined_call_operand.vmem [shape: f32[16,32], index: 7, kind: output, shape index: {}]  }
   0x1   :  { %v31_v0 = vld [vmem:[%s2192_s1 + $0x18] sm:$0xff]  ;;  %v30_v1 = vld [vmem:[%s2192_s1 + $0x10] sm:$0xff]  ;;  %v1956_v2 = vld [vmem:[%s2193_s0] sm:$0xff]  ;;  %1748 = vmatprep.subr.mxu1 %v1891_v6  ;;  %1750 = vmatprep.mubr.msk.f32.mxu1 %vm1892_vm2, %v1891_v6  ;;  %s1898_s17 = smov 112   ;;  %vm134_vm3 = vcmask 64512   ;;  %v124_v19 = vlaneseq  ;;  %s1899_s18 = smov 72  }
   0x2   :  { %1737 = vmatprep.subr.mxu0 %v31_v0  ;;  %v29_v3 = vld [vmem:[%s2192_s1 + $0x8] sm:$0xff]  ;;  %1745 = vmatprep.mubr.msk.f32.mxu0 %vm39_vm0, %v1956_v2  ;;  %v28_v4 = vld [vmem:[%s2192_s1] sm:$0xff]  ;;  %s1894_s1 = smov 96   ;;  %s1900_s19 = smov 104   ;;  %vm472_vm5 = vcmask 130112   ;;  %vm647_vm6 = vcmask 195712  }
   0x3   :  { %1738 = vmatpush3.msra.mxu0 %v31_v0  ;;  %v1969_v5 = vld [vmem:[%s2193_s0 + $0x8] sm:$0xff]  ;;  %v1661_v7 = vld [vmem:[%s2194_s2] ss:$0 sm:$0xff]  ;;  %s1893_s0 = smov 64   ;;  %s1895_s2 = smov 88   ;;  %v125_v20 = vshrl.u32 %v124_v19, 7 }
   0x4   :  { %1739 = vmatprep.subr.mxu0 %v30_v1  ;;  %v127_v21 = vand.u32 127, %v124_v19  ;;  %s1901_s20 = smov 48   ;;  %s1902_s21 = smov 56   ;;  %vm822_vm7 = vcmask 261312  }
   0x5   :  { %1740 = vmatpush3.msra.mxu0 %v30_v1  ;;  %s1903_s22 = smov 40   ;;  %s1904_s23 = smov 8  }
   0x6   :  { %1741 = vmatprep.subr.mxu0 %v29_v3  ;;  %vm128_vm4 = vcmp.gt.s32.totalorder %v127_v21, %v125_v20  ;;  %s1905_s24 = smov 16   ;;  %s1906_s25 = smov 24  }
   0x7   :  { %1742 = vmatpush3.msra.mxu0 %v29_v3  ;;  %v2013_v23 = vsel %vm128_vm4, -1e+30, %v1891_v6 }
   0x8   :  { %1743 = vmatprep.subr.mxu0 %v28_v4 }
   0x9   :  { %1744 = vmatpush3.msra.mxu0 %v28_v4 }
   0xa   :  { %1746 = vmatmul.mubr.msk.f32.vlgmr.msra.gmra.mxu0 %vm39_vm0, %v1969_v5  ;;  %1768 = vmatprep.subr.mxu0 %v1891_v6 }
   0xb   :  { %1770 = vmatprep.mubr.msk.f32.mxu0 %vm1892_vm2, %v1891_v6 }
  0xca   :  { %v1747_v8 = vpop.f32.mrf.mxu0 }
  0xcb   :  { %v118_v9 = vadd.f32 %v1747_v8, %v1661_v7 }
  0xcc   :  { %v112_v10 = vpop.f32.mrf.mxu0 }
  0xcd   :  { %123 = vst.msk [vmem:[#allocation2 + $0x8] sm:$0xff] %vm121_vm1, %v118_v9  ;;  %v113_v11 = vadd.f32 %v1661_v7, %v112_v10 }
  0xcf   :  { %122 = vst.msk [vmem:[#allocation2] sm:$0xff] %vm121_vm1, %v113_v11 }
  0xd4   :  { %v2018_v30 = vld [vmem:[#allocation2 + $0x8] sm:$0xff] }
  0xd6   :  { %v1982_v12 = vld [vmem:[#allocation2] sm:$0xff] }
  0xd7   :  { %222 = vrot.lane.b32.xlu1 %v1982_v12, %s1893_s0  ;;  %132 = vrot.lane.b32.xlu0 %v1982_v12, %s1894_s1 }
  0xdb   :  { %303 = vrot.lane.b32.xlu1 %v1982_v12, %s1895_s2 }
  0xdf   :  { %301 = vrot.lane.b32.xlu1 %v1982_v12, %s1896_s15 }
  0xe3   :  { %478 = vrot.lane.b32.xlu1 %v1982_v12, %s1897_s16 }
  0xe7   :  { %476 = vrot.lane.b32.xlu1 %v1982_v12, %s1898_s17 }
 0x149   :  { %v223_v13 = vpop.permute.xlu1 %222  ;;  %v133_v14 = vpop.permute.xlu0 %132 }
 0x14a   :  { %1749 = vmatpush3.xpose.msk.msra.mxu1 %vm134_vm3, %v133_v14 }
 0x14b   :  { %1753 = vmatprep.subr.mxu1 %v1891_v6 }
 0x14d   :  { %v1998_v15 = vpop.permute.xlu1 %303  ;;  %1751 = vmatmul.mubr.msk.f32.vlgmr.msra.gmra.mxu1 %vm134_vm3, %v1982_v12 }
 0x14e   :  { %1754 = vmatpush3.msra.mxu1 %v223_v13  ;;  %1755 = vmatprep.mubr.msk.f32.mxu1 %vm1892_vm2, %v1891_v6 }
 0x14f   :  { %1758 = vmatprep.subr.mxu1 %v1891_v6 }
 0x151   :  { %v2005_v16 = vpop.permute.xlu1 %301 }
 0x155   :  { %v479_v17 = vpop.permute.xlu1 %478 }
 0x156   :  { %1769 = vmatpush3.xpose.msk.msra.mxu0 %vm134_vm3, %v479_v17 }
 0x157   :  { %1778 = vmatprep.subr.mxu0 %v1891_v6 }
 0x159   :  { %v477_v18 = vpop.permute.xlu1 %476 }
 0x15a   :  { %1771 = vmatmul.mubr.msk.f32.vlgmr.msra.gmra.mxu0 %vm134_vm3, %v477_v18 }
 0x15b   :  { %1780 = vmatprep.mubr.msk.f32.mxu0 %vm1892_vm2, %v1891_v6 }
 0x20d   :  { %v205_v22 = vpop.f32.mrf.mxu1 }
 0x20e   :  { %v209_v24 = vmul.f32 0.35355338, %v205_v22 }
 0x20f   :  { %v1752_v25 = vpop.f32.mrf.mxu1 }
 0x210   :  { %v210_v26 = vadd.f32 %v209_v24, %v2013_v23 }
 0x212   :  { %v211_v27 = vsel %vm134_vm3, %v210_v26, -inf }
 0x213   :  { %212 = vmax.xlane.f32.xlu0 %v211_v27 }
 0x21a   :  { %v550_v28 = vpop.f32.mrf.mxu0 }
 0x21b   :  { %v554_v31 = vmul.f32 0.35355338, %v550_v28 }
 0x21c   :  { %v1772_v29 = vpop.f32.mrf.mxu0 }
 0x21d   :  { %v2024_v32 = vadd.f32 %v554_v31, %v2013_v23 }
 0x21f   :  { %v556_v33 = vsel %vm134_vm3, %v2024_v32, -inf }
 0x229   :  { %653 = vrot.lane.b32.xlu0 %v1982_v12, %s1899_s18 }
 0x22d   :  { %1168 = vrot.lane.b32.xlu0 %v2018_v30, %s1898_s17 }
 0x231   :  { %1342 = vrot.lane.b32.xlu0 %v2018_v30, %s1900_s19 }
 0x250   :  { %557 = vmax.xlane.f32.xlu0 %v556_v33 }
 0x29c   :  { %v213_v34 = vpop.xlane.xlu0 %212 }
 0x29d   :  { %v214_v35 = vsub.f32 %v210_v26, %v213_v34 }
 0x29f   :  { %v215_v36 = vmul.f32 1.442695, %v214_v35 }
 0x2a0   :  { %v654_v37 = vpop.permute.xlu0 %653 }
 0x2a1   :  { %1855 = vpow2.f32 %v215_v36  ;;  %1779 = vmatpush3.xpose.msk.msra.mxu0 %vm134_vm3, %v654_v37 }
 0x2a2   :  { %1788 = vmatprep.subr.mxu0 %v1891_v6 }
 0x2a4   :  { %v1169_v48 = vpop.permute.xlu0 %1168 }
 0x2a8   :  { %v1343_v50 = vpop.permute.xlu0 %1342 }
 0x2ae   :  { %v1856_v38 = vpop.eup %1855 }
 0x2af   :  { %v217_v39 = vsel %vm134_vm3, %v1856_v38, 0.0 }
 0x2b0   :  { %218 = vadd.xlane.f32.xlu1 %v217_v39 }
 0x2c1   :  { %651 = vrot.lane.b32.xlu1 %v1982_v12, %s1900_s19 }
 0x2c5   :  { %826 = vrot.lane.b32.xlu1 %v2018_v30, %s1894_s1 }
 0x2c9   :  { %996 = vrot.lane.b32.xlu1 %v2018_v30, %s1895_s2 }
 0x2cd   :  { %994 = vrot.lane.b32.xlu1 %v2018_v30, %s1896_s15 }
 0x2d1   :  { %1170 = vrot.lane.b32.xlu1 %v2018_v30, %s1897_s16 }
 0x2d5   :  { %1344 = vrot.lane.b32.xlu1 %v2018_v30, %s1899_s18 }
 0x2d9   :  { %v558_v55 = vpop.xlane.xlu0 %557 }
 0x2da   :  { %v559_v58 = vsub.f32 %v2024_v32, %v558_v55 }
 0x2dc   :  { %v560_v60 = vmul.f32 1.442695, %v559_v58 }
 0x339   :  { %v219_v40 = vpop.xlane.xlu1 %218 }
 0x33a   :  { %1857 = vrcp.f32 %v219_v40 }
 0x33b   :  { %1859 = vpow2.f32 %v560_v60 }
 0x33d   :  { %v652_v41 = vpop.permute.xlu1 %651 }
 0x33e   :  { %1781 = vmatmul.mubr.msk.f32.vlgmr.msra.gmra.mxu0 %vm134_vm3, %v652_v41 }
 0x33f   :  { %1790 = vmatprep.mubr.msk.f32.mxu0 %vm1892_vm2, %v1891_v6 }
 0x341   :  { %v827_v42 = vpop.permute.xlu1 %826 }
 0x342   :  { %1789 = vmatpush3.xpose.msk.msra.mxu0 %vm134_vm3, %v827_v42 }
 0x343   :  { %1798 = vmatprep.subr.mxu0 %v1891_v6 }
 0x345   :  { %v997_v43 = vpop.permute.xlu1 %996  ;;  %1791 = vmatmul.mubr.msk.f32.vlgmr.msra.gmra.mxu0 %vm134_vm3, %v2018_v30 }
 0x346   :  { %1799 = vmatpush3.xpose.msk.msra.mxu0 %vm134_vm3, %v997_v43  ;;  %1800 = vmatprep.mubr.msk.f32.mxu0 %vm1892_vm2, %v1891_v6 }
 0x347   :  { %v1858_v44 = vpop.eup %1857  ;;  %1808 = vmatprep.subr.mxu0 %v1891_v6 }
 0x348   :  { %v221_v45 = vmul.f32 %v1858_v44, %v1856_v38  ;;  %v2088_v26 = vpop.eup %1859 }
 0x349   :  { %v995_v46 = vpop.permute.xlu1 %994  ;;  %v562_v28 = vsel %vm134_vm3, %v2088_v26, 0.0 }
 0x34a   :  { %1756 = vmatmul.mubr.msk.f32.vlgmr.msra.gmra.mxu1 %vm134_vm3, %v221_v45  ;;  %1801 = vmatmul.mubr.msk.f32.vlgmr.msra.gmra.mxu0 %vm134_vm3, %v995_v46 }
 0x34b   :  { %1759 = vmatpush3.xpose.msk.msra.mxu1 %vm134_vm3, %v1998_v15  ;;  %1760 = vmatprep.mubr.msk.f32.mxu1 %vm1892_vm2, %v1891_v6 }
 0x34c   :  { %1810 = vmatprep.mubr.msk.f32.mxu0 %vm1892_vm2, %v1891_v6  ;;  %1763 = vmatprep.subr.mxu1 %v1891_v6 }
 0x34d   :  { %v1171_v47 = vpop.permute.xlu1 %1170 }
 0x34e   :  { %1761 = vmatmul.mubr.msk.f32.vlgmr.msra.gmra.mxu1 %vm134_vm3, %v2005_v16  ;;  %1809 = vmatpush3.xpose.msk.msra.mxu0 %vm134_vm3, %v1171_v47 }
 0x34f   :  { %1818 = vmatprep.subr.mxu0 %v1891_v6  ;;  %1765 = vmatprep.mubr.msk.f32.mxu1 %vm1892_vm2, %v1891_v6 }
 0x351   :  { %v1345_v49 = vpop.permute.xlu1 %1344  ;;  %1811 = vmatmul.mubr.msk.f32.vlgmr.msra.gmra.mxu0 %vm134_vm3, %v1169_v48 }
 0x352   :  { %1819 = vmatpush3.xpose.msk.msra.mxu0 %vm134_vm3, %v1345_v49  ;;  %1820 = vmatprep.mubr.msk.f32.mxu0 %vm1892_vm2, %v1891_v6 }
 0x355   :  { %1821 = vmatmul.mubr.msk.f32.vlgmr.msra.gmra.mxu0 %vm134_vm3, %v1343_v50 }
 0x3fe   :  { %v725_v51 = vpop.f32.mrf.mxu0 }
 0x3ff   :  { %v729_v52 = vmul.f32 0.35355338, %v725_v51 }
 0x400   :  { %v1782_v53 = vpop.f32.mrf.mxu0 }
 0x401   :  { %v730_v54 = vadd.f32 %v729_v52, %v2013_v23 }
 0x403   :  { %v731_v56 = vsel %vm134_vm3, %v730_v54, -inf }
 0x404   :  { %732 = vmax.xlane.f32.xlu0 %v731_v56 }
 0x405   :  { %v898_v57 = vpop.f32.mrf.mxu0 }
 0x406   :  { %v902_v7 = vmul.f32 0.35355338, %v898_v57 }
 0x407   :  { %v1792_v59 = vpop.f32.mrf.mxu0 }
 0x408   :  { %v903_v17 = vadd.f32 %v902_v7, %v2013_v23 }
 0x40a   :  { %v294_v61 = vpop.f32.mrf.mxu1  ;;  %v1068_v62 = vpop.f32.mrf.mxu0  ;;  %v904_v21 = vsel %vm134_vm3, %v903_v17, -inf }
 0x40b   :  { %298 = vst.msk [vmem:[#allocation3] sm:$0xff] %vm134_vm3, %v294_v61  ;;  %v1072_v63 = vmul.f32 0.35355338, %v1068_v62 }
 0x40c   :  { %v1757_v0 = vpop.f32.mrf.mxu1  ;;  %v1802_v1 = vpop.f32.mrf.mxu0 }
 0x40d   :  { %v1073_v3 = vadd.f32 %v1072_v63, %v2013_v23 }
 0x40e   :  { %v375_v4 = vpop.f32.mrf.mxu1 }
 0x40f   :  { %v379_v8 = vmul.f32 0.35355338, %v375_v4  ;;  %v1074_v9 = vsel %vm134_vm3, %v1073_v3, -inf }
 0x410   :  { %1075 = vmax.xlane.f32.xlu0 %v1074_v9  ;;  %v1762_v10 = vpop.f32.mrf.mxu1 }
 0x411   :  { %v1242_v11 = vpop.f32.mrf.mxu0  ;;  %v2079_v13 = vadd.f32 %v379_v8, %v2013_v23 }
 0x412   :  { %v1246_v14 = vmul.f32 0.35355338, %v1242_v11 }
 0x413   :  { %v1812_v15 = vpop.f32.mrf.mxu0  ;;  %v381_v16 = vsel %vm134_vm3, %v2079_v13, -inf }
 0x414   :  { %382 = vmax.xlane.f32.xlu1 %v381_v16  ;;  %v1247_v22 = vadd.f32 %v1246_v14, %v2013_v23 }
 0x415   :  { %v1416_v18 = vpop.f32.mrf.mxu0 }
 0x416   :  { %v1420_v19 = vmul.f32 0.35355338, %v1416_v18  ;;  %v1248_v27 = vsel %vm134_vm3, %v1247_v22, -inf }
 0x417   :  { %v1822_v20 = vpop.f32.mrf.mxu0 }
 0x418   :  { %905 = vmax.xlane.f32.xlu1 %v904_v21  ;;  %v1421_v24 = vadd.f32 %v1420_v19, %v2013_v23 }
 0x41a   :  { %v1422_v25 = vsel %vm134_vm3, %v1421_v24, -inf }
 0x41b   :  { %1423 = vmax.xlane.f32.xlu0 %v1422_v25 }
 0x41c   :  { %1249 = vmax.xlane.f32.xlu1 %v1248_v27 }
 0x41f   :  { %563 = vadd.xlane.f32.xlu0 %v562_v28 }
 0x48d   :  { %v733_v29 = vpop.xlane.xlu0 %732 }
 0x48e   :  { %v734_v31 = vsub.f32 %v730_v54, %v733_v29 }
 0x490   :  { %v735_v32 = vmul.f32 1.442695, %v734_v31 }
 0x492   :  { %1861 = vpow2.f32 %v735_v32 }
 0x499   :  { %v1076_v33 = vpop.xlane.xlu0 %1075 }
 0x49a   :  { %v1077_v34 = vsub.f32 %v1073_v3, %v1076_v33 }
 0x49c   :  { %v1078_v35 = vmul.f32 1.442695, %v1077_v34  ;;  %v1518_v34 = vld [vmem:[%s2195_s3 + $0x10] sm:$0xff] }
 0x49d   :  { %v383_v23 = vpop.xlane.xlu1 %382 }
 0x49e   :  { %1863 = vpow2.f32 %v1078_v35  ;;  %v384_v55 = vsub.f32 %v2079_v13, %v383_v23  ;;  %v1517_v23 = vld [vmem:[%s2195_s3 + $0x8] sm:$0xff] }
 0x49f   :  { %v2093_v36 = vpop.eup %1861 }
 0x4a0   :  { %v737_v37 = vsel %vm134_vm3, %v2093_v36, 0.0  ;;  %v385_v56 = vmul.f32 1.442695, %v384_v55 }
 0x4a1   :  { %738 = vadd.xlane.f32.xlu1 %v737_v37  ;;  %v906_v38 = vpop.xlane.xlu1 %905  ;;  %v1516_v37 = vld [vmem:[%s2195_s3] sm:$0xff] }
 0x4a2   :  { %v907_v39 = vsub.f32 %v903_v17, %v906_v38 }
 0x4a4   :  { %v908_v40 = vmul.f32 1.442695, %v907_v39  ;;  %v1424_v41 = vpop.xlane.xlu0 %1423 }
 0x4a5   :  { %v1425_v42 = vsub.f32 %v1421_v24, %v1424_v41  ;;  %v1250_v43 = vpop.xlane.xlu1 %1249 }
 0x4a6   :  { %1865 = vpow2.f32 %v908_v40  ;;  %v1251_v44 = vsub.f32 %v1247_v22, %v1250_v43 }
 0x4a7   :  { %v1426_v45 = vmul.f32 1.442695, %v1425_v42 }
 0x4a8   :  { %v1252_v46 = vmul.f32 1.442695, %v1251_v44  ;;  %v564_v59 = vpop.xlane.xlu0 %563 }
 0x4a9   :  { %1867 = vpow2.f32 %v1426_v45 }
 0x4aa   :  { %1869 = vpow2.f32 %v1252_v46 }
 0x4ab   :  { %v2097_v47 = vpop.eup %1863  ;;  %1871 = vpow2.f32 %v385_v56 }
 0x4ac   :  { %v1080_v48 = vsel %vm134_vm3, %v2097_v47, 0.0 }
 0x4ad   :  { %1081 = vadd.xlane.f32.xlu1 %v1080_v48 }
 0x4b3   :  { %v2101_v49 = vpop.eup %1865 }
 0x4b4   :  { %v910_v50 = vsel %vm134_vm3, %v2101_v49, 0.0 }
 0x4b5   :  { %911 = vadd.xlane.f32.xlu0 %v910_v50 }
 0x4b6   :  { %v2105_v51 = vpop.eup %1867 }
 0x4b7   :  { %v2107_v52 = vpop.eup %1869  ;;  %v1428_v53 = vsel %vm134_vm3, %v2105_v51, 0.0 }
 0x4b8   :  { %1429 = vadd.xlane.f32.xlu1 %v1428_v53  ;;  %v1254_v54 = vsel %vm134_vm3, %v2107_v52, 0.0  ;;  %v1872_v57 = vpop.eup %1871 }
 0x4b9   :  { %1255 = vadd.xlane.f32.xlu0 %v1254_v54  ;;  %v387_v58 = vsel %vm134_vm3, %v1872_v57, 0.0 }
 0x4c9   :  { %567 = vrot.lane.b32.xlu1 %v1982_v12, %s1901_s20 }
 0x4cf   :  { %392 = vrot.lane.b32.xlu0 %v1982_v12, %s1902_s21 }
 0x4d3   :  { %915 = vrot.lane.b32.xlu0 %v2018_v30, %s1893_s0 }
 0x4d7   :  { %1259 = vrot.lane.b32.xlu0 %v2018_v30, %s1901_s20 }
 0x4ed   :  { %388 = vadd.xlane.f32.xlu1 %v387_v58 }
 0x4fe   :  { %742 = vrot.lane.b32.xlu1 %v1982_v12, %s1903_s22 }
 0x502   :  { %1085 = vrot.lane.b32.xlu1 %v2018_v30, %s1902_s21 }
 0x506   :  { %1433 = vrot.lane.b32.xlu1 %v2018_v30, %s1903_s22 }
 0x52a   :  { %v739_v63 = vpop.xlane.xlu1 %738 }
 0x536   :  { %v1082_v0 = vpop.xlane.xlu1 %1081 }
 0x53e   :  { %v912_v60 = vpop.xlane.xlu0 %911 }
 0x541   :  { %v1430_v1 = vpop.xlane.xlu1 %1429 }
 0x542   :  { %v1256_v61 = vpop.xlane.xlu0 %1255 }
 0x545   :  { %v568_v3 = vpop.permute.xlu1 %567 }
 0x546   :  { %v393_v62 = vpop.permute.xlu0 %392 }
 0x547   :  { %1764 = vmatpush3.msra.mxu1 %v393_v62 }
 0x548   :  { %1773 = vmatprep.subr.mxu1 %v1891_v6 }
 0x54a   :  { %v916_v14 = vpop.permute.xlu0 %915 }
 0x54e   :  { %v1260_v20 = vpop.permute.xlu0 %1259 }
 0x576   :  { %v389_v4 = vpop.xlane.xlu1 %388 }
 0x577   :  { %1873 = vrcp.f32 %v389_v4 }
 0x578   :  { %1875 = vrcp.f32 %v564_v59 }
 0x579   :  { %1877 = vrcp.f32 %v739_v63 }
 0x57a   :  { %1879 = vrcp.f32 %v912_v60  ;;  %v743_v10 = vpop.permute.xlu1 %742 }
 0x57b   :  { %1881 = vrcp.f32 %v1082_v0 }
 0x57c   :  { %1883 = vrcp.f32 %v1256_v61 }
 0x57d   :  { %1885 = vrcp.f32 %v1430_v1 }
 0x57e   :  { %v1086_v17 = vpop.permute.xlu1 %1085 }
 0x582   :  { %v1434_v24 = vpop.permute.xlu1 %1433 }
 0x584   :  { %v1874_v12 = vpop.eup %1873 }
 0x585   :  { %v391_v7 = vmul.f32 %v1874_v12, %v1872_v57  ;;  %v1876_v30 = vpop.eup %1875 }
 0x586   :  { %v566_v8 = vmul.f32 %v1876_v30, %v2088_v26  ;;  %v1878_v9 = vpop.eup %1877 }
 0x587   :  { %1766 = vmatmul.mubr.msk.f32.vlgmr.msra.gmra.mxu1 %vm134_vm3, %v391_v7  ;;  %v741_v11 = vmul.f32 %v1878_v9, %v2093_v36  ;;  %v1880_v13 = vpop.eup %1879 }
 0x588   :  { %1774 = vmatpush3.msra.mxu1 %v568_v3  ;;  %1775 = vmatprep.mubr.msk.f32.mxu1 %vm1892_vm2, %v1891_v6  ;;  %v914_v15 = vmul.f32 %v1880_v13, %v2101_v49  ;;  %v1882_v16 = vpop.eup %1881  ;;  %v1691_v13 = vld [vmem:[%s2197_s5] ss:$0 sm:$0xff] }
 0x589   :  { %1783 = vmatprep.subr.mxu1 %v1891_v6  ;;  %v1084_v18 = vmul.f32 %v1882_v16, %v2097_v47  ;;  %v1884_v19 = vpop.eup %1883 }
 0x58a   :  { %v1258_v21 = vmul.f32 %v1884_v19, %v2107_v52  ;;  %v1886_v22 = vpop.eup %1885 }
 0x58b   :  { %1776 = vmatmul.mubr.msk.f32.vlgmr.msra.gmra.mxu1 %vm134_vm3, %v566_v8  ;;  %v1432_v25 = vmul.f32 %v1886_v22, %v2105_v51  ;;  %v1688_v51 = vld [vmem:[%s2196_s4] ss:$0 sm:$0xff] }
 0x58c   :  { %1784 = vmatpush3.msra.mxu1 %v743_v10  ;;  %1785 = vmatprep.mubr.msk.f32.mxu1 %vm1892_vm2, %v1891_v6 }
 0x58d   :  { %1793 = vmatprep.subr.mxu1 %v1891_v6 }
 0x58f   :  { %1786 = vmatmul.mubr.msk.f32.vlgmr.msra.gmra.mxu1 %vm134_vm3, %v741_v11 }
 0x590   :  { %1794 = vmatpush3.msra.mxu1 %v916_v14  ;;  %1795 = vmatprep.mubr.msk.f32.mxu1 %vm1892_vm2, %v1891_v6 }
 0x591   :  { %1803 = vmatprep.subr.mxu1 %v1891_v6 }
 0x593   :  { %1796 = vmatmul.mubr.msk.f32.vlgmr.msra.gmra.mxu1 %vm134_vm3, %v914_v15  ;;  %v1692_v15 = vld [vmem:[%s2198_s6] ss:$0 sm:$0xff] }
 0x594   :  { %1804 = vmatpush3.msra.mxu1 %v1086_v17  ;;  %1805 = vmatprep.mubr.msk.f32.mxu1 %vm1892_vm2, %v1891_v6 }
 0x595   :  { %1813 = vmatprep.subr.mxu1 %v1891_v6 }
 0x597   :  { %1806 = vmatmul.mubr.msk.f32.vlgmr.msra.gmra.mxu1 %vm134_vm3, %v1084_v18 }
 0x598   :  { %1814 = vmatpush3.msra.mxu1 %v1260_v20  ;;  %1815 = vmatprep.mubr.msk.f32.mxu1 %vm1892_vm2, %v1891_v6 }
 0x599   :  { %1823 = vmatprep.subr.mxu1 %v1891_v6 }
 0x59b   :  { %1816 = vmatmul.mubr.msk.f32.vlgmr.msra.gmra.mxu1 %vm134_vm3, %v1258_v21 }
 0x59c   :  { %1824 = vmatpush3.msra.mxu1 %v1434_v24  ;;  %1825 = vmatprep.mubr.msk.f32.mxu1 %vm1892_vm2, %v1891_v6  ;;  %v1519_v6 = vld [vmem:[%s2195_s3 + $0x18] sm:$0xff] }
 0x59d   :  { %1828 = vmatprep.subr.mxu0 %v1519_v6 }
 0x59e   :  { %1829 = vmatpush3.msra.mxu0 %v1519_v6 }
 0x59f   :  { %1826 = vmatmul.mubr.msk.f32.vlgmr.msra.gmra.mxu1 %vm134_vm3, %v1432_v25  ;;  %1830 = vmatprep.subr.mxu0 %v1518_v34 }
 0x5a0   :  { %1831 = vmatpush3.msra.mxu0 %v1518_v34 }
 0x5a1   :  { %1832 = vmatprep.subr.mxu0 %v1517_v23 }
 0x5a2   :  { %1833 = vmatpush3.msra.mxu0 %v1517_v23 }
 0x5a3   :  { %1834 = vmatprep.subr.mxu0 %v1516_v37 }
 0x5a4   :  { %1835 = vmatpush3.msra.mxu0 %v1516_v37 }
 0x647   :  { %v464_v26 = vpop.f32.mrf.mxu1 }
 0x648   :  { %469 = vrot.lane.b32.xlu0 %v464_v26, %s1904_s23 }
 0x649   :  { %v1767_v27 = vpop.f32.mrf.mxu1 }
 0x64b   :  { %v639_v28 = vpop.f32.mrf.mxu1 }
 0x64c   :  { %644 = vrot.lane.b32.xlu1 %v639_v28, %s1905_s24 }
 0x64d   :  { %v1777_v29 = vpop.f32.mrf.mxu1 }
 0x64f   :  { %v814_v31 = vpop.f32.mrf.mxu1 }
 0x650   :  { %819 = vrot.lane.b32.xlu1 %v814_v31, %s1906_s25 }
 0x651   :  { %v1787_v32 = vpop.f32.mrf.mxu1 }
 0x653   :  { %v987_v33 = vpop.f32.mrf.mxu1 }
 0x654   :  { %991 = vst.msk [vmem:[#allocation3 + $0x8] sm:$0xff] %vm134_vm3, %v987_v33 }
 0x655   :  { %v1797_v35 = vpop.f32.mrf.mxu1 }
 0x657   :  { %v1157_v36 = vpop.f32.mrf.mxu1 }
 0x658   :  { %1162 = vrot.lane.b32.xlu0 %v1157_v36, %s1904_s23 }
 0x659   :  { %v1807_v38 = vpop.f32.mrf.mxu1 }
 0x65b   :  { %v1331_v39 = vpop.f32.mrf.mxu1 }
 0x65c   :  { %1336 = vrot.lane.b32.xlu0 %v1331_v39, %s1905_s24 }
 0x65d   :  { %v1817_v40 = vpop.f32.mrf.mxu1 }
 0x65f   :  { %v1505_v41 = vpop.f32.mrf.mxu1 }
 0x660   :  { %1510 = vrot.lane.b32.xlu1 %v1505_v41, %s1906_s25 }
 0x661   :  { %v1827_v42 = vpop.f32.mrf.mxu1 }
 0x6ba   :  { %v470_v43 = vpop.permute.xlu0 %469 }
 0x6bb   :  { %473 = vst.msk [vmem:[#allocation3] sm:$0xff] %vm472_vm5, %v470_v43 }
 0x6be   :  { %v645_v44 = vpop.permute.xlu1 %644 }
 0x6bf   :  { %648 = vst.msk [vmem:[#allocation3] sm:$0xff] %vm647_vm6, %v645_v44 }
 0x6c2   :  { %v820_v45 = vpop.permute.xlu1 %819 }
 0x6c3   :  { %823 = vst.msk [vmem:[#allocation3] sm:$0xff] %vm822_vm7, %v820_v45 }
 0x6ca   :  { %v1163_v46 = vpop.permute.xlu0 %1162  ;;  %v1514_v47 = vld [vmem:[#allocation3] sm:$0xff] }
 0x6cb   :  { %1165 = vst.msk [vmem:[#allocation3 + $0x8] sm:$0xff] %vm472_vm5, %v1163_v46  ;;  %1836 = vmatprep.mubr.msk.f32.mxu0 %vm39_vm0, %v1514_v47 }
 0x6ce   :  { %v1337_v48 = vpop.permute.xlu0 %1336 }
 0x6cf   :  { %1339 = vst.msk [vmem:[#allocation3 + $0x8] sm:$0xff] %vm647_vm6, %v1337_v48 }
 0x6d2   :  { %v1511_v49 = vpop.permute.xlu1 %1510 }
 0x6d3   :  { %1513 = vst.msk [vmem:[#allocation3 + $0x8] sm:$0xff] %vm822_vm7, %v1511_v49 }
 0x6da   :  { %v1515_v50 = vld [vmem:[#allocation3 + $0x8] sm:$0xff] }
 0x6db   :  { %1837 = vmatmul.mubr.msk.f32.vlgmr.msra.gmra.mxu0 %vm39_vm0, %v1515_v50 }
 0x79b   :  { %v1838_v52 = vpop.f32.mrf.mxu0 }
 0x79c   :  { %v1605_v53 = vadd.f32 %v1838_v52, %v1688_v51 }
 0x79d   :  { %v1599_v54 = vpop.f32.mrf.mxu0 }
 0x79e   :  { %v1600_v55 = vadd.f32 %v1688_v51, %v1599_v54  ;;  %v1611_v56 = vadd.f32 %v1605_v53, %v1969_v5 }
 0x7a0   :  { %v1615_v57 = vsel %vm39_vm0, %v1611_v56, 0.0  ;;  %v1610_v58 = vadd.f32 %v1600_v55, %v1956_v2 }
 0x7a1   :  { %1616 = vadd.xlane.f32.xlu1 %v1615_v57 }
 0x7a2   :  { %v1612_v59 = vsel %vm39_vm0, %v1610_v58, 0.0 }
 0x7a3   :  { %1613 = vadd.xlane.f32.xlu0 %v1612_v59 }
 0x82a   :  { %v1617_v60 = vpop.xlane.xlu1 %1616 }
 0x82b   :  { %v1620_v61 = vmul.f32 0.03125, %v1617_v60 }
 0x82c   :  { %v1614_v62 = vpop.xlane.xlu0 %1613 }
 0x82d   :  { %v1619_v63 = vmul.f32 0.03125, %v1614_v62  ;;  %v1622_v0 = vsub.f32 %v1611_v56, %v1620_v61 }
 0x82f   :  { %v1621_v1 = vsub.f32 %v1610_v58, %v1619_v63  ;;  %v1624_v12 = vmul.f32 %v1622_v0, %v1622_v0 }
 0x831   :  { %v1623_v3 = vmul.f32 %v1621_v1, %v1621_v1  ;;  %v1628_v5 = vsel %vm39_vm0, %v1624_v12, 0.0 }
 0x833   :  { %v1625_v4 = vsel %vm39_vm0, %v1623_v3, 0.0 }
 0x834   :  { %1626 = vadd.xlane.f32.xlu0 %v1625_v4 }
 0x838   :  { %1629 = vadd.xlane.f32.xlu0 %v1628_v5 }
 0x8bd   :  { %v1627_v7 = vpop.xlane.xlu0 %1626 }
 0x8be   :  { %v1631_v2 = vmul.f32 0.03125, %v1627_v7 }
 0x8c0   :  { %v1633_v30 = vadd.f32 1e-05, %v1631_v2 }
 0x8c1   :  { %v1630_v8 = vpop.xlane.xlu0 %1629 }
 0x8c2   :  { %1887 = vrsqrt.f32 %v1633_v30  ;;  %v1632_v9 = vmul.f32 0.03125, %v1630_v8 }
 0x8c4   :  { %v1634_v10 = vadd.f32 1e-05, %v1632_v9 }
 0x8c6   :  { %1889 = vrsqrt.f32 %v1634_v10 }
 0x8cf   :  { %v1888_v11 = vpop.eup %1887 }
 0x8d0   :  { %v1637_v14 = vmul.f32 %v1888_v11, %v1621_v1 }
 0x8d2   :  { %v1645_v16 = vmul.f32 %v1691_v13, %v1637_v14 }
 0x8d3   :  { %v1890_v17 = vpop.eup %1889 }
 0x8d4   :  { %v1653_v18 = vadd.f32 %v1692_v15, %v1645_v16  ;;  %v1638_v19 = vmul.f32 %v1890_v17, %v1622_v0 }
 0x8d6   :  { %1655 = vst.msk [vmem:[%s2199_s7] sm:$0xff] %vm39_vm0, %v1653_v18  ;;  %v1646_v20 = vmul.f32 %v1691_v13, %v1638_v19 }
 0x8d8   :  { %v1654_v21 = vadd.f32 %v1692_v15, %v1646_v20 }
 0x8da   :  { %1656 = vst.msk [vmem:[%s2199_s7 + $0x8] sm:$0xff] %vm39_vm0, %v1654_v21 }

// kernel: embedded_transformer_forward.23
= control target key start
LH: loop header
LB: loop body
LE: loop exit
PB: predicated region body
PF: predicated region fallthrough
CT: control target
= control target key end

     0   :  { %vm22_vm0 = vcmask 261120   ;;  %s261_s0 = inlined_call_operand.vmem [shape: f32[16,32], index: 0, kind: input, shape index: {}]   ;;  %s262_s3 = inlined_call_operand.vmem [shape: f32[32,128], index: 3, kind: input, shape index: {}]   ;;  %s263_s1 = inlined_call_operand.vmem [shape: f32[1,32], index: 1, kind: input, shape index: {}]   ;;  %s264_s2 = inlined_call_operand.vmem [shape: f32[1,32], index: 2, kind: input, shape index: {}]   ;;  %s265_s4 = inlined_call_operand.vmem [shape: f32[1,128], index: 4, kind: input, shape index: {}]   ;;  %s266_s5 = inlined_call_operand.vmem [shape: f32[16,128], index: 5, kind: output, shape index: {}]  }
   0x1   :  { %v20_v0 = vld [vmem:[%s261_s0] sm:$0xff]  ;;  %v21_v1 = vld [vmem:[%s261_s0 + $0x8] sm:$0xff]  ;;  %v71_v14 = vld [vmem:[%s262_s3 + $0x18] sm:$0xff] }
   0x2   :  { %v23_v2 = vsel %vm22_vm0, %v20_v0, 0.0  ;;  %v26_v3 = vsel %vm22_vm0, %v21_v1, 0.0  ;;  %v70_v15 = vld [vmem:[%s262_s3 + $0x10] sm:$0xff]  ;;  %177 = vmatprep.subr.mxu0 %v71_v14  ;;  %v69_v16 = vld [vmem:[%s262_s3 + $0x8] sm:$0xff]  ;;  %v68_v17 = vld [vmem:[%s262_s3] sm:$0xff] }
   0x3   :  { %24 = vadd.xlane.f32.xlu0 %v23_v2  ;;  %178 = vmatpush3.msra.mxu0 %v71_v14  ;;  %v166_v25 = vld [vmem:[%s263_s1] ss:$0 sm:$0xff] }
   0x4   :  { %179 = vmatprep.subr.mxu0 %v70_v15  ;;  %v167_v27 = vld [vmem:[%s264_s2] ss:$0 sm:$0xff] }
   0x5   :  { %180 = vmatpush3.msra.mxu0 %v70_v15  ;;  %v168_v34 = vld [vmem:[%s265_s4] ss:$0 sm:$0xff] }
   0x6   :  { %181 = vmatprep.subr.mxu0 %v69_v16 }
   0x7   :  { %27 = vadd.xlane.f32.xlu0 %v26_v3  ;;  %182 = vmatpush3.msra.mxu0 %v69_v16 }
   0x8   :  { %183 = vmatprep.subr.mxu0 %v68_v17 }
   0x9   :  { %184 = vmatpush3.msra.mxu0 %v68_v17 }
  0x8c   :  { %v25_v4 = vpop.xlane.xlu0 %24 }
  0x8d   :  { %v30_v5 = vmul.f32 0.03125, %v25_v4 }
  0x8f   :  { %v32_v6 = vsub.f32 %v20_v0, %v30_v5 }
  0x90   :  { %v28_v7 = vpop.xlane.xlu0 %27 }
  0x91   :  { %v31_v8 = vmul.f32 0.03125, %v28_v7  ;;  %v34_v9 = vmul.f32 %v32_v6, %v32_v6 }
  0x93   :  { %v33_v10 = vsub.f32 %v21_v1, %v31_v8  ;;  %v36_v11 = vsel %vm22_vm0, %v34_v9, 0.0 }
  0x94   :  { %37 = vadd.xlane.f32.xlu1 %v36_v11 }
  0x95   :  { %v35_v12 = vmul.f32 %v33_v10, %v33_v10 }
  0x97   :  { %v39_v13 = vsel %vm22_vm0, %v35_v12, 0.0 }
  0x98   :  { %40 = vadd.xlane.f32.xlu1 %v39_v13 }
 0x11d   :  { %v38_v18 = vpop.xlane.xlu1 %37 }
 0x11e   :  { %v42_v19 = vmul.f32 0.03125, %v38_v18 }
 0x120   :  { %v44_v20 = vadd.f32 1e-05, %v42_v19 }
 0x121   :  { %v41_v21 = vpop.xlane.xlu1 %40 }
 0x122   :  { %188 = vrsqrt.f32 %v44_v20  ;;  %v43_v22 = vmul.f32 0.03125, %v41_v21 }
 0x124   :  { %v45_v23 = vadd.f32 1e-05, %v43_v22 }
 0x126   :  { %190 = vrsqrt.f32 %v45_v23 }
 0x12f   :  { %v189_v24 = vpop.eup %188 }
 0x130   :  { %v48_v26 = vmul.f32 %v189_v24, %v32_v6 }
 0x132   :  { %v57_v28 = vmul.f32 %v166_v25, %v48_v26 }
 0x133   :  { %v191_v29 = vpop.eup %190 }
 0x134   :  { %v49_v30 = vmul.f32 %v191_v29, %v33_v10  ;;  %v66_v31 = vadd.f32 %v167_v27, %v57_v28 }
 0x136   :  { %v58_v32 = vmul.f32 %v166_v25, %v49_v30  ;;  %185 = vmatprep.mubr.msk.f32.mxu0 %vm22_vm0, %v66_v31 }
 0x138   :  { %v67_v33 = vadd.f32 %v167_v27, %v58_v32 }
 0x13a   :  { %186 = vmatmul.mubr.msk.f32.vlgmr.msra.gmra.mxu0 %vm22_vm0, %v67_v33 }
 0x1fa   :  { %v187_v35 = vpop.f32.mrf.mxu0 }
 0x1fb   :  { %v157_v36 = vadd.f32 %v187_v35, %v168_v34 }
 0x1fc   :  { %v151_v37 = vpop.f32.mrf.mxu0 }
 0x1fd   :  { %161 = vst [vmem:[%s266_s5 + $0x8] sm:$0xff] %v157_v36  ;;  %v152_v38 = vadd.f32 %v168_v34, %v151_v37 }
 0x1ff   :  { %160 = vst [vmem:[%s266_s5] sm:$0xff] %v152_v38 }

// kernel: embedded_transformer_forward.18
= control target key start
LH: loop header
LB: loop body
LE: loop exit
PB: predicated region body
PF: predicated region fallthrough
CT: control target
= control target key end

     0   :  { %v2170_v0 = vmov 0.0   ;;  %vm2171_vm0 = vmmov 0   ;;  %vm51_vm1 = vcmask 261120   ;;  %vm235_vm2 = vcmask 523264   ;;  %s2175_s20 = smov 88   ;;  %s2176_s21 = smov 80   ;;  %s2544_s2 = inlined_call_operand.vmem [shape: f32[32,32], index: 2, kind: input, shape index: {}]   ;;  %s2545_s4 = inlined_call_operand.vmem [shape: f32[32,64], index: 4, kind: input, shape index: {}]   ;;  %s2546_s0 = inlined_call_operand.vmem [shape: f32[16,32], index: 0, kind: input, shape index: {}]   ;;  %s2547_s1 = inlined_call_operand.vmem [shape: f32[24,32], index: 1, kind: input, shape index: {}]   ;;  %s2548_s5 = inlined_call_operand.vmem [shape: f32[1,64], index: 5, kind: input, shape index: {}]   ;;  %s2549_s3 = inlined_call_operand.vmem [shape: f32[1,32], index: 3, kind: input, shape index: {}]   ;;  %s2550_s6 = inlined_call_operand.vmem [shape: f32[32,32], index: 6, kind: input, shape index: {}]   ;;  %s2551_s7 = inlined_call_operand.vmem [shape: f32[1,32], index: 7, kind: input, shape index: {}]   ;;  %s2552_s8 = inlined_call_operand.vmem [shape: f32[1,32], index: 8, kind: input, shape index: {}]   ;;  %s2553_s9 = inlined_call_operand.vmem [shape: f32[1,32], index: 9, kind: input, shape index: {}]   ;;  %s2554_s10 = inlined_call_operand.vmem [shape: f32[16,32], index: 10, kind: output, shape index: {}]  }
   0x1   :  { %1982 = vmatprep.subr.mxu1 %v2170_v0  ;;  %v43_v1 = vld [vmem:[%s2544_s2 + $0x18] sm:$0xff]  ;;  %v42_v3 = vld [vmem:[%s2544_s2 + $0x10] sm:$0xff]  ;;  %1990 = vmatprep.mubr.msk.f32.mxu1 %vm2171_vm0, %v2170_v0  ;;  %v41_v5 = vld [vmem:[%s2544_s2 + $0x8] sm:$0xff]  ;;  %vm242_vm3 = vcmask 64512   ;;  %vm323_vm4 = vcmask 97280   ;;  %vm343_vm5 = vcmask 1043456  }
   0x2   :  { %v138_v2 = vld [vmem:[%s2545_s4 + $0x18] sm:$0xff]  ;;  %1971 = vmatprep.subr.mxu0 %v43_v1  ;;  %v137_v4 = vld [vmem:[%s2545_s4 + $0x10] sm:$0xff]  ;;  %v136_v6 = vld [vmem:[%s2545_s4 + $0x8] sm:$0xff]  ;;  %s2177_s22 = smov 104   ;;  %s2178_s23 = smov 72   ;;  %vm601_vm6 = vcmask 130112  }
   0x3   :  { %1983 = vmatpush3.msra.mxu1 %v138_v2  ;;  %1972 = vmatpush3.msra.mxu0 %v43_v1  ;;  %v40_v7 = vld [vmem:[%s2544_s2] sm:$0xff]  ;;  %v2275_v10 = vld [vmem:[%s2546_s0 + $0x8] sm:$0xff]  ;;  %v39_v13 = vld [vmem:[%s2547_s1 + $0x10] sm:$0xff]  ;;  %s2179_s24 = smov 8   ;;  %s2180_s25 = smov 16   ;;  %vm787_vm7 = vcmask 195712  }
   0x4   :  { %1984 = vmatprep.subr.mxu1 %v2170_v0  ;;  %1973 = vmatprep.subr.mxu0 %v42_v3  ;;  %v135_v8 = vld [vmem:[%s2545_s4] sm:$0xff]  ;;  %v38_v12 = vld [vmem:[%s2547_s1 + $0x8] sm:$0xff]  ;;  %s2181_s26 = smov 24   ;;  %vm973_vm8 = vcmask 261312  }
   0x5   :  { %1985 = vmatpush3.msra.mxu1 %v137_v4  ;;  %1974 = vmatpush3.msra.mxu0 %v42_v3  ;;  %v2269_v9 = vld [vmem:[%s2546_s0] sm:$0xff] }
   0x6   :  { %1986 = vmatprep.subr.mxu1 %v2170_v0  ;;  %1975 = vmatprep.subr.mxu0 %v41_v5  ;;  %v37_v11 = vld [vmem:[%s2547_s1] sm:$0xff]  ;;  %s2172_s1 = smov 120  }
   0x7   :  { %1987 = vmatpush3.msra.mxu1 %v136_v6  ;;  %1976 = vmatpush3.msra.mxu0 %v41_v5  ;;  %v1855_v14 = vld [vmem:[%s2548_s5] ss:$0 sm:$0xff]  ;;  %s2174_s5 = smov 96  }
   0x8   :  { %1988 = vmatprep.subr.mxu1 %v2170_v0  ;;  %1977 = vmatprep.subr.mxu0 %v40_v7  ;;  %v1852_v17 = vld [vmem:[%s2549_s3] ss:$0 sm:$0xff]  ;;  %s2173_s3 = smov 112  }
   0x9   :  { %1989 = vmatpush3.msra.mxu1 %v135_v8  ;;  %1978 = vmatpush3.msra.mxu0 %v40_v7 }
   0xa   :  { %1979 = vmatprep.mubr.msk.f32.mxu0 %vm51_vm1, %v2269_v9  ;;  %1991 = vmatmul.mubr.msk.f32.vlgmr.msra.gmra.mxu1 %vm51_vm1, %v37_v11 }
   0xb   :  { %1980 = vmatmul.mubr.msk.f32.vlgmr.msra.gmra.mxu0 %vm51_vm1, %v2275_v10  ;;  %1993 = vmatprep.mubr.msk.f32.mxu1 %vm2171_vm0, %v2170_v0 }
   0xc   :  { %1999 = vmatprep.subr.mxu0 %v2170_v0  ;;  %2003 = vmatprep.mubr.msk.f32.mxu0 %vm2171_vm0, %v2170_v0 }
   0xd   :  { %2013 = vmatprep.subr.mxu1 %v2170_v0 }
   0xe   :  { %1994 = vmatmul.mubr.msk.f32.gmra.mxu1 %vm51_vm1, %v38_v12 }
   0xf   :  { %1996 = vmatprep.mubr.msk.f32.mxu1 %vm2171_vm0, %v2170_v0 }
  0x12   :  { %1997 = vmatmul.mubr.msk.f32.gmra.mxu1 %vm51_vm1, %v39_v13 }
  0x13   :  { %2017 = vmatprep.mubr.msk.f32.mxu1 %vm2171_vm0, %v2170_v0 }
  0xca   :  { %v221_v15 = vpop.f32.mrf.mxu1 }
  0xcb   :  { %v1981_v16 = vpop.f32.mrf.mxu0  ;;  %v222_v18 = vadd.f32 %v1855_v14, %v221_v15 }
  0xcc   :  { %v130_v19 = vadd.f32 %v1981_v16, %v1852_v17  ;;  %v1992_v20 = vpop.f32.mrf.mxu1 }
  0xcd   :  { %v124_v21 = vpop.f32.mrf.mxu0  ;;  %236 = vst.msk [vmem:[#allocation3] sm:$0xff] %vm235_vm2, %v222_v18 }
  0xce   :  { %134 = vst.msk [vmem:[#allocation2 + $0x8] sm:$0xff] %vm51_vm1, %v130_v19  ;;  %v125_v22 = vadd.f32 %v1852_v17, %v124_v21  ;;  %v226_v23 = vpop.f32.mrf.mxu1 }
  0xcf   :  { %v227_v24 = vadd.f32 %v1855_v14, %v226_v23 }
  0xd0   :  { %133 = vst.msk [vmem:[#allocation2] sm:$0xff] %vm51_vm1, %v125_v22  ;;  %v1995_v25 = vpop.f32.mrf.mxu1 }
  0xd1   :  { %237 = vst.msk [vmem:[#allocation3 + $0x8] sm:$0xff] %vm235_vm2, %v227_v24 }
  0xd2   :  { %v231_v26 = vpop.f32.mrf.mxu1 }
  0xd3   :  { %v232_v27 = vadd.f32 %v1855_v14, %v231_v26 }
  0xd4   :  { %v1998_v28 = vpop.f32.mrf.mxu1  ;;  %v2322_v33 = vld [vmem:[#allocation3] sm:$0xff] }
  0xd5   :  { %238 = vst.msk [vmem:[#allocation3 + $0x10] sm:$0xff] %vm235_vm2, %v232_v27 }
  0xd7   :  { %v2314_v29 = vld [vmem:[#allocation2] sm:$0xff] }
  0xd8   :  { %421 = vrot.lane.b32.xlu1 %v2314_v29, %s2172_s1  ;;  %v419_v30 = vld [vmem:[#allocation3 + $0x8] sm:$0xf] }
  0xd9   :  { %v241_v31 = vld [vmem:[#allocation3 + $0x8] sm:$0xf]  ;;  %427 = vrot.lane.b32.xlu0 %v419_v30, %s2172_s1 }
  0xda   :  { %2000 = vmatpush3.xpose.msk.msra.mxu0 %vm242_vm3, %v241_v31  ;;  %v605_v32 = vld [vmem:[#allocation3 + $0x8] sm:$0xf] }
  0xdb   :  { %2001 = vmatprep.subr.mxu0 %v2170_v0  ;;  %v791_v6 = vld [vmem:[#allocation3 + $0x8] sm:$0xf] }
  0xdc   :  { %613 = vrot.lane.b32.xlu1 %v605_v32, %s2173_s3 }
  0xdd   :  { %425 = vrot.lane.b32.xlu0 %v2322_v33, %s2172_s1 }
  0xde   :  { %2002 = vmatpush3.xpose.msk.msra.mxu0 %vm242_vm3, %v2322_v33 }
  0xdf   :  { %2006 = vmatprep.subr.mxu0 %v2170_v0 }
  0xe0   :  { %607 = vrot.lane.b32.xlu1 %v2314_v29, %s2173_s3 }
  0xe1   :  { %2004 = vmatmul.mubr.msk.f32.vlgmr.msra.gmra.mxu0 %vm242_vm3, %v2314_v29  ;;  %611 = vrot.lane.b32.xlu0 %v2322_v33, %s2173_s3 }
  0xe2   :  { %2010 = vmatprep.mubr.msk.f32.mxu0 %vm2171_vm0, %v2170_v0 }
 0x14a   :  { %v422_v35 = vpop.permute.xlu1 %421 }
 0x14b   :  { %v428_v34 = vpop.permute.xlu0 %427 }
 0x14c   :  { %2014 = vmatpush3.xpose.msk.msra.mxu1 %vm242_vm3, %v428_v34 }
 0x14d   :  { %2015 = vmatprep.subr.mxu1 %v2170_v0 }
 0x14e   :  { %v614_v37 = vpop.permute.xlu1 %613 }
 0x14f   :  { %v426_v36 = vpop.permute.xlu0 %425 }
 0x150   :  { %2016 = vmatpush3.xpose.msk.msra.mxu1 %vm242_vm3, %v426_v36 }
 0x151   :  { %2027 = vmatprep.subr.mxu1 %v2170_v0 }
 0x152   :  { %v608_v39 = vpop.permute.xlu1 %607 }
 0x153   :  { %2018 = vmatmul.mubr.msk.f32.vlgmr.msra.gmra.mxu1 %vm242_vm3, %v422_v35  ;;  %v612_v38 = vpop.permute.xlu0 %611 }
 0x154   :  { %2028 = vmatpush3.xpose.msk.msra.mxu1 %vm242_vm3, %v614_v37  ;;  %2031 = vmatprep.mubr.msk.f32.mxu1 %vm2171_vm0, %v2170_v0 }
 0x155   :  { %2029 = vmatprep.subr.mxu1 %v2170_v0 }
 0x158   :  { %2030 = vmatpush3.xpose.msk.msra.mxu1 %vm242_vm3, %v612_v38 }
 0x159   :  { %2048 = vmatprep.subr.mxu1 %v2170_v0 }
 0x15b   :  { %2032 = vmatmul.mubr.msk.f32.vlgmr.msra.gmra.mxu1 %vm242_vm3, %v608_v39 }
 0x15c   :  { %2052 = vmatprep.mubr.msk.f32.mxu1 %vm2171_vm0, %v2170_v0 }
 0x1a1   :  { %v318_v40 = vpop.f32.mrf.mxu0 }
 0x1a2   :  { %v322_v41 = vmul.f32 0.35355338, %v318_v40 }
 0x1a3   :  { %v2005_v42 = vpop.f32.mrf.mxu0 }
 0x1a4   :  { %v324_v43 = vsel %vm323_vm4, %v322_v41, -inf }
 0x1a5   :  { %325 = vmax.xlane.f32.xlu0 %v324_v43 }
 0x213   :  { %v501_v44 = vpop.f32.mrf.mxu1 }
 0x214   :  { %v505_v45 = vmul.f32 0.35355338, %v501_v44 }
 0x215   :  { %v2019_v46 = vpop.f32.mrf.mxu1 }
 0x216   :  { %v506_v47 = vsel %vm323_vm4, %v505_v45, -inf  ;;  %v2414_v46 = vld [vmem:[#allocation3 + $0xc] sm:$0xff] }
 0x217   :  { %507 = vmax.xlane.f32.xlu1 %v506_v47  ;;  %v2419_v47 = vld [vmem:[#allocation2 + $0x8] sm:$0xff] }
 0x21b   :  { %v687_v48 = vpop.f32.mrf.mxu1 }
 0x21c   :  { %v691_v49 = vmul.f32 0.35355338, %v687_v48 }
 0x21d   :  { %v2033_v50 = vpop.f32.mrf.mxu1 }
 0x21e   :  { %v692_v51 = vsel %vm323_vm4, %v691_v49, -inf }
 0x21f   :  { %693 = vmax.xlane.f32.xlu0 %v692_v51 }
 0x228   :  { %337 = vrot.lane.b32.xlu1 %v241_v31, %s2174_s5 }
 0x22c   :  { %519 = vrot.lane.b32.xlu1 %v419_v30, %s2175_s20 }
 0x22e   :  { %v326_v52 = vpop.xlane.xlu0 %325 }
 0x22f   :  { %v327_v53 = vsub.f32 %v322_v41, %v326_v52 }
 0x230   :  { %517 = vrot.lane.b32.xlu1 %v2322_v33, %s2175_s20 }
 0x231   :  { %v328_v54 = vmul.f32 1.442695, %v327_v53 }
 0x233   :  { %2134 = vpow2.f32 %v328_v54  ;;  %v1152_v54 = vld [vmem:[#allocation3 + $0x14] sm:$0xf] }
 0x234   :  { %703 = vrot.lane.b32.xlu1 %v2322_v33, %s2176_s21 }
 0x235   :  { %335 = vrot.lane.b32.xlu0 %v2322_v33, %s2174_s5 }
 0x240   :  { %v2135_v55 = vpop.eup %2134 }
 0x241   :  { %v330_v56 = vsel %vm323_vm4, %v2135_v55, 0.0 }
 0x254   :  { %331 = vadd.xlane.f32.xlu0 %v330_v56 }
 0x26a   :  { %705 = vrot.lane.b32.xlu0 %v605_v32, %s2176_s21 }
 0x2a0   :  { %v508_v57 = vpop.xlane.xlu1 %507 }
 0x2a1   :  { %v509_v58 = vsub.f32 %v505_v45, %v508_v57  ;;  %v977_v45 = vld [vmem:[#allocation3 + $0x14] sm:$0xf] }
 0x2a3   :  { %v510_v59 = vmul.f32 1.442695, %v509_v58 }
 0x2a4   :  { %v338_v60 = vpop.permute.xlu1 %337 }
 0x2a5   :  { %2136 = vpow2.f32 %v510_v59  ;;  %2007 = vmatpush3.msk.msra.mxu0 %vm343_vm5, %v338_v60 }
 0x2a6   :  { %2008 = vmatprep.subr.mxu0 %v2170_v0 }
 0x2a8   :  { %v694_v61 = vpop.xlane.xlu0 %693  ;;  %v520_v8 = vpop.permute.xlu1 %519 }
 0x2a9   :  { %v695_v62 = vsub.f32 %v691_v49, %v694_v61 }
 0x2ab   :  { %v696_v63 = vmul.f32 1.442695, %v695_v62 }
 0x2ac   :  { %v336_v1 = vpop.permute.xlu0 %335  ;;  %v518_v13 = vpop.permute.xlu1 %517 }
 0x2ad   :  { %2138 = vpow2.f32 %v696_v63  ;;  %2009 = vmatpush3.msra.mxu0 %v336_v1 }
 0x2ae   :  { %2020 = vmatprep.subr.mxu0 %v2170_v0 }
 0x2b0   :  { %v704_v14 = vpop.permute.xlu1 %703 }
 0x2b2   :  { %v2137_v2 = vpop.eup %2136 }
 0x2b3   :  { %v512_v3 = vsel %vm323_vm4, %v2137_v2, 0.0 }
 0x2b4   :  { %513 = vadd.xlane.f32.xlu1 %v512_v3 }
 0x2ba   :  { %v2139_v4 = vpop.eup %2138 }
 0x2bb   :  { %v698_v5 = vsel %vm323_vm4, %v2139_v4, 0.0 }
 0x2bc   :  { %699 = vadd.xlane.f32.xlu0 %v698_v5 }
 0x2c5   :  { %797 = vrot.lane.b32.xlu1 %v2322_v33, %s2177_s22 }
 0x2d2   :  { %799 = vrot.lane.b32.xlu0 %v791_v6, %s2177_s22 }
 0x2d6   :  { %793 = vrot.lane.b32.xlu0 %v2314_v29, %s2177_s22 }
 0x2dd   :  { %v332_v7 = vpop.xlane.xlu0 %331 }
 0x2de   :  { %2140 = vrcp.f32 %v332_v7 }
 0x2e1   :  { %v706_v16 = vpop.permute.xlu0 %705 }
 0x2eb   :  { %v2141_v11 = vpop.eup %2140 }
 0x2ec   :  { %v334_v12 = vmul.f32 %v2141_v11, %v2135_v55 }
 0x2ee   :  { %2011 = vmatmul.mubr.msk.f32.vlgmr.msra.gmra.mxu0 %vm323_vm4, %v334_v12 }
 0x2ef   :  { %2021 = vmatpush3.msk.msra.mxu0 %vm343_vm5, %v520_v8  ;;  %2024 = vmatprep.mubr.msk.f32.mxu0 %vm2171_vm0, %v2170_v0 }
 0x2f0   :  { %2022 = vmatprep.subr.mxu0 %v2170_v0 }
 0x2f1   :  { %2023 = vmatpush3.msra.mxu0 %v518_v13  ;;  %v1337_v13 = vld [vmem:[#allocation3 + $0x14] sm:$0xf] }
 0x2f2   :  { %2034 = vmatprep.subr.mxu0 %v2170_v0 }
 0x33d   :  { %v514_v15 = vpop.xlane.xlu1 %513 }
 0x33e   :  { %2142 = vrcp.f32 %v514_v15 }
 0x341   :  { %v798_v23 = vpop.permute.xlu1 %797 }
 0x345   :  { %v700_v17 = vpop.xlane.xlu0 %699 }
 0x346   :  { %2144 = vrcp.f32 %v700_v17 }
 0x349   :  { %v800_v22 = vpop.permute.xlu0 %799 }
 0x34b   :  { %v2143_v18 = vpop.eup %2142 }
 0x34c   :  { %v516_v19 = vmul.f32 %v2143_v18, %v2137_v2 }
 0x34d   :  { %v794_v24 = vpop.permute.xlu0 %793 }
 0x34e   :  { %2025 = vmatmul.mubr.msk.f32.vlgmr.msra.gmra.mxu0 %vm323_vm4, %v516_v19 }
 0x34f   :  { %2035 = vmatpush3.msk.msra.mxu0 %vm343_vm5, %v706_v16  ;;  %2038 = vmatprep.mubr.msk.f32.mxu0 %vm2171_vm0, %v2170_v0 }
 0x350   :  { %2036 = vmatprep.subr.mxu0 %v2170_v0 }
 0x351   :  { %2037 = vmatpush3.msra.mxu0 %v704_v14 }
 0x352   :  { %2041 = vmatprep.subr.mxu0 %v2170_v0 }
 0x353   :  { %v2145_v20 = vpop.eup %2144 }
 0x354   :  { %v702_v21 = vmul.f32 %v2145_v20, %v2139_v4 }
 0x356   :  { %2039 = vmatmul.mubr.msk.f32.vlgmr.msra.gmra.mxu0 %vm323_vm4, %v702_v21 }
 0x357   :  { %2042 = vmatpush3.xpose.msk.msra.mxu0 %vm242_vm3, %v800_v22  ;;  %2045 = vmatprep.mubr.msk.f32.mxu0 %vm2171_vm0, %v2170_v0 }
 0x358   :  { %2043 = vmatprep.subr.mxu0 %v2170_v0 }
 0x35b   :  { %2044 = vmatpush3.xpose.msk.msra.mxu0 %vm242_vm3, %v798_v23 }
 0x35c   :  { %2062 = vmatprep.subr.mxu0 %v2170_v0 }
 0x35e   :  { %2046 = vmatmul.mubr.msk.f32.vlgmr.msra.gmra.mxu0 %vm242_vm3, %v794_v24 }
 0x35f   :  { %2066 = vmatprep.mubr.msk.f32.mxu0 %vm2171_vm0, %v2170_v0 }
 0x3ae   :  { %v412_v25 = vpop.f32.mrf.mxu0 }
 0x3af   :  { %416 = vst.msk [vmem:[#allocation4] sm:$0xff] %vm242_vm3, %v412_v25 }
 0x3b0   :  { %v2012_v26 = vpop.f32.mrf.mxu0 }
 0x40e   :  { %v2397_v27 = vpop.f32.mrf.mxu0 }
 0x410   :  { %v2026_v28 = vpop.f32.mrf.mxu0 }
 0x416   :  { %v2399_v29 = vpop.f32.mrf.mxu0 }
 0x418   :  { %v2040_v30 = vpop.f32.mrf.mxu0 }
 0x41e   :  { %v873_v31 = vpop.f32.mrf.mxu0 }
 0x41f   :  { %v877_v32 = vmul.f32 0.35355338, %v873_v31 }
 0x420   :  { %v2047_v34 = vpop.f32.mrf.mxu0 }
 0x421   :  { %v878_v35 = vsel %vm323_vm4, %v877_v32, -inf }
 0x422   :  { %879 = vmax.xlane.f32.xlu1 %v878_v35 }
 0x433   :  { %889 = vrot.lane.b32.xlu1 %v2322_v33, %s2178_s23 }
 0x4ab   :  { %v880_v36 = vpop.xlane.xlu1 %879 }
 0x4ac   :  { %v881_v37 = vsub.f32 %v877_v32, %v880_v36  ;;  %v1522_v36 = vld [vmem:[#allocation3 + $0x14] sm:$0xf] }
 0x4ae   :  { %v882_v38 = vmul.f32 1.442695, %v881_v37 }
 0x4af   :  { %v890_v43 = vpop.permute.xlu1 %889 }
 0x4b0   :  { %2146 = vpow2.f32 %v882_v38 }
 0x4bd   :  { %v2147_v39 = vpop.eup %2146 }
 0x4be   :  { %v884_v40 = vsel %vm323_vm4, %v2147_v39, 0.0 }
 0x4bf   :  { %885 = vadd.xlane.f32.xlu0 %v884_v40 }
 0x4d5   :  { %891 = vrot.lane.b32.xlu0 %v791_v6, %s2178_s23 }
 0x548   :  { %v886_v41 = vpop.xlane.xlu0 %885 }
 0x549   :  { %2148 = vrcp.f32 %v886_v41 }
 0x54c   :  { %v892_v42 = vpop.permute.xlu0 %891 }
 0x54d   :  { %2049 = vmatpush3.msk.msra.mxu1 %vm343_vm5, %v892_v42 }
 0x54e   :  { %2050 = vmatprep.subr.mxu1 %v2170_v0 }
 0x54f   :  { %2051 = vmatpush3.msra.mxu1 %v890_v43 }
 0x550   :  { %2055 = vmatprep.subr.mxu1 %v2170_v0 }
 0x556   :  { %v2149_v33 = vpop.eup %2148 }
 0x557   :  { %v888_v44 = vmul.f32 %v2149_v33, %v2147_v39 }
 0x559   :  { %2053 = vmatmul.mubr.msk.f32.vlgmr.msra.gmra.mxu1 %vm323_vm4, %v888_v44 }
 0x55a   :  { %2056 = vmatpush3.xpose.msk.msra.mxu1 %vm242_vm3, %v977_v45  ;;  %2059 = vmatprep.mubr.msk.f32.mxu1 %vm2171_vm0, %v2170_v0 }
 0x55b   :  { %2057 = vmatprep.subr.mxu1 %v2170_v0 }
 0x55e   :  { %2058 = vmatpush3.xpose.msk.msra.mxu1 %vm242_vm3, %v2414_v46 }
 0x55f   :  { %2076 = vmatprep.subr.mxu1 %v2170_v0 }
 0x561   :  { %2060 = vmatmul.mubr.msk.f32.vlgmr.msra.gmra.mxu1 %vm242_vm3, %v2419_v47 }
 0x562   :  { %2080 = vmatprep.mubr.msk.f32.mxu1 %vm2171_vm0, %v2170_v0 }
 0x619   :  { %v2425_v48 = vpop.f32.mrf.mxu1 }
 0x61b   :  { %v2054_v49 = vpop.f32.mrf.mxu1 }
 0x621   :  { %v1053_v50 = vpop.f32.mrf.mxu1 }
 0x622   :  { %v1057_v51 = vmul.f32 0.35355338, %v1053_v50 }
 0x623   :  { %v2061_v52 = vpop.f32.mrf.mxu1 }
 0x624   :  { %v1058_v53 = vsel %vm323_vm4, %v1057_v51, -inf }
 0x625   :  { %1059 = vmax.xlane.f32.xlu1 %v1058_v53 }
 0x636   :  { %1069 = vrot.lane.b32.xlu1 %v2414_v46, %s2174_s5 }
 0x63a   :  { %1160 = vrot.lane.b32.xlu1 %v1152_v54, %s2172_s1 }
 0x63e   :  { %1154 = vrot.lane.b32.xlu1 %v2419_v47, %s2172_s1 }
 0x642   :  { %1250 = vrot.lane.b32.xlu1 %v2414_v46, %s2175_s20 }
 0x6ae   :  { %v1060_v55 = vpop.xlane.xlu1 %1059 }
 0x6af   :  { %v1061_v56 = vsub.f32 %v1057_v51, %v1060_v55 }
 0x6b1   :  { %v1062_v57 = vmul.f32 1.442695, %v1061_v56 }
 0x6b2   :  { %v1070_v62 = vpop.permute.xlu1 %1069 }
 0x6b3   :  { %2150 = vpow2.f32 %v1062_v57 }
 0x6b6   :  { %v1161_v2 = vpop.permute.xlu1 %1160 }
 0x6ba   :  { %v1155_v4 = vpop.permute.xlu1 %1154 }
 0x6be   :  { %v1251_v18 = vpop.permute.xlu1 %1250 }
 0x6c0   :  { %v2151_v58 = vpop.eup %2150 }
 0x6c1   :  { %v1064_v59 = vsel %vm323_vm4, %v2151_v58, 0.0 }
 0x6c2   :  { %1065 = vadd.xlane.f32.xlu0 %v1064_v59 }
 0x6d8   :  { %1071 = vrot.lane.b32.xlu0 %v977_v45, %s2174_s5 }
 0x6dc   :  { %1158 = vrot.lane.b32.xlu0 %v2414_v46, %s2172_s1 }
 0x74b   :  { %v1066_v60 = vpop.xlane.xlu0 %1065 }
 0x74c   :  { %2152 = vrcp.f32 %v1066_v60 }
 0x74f   :  { %v1072_v61 = vpop.permute.xlu0 %1071 }
 0x750   :  { %2063 = vmatpush3.msk.msra.mxu0 %vm343_vm5, %v1072_v61 }
 0x751   :  { %2064 = vmatprep.subr.mxu0 %v2170_v0 }
 0x752   :  { %2065 = vmatpush3.msra.mxu0 %v1070_v62 }
 0x753   :  { %2069 = vmatprep.subr.mxu0 %v2170_v0  ;;  %v1159_v3 = vpop.permute.xlu0 %1158 }
 0x759   :  { %v2153_v63 = vpop.eup %2152 }
 0x75a   :  { %v1068_v1 = vmul.f32 %v2153_v63, %v2151_v58 }
 0x75c   :  { %2067 = vmatmul.mubr.msk.f32.vlgmr.msra.gmra.mxu0 %vm323_vm4, %v1068_v1 }
 0x75d   :  { %2070 = vmatpush3.xpose.msk.msra.mxu0 %vm242_vm3, %v1161_v2  ;;  %2073 = vmatprep.mubr.msk.f32.mxu0 %vm2171_vm0, %v2170_v0 }
 0x75e   :  { %2071 = vmatprep.subr.mxu0 %v2170_v0 }
 0x761   :  { %2072 = vmatpush3.xpose.msk.msra.mxu0 %vm242_vm3, %v1159_v3 }
 0x762   :  { %2090 = vmatprep.subr.mxu0 %v2170_v0 }
 0x764   :  { %2074 = vmatmul.mubr.msk.f32.vlgmr.msra.gmra.mxu0 %vm242_vm3, %v1155_v4 }
 0x765   :  { %2094 = vmatprep.mubr.msk.f32.mxu0 %vm2171_vm0, %v2170_v0 }
 0x81c   :  { %v1145_v5 = vpop.f32.mrf.mxu0 }
 0x81d   :  { %1149 = vst.msk [vmem:[#allocation4 + $0x8] sm:$0xff] %vm242_vm3, %v1145_v5 }
 0x81e   :  { %v2068_v6 = vpop.f32.mrf.mxu0 }
 0x824   :  { %v1234_v7 = vpop.f32.mrf.mxu0 }
 0x825   :  { %v1238_v8 = vmul.f32 0.35355338, %v1234_v7  ;;  %v1708_v7 = vld [vmem:[%s2550_s6 + $0x8] sm:$0xff] }
 0x826   :  { %v2075_v11 = vpop.f32.mrf.mxu0 }
 0x827   :  { %v1239_v12 = vsel %vm323_vm4, %v1238_v8, -inf }
 0x828   :  { %1240 = vmax.xlane.f32.xlu0 %v1239_v12 }
 0x83e   :  { %1252 = vrot.lane.b32.xlu0 %v1152_v54, %s2175_s20 }
 0x842   :  { %1345 = vrot.lane.b32.xlu0 %v1337_v13, %s2173_s3 }
 0x846   :  { %1339 = vrot.lane.b32.xlu0 %v2419_v47, %s2173_s3 }
 0x8b1   :  { %v1241_v14 = vpop.xlane.xlu0 %1240 }
 0x8b2   :  { %v1242_v15 = vsub.f32 %v1238_v8, %v1241_v14  ;;  %v1707_v8 = vld [vmem:[%s2550_s6] sm:$0xff] }
 0x8b4   :  { %v1243_v16 = vmul.f32 1.442695, %v1242_v15  ;;  %v1899_v15 = vld [vmem:[%s2551_s7] ss:$0 sm:$0xff] }
 0x8b5   :  { %v1253_v17 = vpop.permute.xlu0 %1252 }
 0x8b6   :  { %2154 = vpow2.f32 %v1243_v16  ;;  %2077 = vmatpush3.msk.msra.mxu1 %vm343_vm5, %v1253_v17 }
 0x8b7   :  { %2078 = vmatprep.subr.mxu1 %v2170_v0 }
 0x8b8   :  { %2079 = vmatpush3.msra.mxu1 %v1251_v18 }
 0x8b9   :  { %2083 = vmatprep.subr.mxu1 %v2170_v0  ;;  %v1346_v24 = vpop.permute.xlu0 %1345 }
 0x8bd   :  { %v1340_v26 = vpop.permute.xlu0 %1339 }
 0x8c3   :  { %v2155_v19 = vpop.eup %2154 }
 0x8c4   :  { %v1245_v20 = vsel %vm323_vm4, %v2155_v19, 0.0 }
 0x8c5   :  { %1246 = vadd.xlane.f32.xlu1 %v1245_v20 }
 0x8d6   :  { %1343 = vrot.lane.b32.xlu1 %v2414_v46, %s2173_s3 }
 0x94e   :  { %v1247_v21 = vpop.xlane.xlu1 %1246 }
 0x94f   :  { %2156 = vrcp.f32 %v1247_v21 }
 0x952   :  { %v1344_v25 = vpop.permute.xlu1 %1343 }
 0x95c   :  { %v2157_v22 = vpop.eup %2156 }
 0x95d   :  { %v1249_v23 = vmul.f32 %v2157_v22, %v2155_v19 }
 0x95f   :  { %2081 = vmatmul.mubr.msk.f32.vlgmr.msra.gmra.mxu1 %vm323_vm4, %v1249_v23 }
 0x960   :  { %2084 = vmatpush3.xpose.msk.msra.mxu1 %vm242_vm3, %v1346_v24  ;;  %2087 = vmatprep.mubr.msk.f32.mxu1 %vm2171_vm0, %v2170_v0 }
 0x961   :  { %2085 = vmatprep.subr.mxu1 %v2170_v0 }
 0x964   :  { %2086 = vmatpush3.xpose.msk.msra.mxu1 %vm242_vm3, %v1344_v25 }
 0x965   :  { %2104 = vmatprep.subr.mxu1 %v2170_v0 }
 0x967   :  { %2088 = vmatmul.mubr.msk.f32.vlgmr.msra.gmra.mxu1 %vm242_vm3, %v1340_v26 }
 0x968   :  { %2108 = vmatprep.mubr.msk.f32.mxu1 %vm2171_vm0, %v2170_v0 }
 0xa1f   :  { %v1326_v28 = vpop.f32.mrf.mxu1 }
 0xa21   :  { %v2082_v30 = vpop.f32.mrf.mxu1 }
 0xa27   :  { %v1419_v31 = vpop.f32.mrf.mxu1 }
 0xa28   :  { %v1423_v32 = vmul.f32 0.35355338, %v1419_v31 }
 0xa29   :  { %v2089_v34 = vpop.f32.mrf.mxu1 }
 0xa2a   :  { %v1424_v35 = vsel %vm323_vm4, %v1423_v32, -inf }
 0xa2b   :  { %1425 = vmax.xlane.f32.xlu1 %v1424_v35 }
 0xa3c   :  { %1435 = vrot.lane.b32.xlu1 %v2414_v46, %s2176_s21 }
 0xa40   :  { %1530 = vrot.lane.b32.xlu1 %v1522_v36, %s2177_s22 }
 0xa44   :  { %1524 = vrot.lane.b32.xlu1 %v2419_v47, %s2177_s22 }
 0xab4   :  { %v1426_v37 = vpop.xlane.xlu1 %1425 }
 0xab5   :  { %v1427_v38 = vsub.f32 %v1423_v32, %v1426_v37 }
 0xab7   :  { %v1428_v39 = vmul.f32 1.442695, %v1427_v38 }
 0xab8   :  { %v1436_v33 = vpop.permute.xlu1 %1435 }
 0xab9   :  { %2158 = vpow2.f32 %v1428_v39 }
 0xabc   :  { %v1531_v47 = vpop.permute.xlu1 %1530 }
 0xac0   :  { %v1525_v50 = vpop.permute.xlu1 %1524 }
 0xac6   :  { %v2159_v40 = vpop.eup %2158 }
 0xac7   :  { %v1430_v41 = vsel %vm323_vm4, %v2159_v40, 0.0 }
 0xac8   :  { %1431 = vadd.xlane.f32.xlu0 %v1430_v41 }
 0xade   :  { %1437 = vrot.lane.b32.xlu0 %v1337_v13, %s2176_s21 }
 0xae2   :  { %1528 = vrot.lane.b32.xlu0 %v2414_v46, %s2177_s22 }
 0xb51   :  { %v1432_v42 = vpop.xlane.xlu0 %1431 }
 0xb52   :  { %2160 = vrcp.f32 %v1432_v42  ;;  %v1902_v42 = vld [vmem:[%s2552_s8] ss:$0 sm:$0xff] }
 0xb55   :  { %v1438_v43 = vpop.permute.xlu0 %1437 }
 0xb56   :  { %2091 = vmatpush3.msk.msra.mxu0 %vm343_vm5, %v1438_v43 }
 0xb57   :  { %2092 = vmatprep.subr.mxu0 %v2170_v0 }
 0xb58   :  { %2093 = vmatpush3.msra.mxu0 %v1436_v33  ;;  %v1903_v33 = vld [vmem:[%s2553_s9] ss:$0 sm:$0xff] }
 0xb59   :  { %2097 = vmatprep.subr.mxu0 %v2170_v0  ;;  %v1529_v49 = vpop.permute.xlu0 %1528 }
 0xb5f   :  { %v2161_v44 = vpop.eup %2160 }
 0xb60   :  { %v1434_v45 = vmul.f32 %v2161_v44, %v2159_v40 }
 0xb62   :  { %2095 = vmatmul.mubr.msk.f32.vlgmr.msra.gmra.mxu0 %vm323_vm4, %v1434_v45 }
 0xb63   :  { %2098 = vmatpush3.xpose.msk.msra.mxu0 %vm242_vm3, %v1531_v47  ;;  %2101 = vmatprep.mubr.msk.f32.mxu0 %vm2171_vm0, %v2170_v0 }
 0xb64   :  { %2099 = vmatprep.subr.mxu0 %v2170_v0 }
 0xb67   :  { %2100 = vmatpush3.xpose.msk.msra.mxu0 %vm242_vm3, %v1529_v49 }
 0xb6a   :  { %2102 = vmatmul.mubr.msk.f32.vlgmr.msra.gmra.mxu0 %vm242_vm3, %v1525_v50 }
 0xc22   :  { %v1511_v51 = vpop.f32.mrf.mxu0 }
 0xc24   :  { %v2096_v52 = vpop.f32.mrf.mxu0 }
 0xc2a   :  { %v1604_v53 = vpop.f32.mrf.mxu0 }
 0xc2b   :  { %v1608_v54 = vmul.f32 0.35355338, %v1604_v53 }
 0xc2c   :  { %v2103_v55 = vpop.f32.mrf.mxu0 }
 0xc2d   :  { %v1609_v56 = vsel %vm323_vm4, %v1608_v54, -inf }
 0xc2e   :  { %1610 = vmax.xlane.f32.xlu0 %v1609_v56 }
 0xc44   :  { %1622 = vrot.lane.b32.xlu0 %v1522_v36, %s2178_s23 }
 0xc48   :  { %598 = vrot.lane.b32.xlu0 %v2397_v27, %s2179_s24 }
 0xc4c   :  { %1331 = vrot.lane.b32.xlu0 %v1326_v28, %s2179_s24 }
 0xc50   :  { %1516 = vrot.lane.b32.xlu0 %v1511_v51, %s2180_s25 }
 0xcb7   :  { %v1611_v57 = vpop.xlane.xlu0 %1610 }
 0xcb8   :  { %v1612_v58 = vsub.f32 %v1608_v54, %v1611_v57 }
 0xcba   :  { %v1613_v59 = vmul.f32 1.442695, %v1612_v58 }
 0xcbb   :  { %v1623_v60 = vpop.permute.xlu0 %1622 }
 0xcbc   :  { %2162 = vpow2.f32 %v1613_v59  ;;  %2105 = vmatpush3.msk.msra.mxu1 %vm343_vm5, %v1623_v60 }
 0xcbd   :  { %2106 = vmatprep.subr.mxu1 %v2170_v0 }
 0xcbf   :  { %v599_v61 = vpop.permute.xlu0 %598 }
 0xcc0   :  { %602 = vst.msk [vmem:[#allocation4] sm:$0xff] %vm601_vm6, %v599_v61 }
 0xcc3   :  { %v1332_v62 = vpop.permute.xlu0 %1331 }
 0xcc4   :  { %1334 = vst.msk [vmem:[#allocation4 + $0x8] sm:$0xff] %vm601_vm6, %v1332_v62 }
 0xcc7   :  { %v1517_v63 = vpop.permute.xlu0 %1516 }
 0xcc8   :  { %1519 = vst.msk [vmem:[#allocation4 + $0x8] sm:$0xff] %vm787_vm7, %v1517_v63 }
 0xcc9   :  { %v2163_v27 = vpop.eup %2162 }
 0xcca   :  { %v1615_v1 = vsel %vm323_vm4, %v2163_v27, 0.0 }
 0xccb   :  { %1616 = vadd.xlane.f32.xlu1 %v1615_v1 }
 0xcdc   :  { %1620 = vrot.lane.b32.xlu1 %v2414_v46, %s2178_s23 }
 0xce0   :  { %784 = vrot.lane.b32.xlu1 %v2399_v29, %s2180_s25  ;;  %v1710_v29 = vld [vmem:[%s2550_s6 + $0x18] sm:$0xff] }
 0xce4   :  { %970 = vrot.lane.b32.xlu1 %v2425_v48, %s2181_s26  ;;  %v1709_v48 = vld [vmem:[%s2550_s6 + $0x10] sm:$0xff] }
 0xd54   :  { %v1617_v0 = vpop.xlane.xlu1 %1616 }
 0xd55   :  { %2164 = vrcp.f32 %v1617_v0 }
 0xd58   :  { %v1621_v2 = vpop.permute.xlu1 %1620 }
 0xd59   :  { %2107 = vmatpush3.msra.mxu1 %v1621_v2 }
 0xd5a   :  { %2111 = vmatprep.subr.mxu1 %v1710_v29 }
 0xd5c   :  { %v785_v3 = vpop.permute.xlu1 %784 }
 0xd5d   :  { %788 = vst.msk [vmem:[#allocation4] sm:$0xff] %vm787_vm7, %v785_v3 }
 0xd60   :  { %v971_v4 = vpop.permute.xlu1 %970 }
 0xd61   :  { %974 = vst.msk [vmem:[#allocation4] sm:$0xff] %vm973_vm8, %v971_v4 }
 0xd62   :  { %v2165_v5 = vpop.eup %2164 }
 0xd63   :  { %v1619_v6 = vmul.f32 %v2165_v5, %v2163_v27 }
 0xd65   :  { %2109 = vmatmul.mubr.msk.f32.vlgmr.msra.gmra.mxu1 %vm323_vm4, %v1619_v6 }
 0xd66   :  { %2112 = vmatpush3.msra.mxu1 %v1710_v29 }
 0xd67   :  { %2113 = vmatprep.subr.mxu1 %v1709_v48 }
 0xd68   :  { %v1705_v46 = vld [vmem:[#allocation4] sm:$0xff]  ;;  %2114 = vmatpush3.msra.mxu1 %v1709_v48 }
 0xd69   :  { %2119 = vmatprep.mubr.msk.f32.mxu1 %vm51_vm1, %v1705_v46  ;;  %2115 = vmatprep.subr.mxu1 %v1708_v7 }
 0xd6a   :  { %2116 = vmatpush3.msra.mxu1 %v1708_v7 }
 0xd6b   :  { %2117 = vmatprep.subr.mxu1 %v1707_v8 }
 0xd6c   :  { %2118 = vmatpush3.msra.mxu1 %v1707_v8 }
 0xe25   :  { %v1696_v11 = vpop.f32.mrf.mxu1 }
 0xe26   :  { %1701 = vrot.lane.b32.xlu1 %v1696_v11, %s2181_s26 }
 0xe27   :  { %v2110_v12 = vpop.f32.mrf.mxu1 }
 0xe98   :  { %v1702_v13 = vpop.permute.xlu1 %1701 }
 0xe99   :  { %1704 = vst.msk [vmem:[#allocation4 + $0x8] sm:$0xff] %vm973_vm8, %v1702_v13 }
 0xea0   :  { %v1706_v14 = vld [vmem:[#allocation4 + $0x8] sm:$0xff] }
 0xea1   :  { %2120 = vmatmul.mubr.msk.f32.vlgmr.msra.gmra.mxu1 %vm51_vm1, %v1706_v14 }
 0xf61   :  { %v2121_v16 = vpop.f32.mrf.mxu1 }
 0xf62   :  { %v1796_v17 = vadd.f32 %v2121_v16, %v1899_v15 }
 0xf63   :  { %v1790_v18 = vpop.f32.mrf.mxu1 }
 0xf64   :  { %v1791_v19 = vadd.f32 %v1899_v15, %v1790_v18  ;;  %v1802_v20 = vadd.f32 %v1796_v17, %v2275_v10 }
 0xf66   :  { %v1806_v21 = vsel %vm51_vm1, %v1802_v20, 0.0  ;;  %v1801_v22 = vadd.f32 %v1791_v19, %v2269_v9 }
 0xf67   :  { %1807 = vadd.xlane.f32.xlu1 %v1806_v21 }
 0xf68   :  { %v1803_v23 = vsel %vm51_vm1, %v1801_v22, 0.0 }
 0xf69   :  { %1804 = vadd.xlane.f32.xlu0 %v1803_v23 }
 0xff0   :  { %v1808_v24 = vpop.xlane.xlu1 %1807 }
 0xff1   :  { %v1811_v25 = vmul.f32 0.03125, %v1808_v24 }
 0xff2   :  { %v1805_v26 = vpop.xlane.xlu0 %1804 }
 0xff3   :  { %v1810_v28 = vmul.f32 0.03125, %v1805_v26  ;;  %v1813_v30 = vsub.f32 %v1802_v20, %v1811_v25 }
 0xff5   :  { %v1812_v31 = vsub.f32 %v1801_v22, %v1810_v28  ;;  %v1815_v35 = vmul.f32 %v1813_v30, %v1813_v30 }
 0xff7   :  { %v1814_v32 = vmul.f32 %v1812_v31, %v1812_v31  ;;  %v1819_v10 = vsel %vm51_vm1, %v1815_v35, 0.0 }
 0xff9   :  { %v1816_v34 = vsel %vm51_vm1, %v1814_v32, 0.0 }
 0xffa   :  { %1817 = vadd.xlane.f32.xlu0 %v1816_v34 }
 0xffe   :  { %1820 = vadd.xlane.f32.xlu0 %v1819_v10 }
0x1083   :  { %v1818_v36 = vpop.xlane.xlu0 %1817 }
0x1084   :  { %v1822_v9 = vmul.f32 0.03125, %v1818_v36 }
0x1086   :  { %v1824_v37 = vadd.f32 1e-05, %v1822_v9 }
0x1087   :  { %v1821_v38 = vpop.xlane.xlu0 %1820 }
0x1088   :  { %2166 = vrsqrt.f32 %v1824_v37  ;;  %v1823_v39 = vmul.f32 0.03125, %v1821_v38 }
0x108a   :  { %v1825_v40 = vadd.f32 1e-05, %v1823_v39 }
0x108c   :  { %2168 = vrsqrt.f32 %v1825_v40 }
0x1095   :  { %v2167_v41 = vpop.eup %2166 }
0x1096   :  { %v1828_v43 = vmul.f32 %v2167_v41, %v1812_v31 }
0x1098   :  { %v1836_v44 = vmul.f32 %v1902_v42, %v1828_v43 }
0x1099   :  { %v2169_v45 = vpop.eup %2168 }
0x109a   :  { %v1844_v47 = vadd.f32 %v1903_v33, %v1836_v44  ;;  %v1829_v49 = vmul.f32 %v2169_v45, %v1813_v30 }
0x109c   :  { %1846 = vst.msk [vmem:[%s2554_s10] sm:$0xff] %vm51_vm1, %v1844_v47  ;;  %v1837_v50 = vmul.f32 %v1902_v42, %v1829_v49 }
0x109e   :  { %v1845_v51 = vadd.f32 %v1903_v33, %v1837_v50 }
0x10a0   :  { %1847 = vst.msk [vmem:[%s2554_s10 + $0x8] sm:$0xff] %vm51_vm1, %v1845_v51 }

</bundles_post_ra>
